<compile_context>
chip_gen: v7x
topology: tpu7x:2x2x1
jax: 0.10.0
libtpu: 0.0.40
codegen_flags: <defaults>
</compile_context>

<pallas_src>
import functools

import jax
import jax.numpy as jnp
from jax import lax
from jax.experimental import pallas as pl
from jax.experimental.pallas import tpu as pltpu


def _inner_block_kernel(x_ref, w1_ref, b1_ref, w2_ref, b2_ref, out_ref,
                        cols2_ref, wm_ref, *, B, H, W):
    """Fused InnerBlock forward for B images per grid step (all refs in VMEM).

    x_ref    : (B*H*W, KP)        bf16  stage-1 im2col input (K zero-padded to KP)
    w1_ref   : (KP, C)            bf16  dw1 (x) pw1 * bn1_scale, im2col row order
    b1_ref   : (1, C)             f32   bn1 bias
    w2_ref   : (9*C, C)           bf16  dw2 (x) pw2 * bn2_scale, tap-major row order
    b2_ref   : (1, C)             f32   bn2 bias
    out_ref  : (B, H//2, W//2, C) f32
    cols2_ref: (B*H*W, 9*C)       bf16  scratch: stage-2 im2col (write-once per tap)
    wm_ref   : (B*(H//2)*W, C)    f32   scratch: W-pool, for the stride-2 subsample
    """
    C = w2_ref.shape[-1]
    Ho, Wo = H // 2, W // 2
    M = B * H * W

    # ---- Stage 1: sconv1 + BN1 (scale folded into w1) + bias + ReLU ----------------
    # One MXU matmul over all B images (batch flattened into M).
    y = jnp.dot(x_ref[...], w1_ref[...], preferred_element_type=jnp.float32)   # (M, C)
    y = jnp.maximum(y + b1_ref[...], 0.0)
    yv = y.astype(jnp.bfloat16).reshape(B, H, W, C)

    # ---- Stage 2: sconv2 + BN2 (scale folded into w2) ------------------------------
    # Build the 9 depthwise taps with shifted concats: dy shifts move the H axis
    # (leading -> free), dx shifts move the W axis (sublane merges).  Shifting the
    # explicit (B, H, W, C) axes keeps the zero padding per-image (nothing leaks
    # across the batch axis).  Each tap is stored once, lane-aligned, into the
    # (M, 9C) scratch; a SINGLE matmul contracts K = 9*C, so the MXU accumulates
    # internally -- no per-tap VMEM accumulator read-modify-write.
    zero_row = jnp.zeros((B, 1, W, C), yv.dtype)
    zero_col = jnp.zeros((B, H, 1, C), yv.dtype)
    for dy in range(3):
        if dy == 0:          # reads row h-1 (zero pad on top)
            sh = jnp.concatenate([zero_row, yv[:, :H - 1]], axis=1)
        elif dy == 1:        # reads row h
            sh = yv
        else:                # reads row h+1 (zero pad at the bottom)
            sh = jnp.concatenate([yv[:, 1:], zero_row], axis=1)
        for dx in range(3):
            if dx == 0:      # reads column w-1 (zero pad on the left)
                tap = jnp.concatenate([zero_col, sh[:, :, :W - 1]], axis=2)
            elif dx == 1:    # reads column w
                tap = sh
            else:            # reads column w+1 (zero pad on the right)
                tap = jnp.concatenate([sh[:, :, 1:], zero_col], axis=2)
            t = dy * 3 + dx
            cols2_ref[:, t * C:(t + 1) * C] = tap.reshape(M, C)

    z = jnp.dot(cols2_ref[...], w2_ref[...], preferred_element_type=jnp.float32)  # (M, C)
    z = (z + b2_ref[...]).reshape(B, Ho, 2, W, C)

    # ---- MaxPool2d(3, stride=2, padding=1) + ReLU -----------------------------------
    # NOTE: 0-padding (instead of -inf) at the borders is ONLY valid because the pool
    # is immediately followed by ReLU: relu(max(..., 0)) == relu(max(..., -inf)).
    # H direction: output row i covers rows {2i-1, 2i, 2i+1}; the (Ho, 2) split of H
    # lives on leading axes, so the stride-2 row subsample is free.
    r_even = z[:, :, 0]                                                     # rows 2i
    r_odd = z[:, :, 1]                                                      # rows 2i+1
    r_prev = jnp.concatenate([jnp.zeros((B, 1, W, C), z.dtype), r_odd[:, :Ho - 1]],
                             axis=1)                                        # rows 2i-1
    rowmax = jnp.maximum(jnp.maximum(r_even, r_odd), r_prev)                # (B, Ho, W, C)

    # W direction: two full-tile shifted maxes (VPU), then ONE stride-2 subsample of
    # the even columns via a strided read from the scratch.  With rows flattened as
    # (b, i, w), the even column w = 2j of output row (b, i, j) is exactly flat row
    # 2 * ((b*Ho + i)*Wo + j), i.e. a plain stride-2 read.
    zc = jnp.zeros((B, Ho, 1, C), rowmax.dtype)
    left = jnp.concatenate([zc, rowmax[:, :, :W - 1]], axis=2)              # column w-1
    right = jnp.concatenate([rowmax[:, :, 1:], zc], axis=2)                 # column w+1
    wm_ref[...] = jnp.maximum(jnp.maximum(rowmax, left), right).reshape(B * Ho * W, C)
    pooled = wm_ref[pl.ds(0, B * Ho * Wo, stride=2), :]                     # (B*Ho*Wo, C)
    out_ref[...] = jnp.maximum(pooled, 0.0).reshape(B, Ho, Wo, C).astype(out_ref.dtype)


@jax.jit
def inner_block(x_nchw, params):
    """Forward pass of InnerBlock.  Input/output are NCHW like PyTorch."""
    N, Cin, H, W = x_nchw.shape
    Cout = params["pw1"].shape[1]
    assert H % 2 == 0 and W % 2 == 0, "even spatial dims assumed (matches module usage)"
    assert (H * W) % 8 == 0
    Ho, Wo = H // 2, W // 2

    # Images per grid step: per-image work is tiny (~0.1 us of MXU time), so amortize
    # the ~0.35 us fixed per-grid-step overhead over several images and keep w1/w2
    # resident.  Capped at 4 so the per-step VMEM footprint stays a few MiB (safe on
    # v7x's 64 MiB physical VMEM at this 16x16 resolution).
    B_blk = 1
    for cand in (4, 2, 1):
        if N % cand == 0:
            B_blk = cand
            break
    # TODO(synk): if the grid collapses to length 1 on v7x (2 TCs), a second
    # "parallel" grid axis (H strips with a 1-row halo) would keep both TensorCores
    # busy; the same H-strip axis is also the VMEM guard needed before running this
    # kernel at much larger H, W (per-step footprint is O(B_blk*H*W*Cout)).

    # ---- wrapper glue: NCHW -> NHWC (bf16 up front), stage-1 im2col, K padded to 64 --
    # Casting to bf16 before building the taps and padding K only to 64 (not 128)
    # roughly halves the im2col HBM traffic and removes the f32 intermediates.
    x = jnp.transpose(x_nchw, (0, 2, 3, 1)).astype(jnp.bfloat16)            # NHWC bf16
    xp = jnp.pad(x, ((0, 0), (1, 1), (1, 1), (0, 0)))
    taps = [xp[:, dy:dy + H, dx:dx + W, :] for dy in range(3) for dx in range(3)]
    K9 = 9 * Cin
    KP = ((K9 + 63) // 64) * 64                                             # MXU-friendly K
    x_cols = jnp.concatenate(taps, axis=-1).reshape(N * H * W, K9)
    x_cols = jnp.pad(x_cols, ((0, 0), (0, KP - K9)))                        # bf16, (N*H*W, KP)

    # ---- fold depthwise + BN scale into the pointwise weights (bf16 for the MXU) ----
    w1 = params["dw1"][:, :, :, None] * params["pw1"][None, None, :, :]     # (3,3,Cin,Cout)
    w1 = (w1 * params["bn1_scale"][None, None, None, :]).reshape(K9, Cout)
    w1 = jnp.pad(w1, ((0, KP - K9), (0, 0))).astype(jnp.bfloat16)           # (KP, Cout)
    w2 = params["dw2"][:, :, :, None] * params["pw2"][None, None, :, :]     # (3,3,Cout,Cout)
    w2 = (w2 * params["bn2_scale"][None, None, None, :]).reshape(9 * Cout, Cout)
    w2 = w2.astype(jnp.bfloat16)                                            # (9*Cout, Cout)
    b1 = params["bn1_bias"].reshape(1, Cout).astype(jnp.float32)
    b2 = params["bn2_bias"].reshape(1, Cout).astype(jnp.float32)

    kernel = functools.partial(_inner_block_kernel, B=B_blk, H=H, W=W)
    out = pl.pallas_call(
        kernel,
        out_shape=jax.ShapeDtypeStruct((N, Ho, Wo, Cout), jnp.float32),
        grid_spec=pltpu.PrefetchScalarGridSpec(
            num_scalar_prefetch=0,
            grid=(N // B_blk,),
            in_specs=[
                pl.BlockSpec((B_blk * H * W, KP), lambda g: (g, 0)),        # im2col'ed x
                pl.BlockSpec((KP, Cout), lambda g: (0, 0)),                 # W1 (folded)
                pl.BlockSpec((1, Cout), lambda g: (0, 0)),                  # bn1 bias
                pl.BlockSpec((9 * Cout, Cout), lambda g: (0, 0)),           # W2 (folded)
                pl.BlockSpec((1, Cout), lambda g: (0, 0)),                  # bn2 bias
            ],
            out_specs=pl.BlockSpec((B_blk, Ho, Wo, Cout), lambda g: (g, 0, 0, 0)),
            scratch_shapes=[
                pltpu.VMEM((B_blk * H * W, 9 * Cout), jnp.bfloat16),        # stage-2 im2col
                pltpu.VMEM((B_blk * Ho * W, Cout), jnp.float32),            # pool subsample
            ],
        ),
        compiler_params=pltpu.CompilerParams(dimension_semantics=("parallel",)),
    )(x_cols, w1, b1, w2, b2)

    return jnp.transpose(out, (0, 3, 1, 2))                                 # back to NCHW


def init_params(key, in_channels, sconv_out=128, eps=1e-5):
    ks = jax.random.split(key, 12)

    def folded_bn(kg, kb, km, kv, c):
        gamma = 1.0 + 0.1 * jax.random.normal(kg, (c,), jnp.float32)
        beta = 0.1 * jax.random.normal(kb, (c,), jnp.float32)
        mean = 0.1 * jax.random.normal(km, (c,), jnp.float32)
        var = jax.random.uniform(kv, (c,), jnp.float32, 0.5, 1.5)
        scale = gamma / jnp.sqrt(var + eps)
        bias = beta - mean * scale
        return scale, bias

    dw1 = 0.2 * jax.random.normal(ks[0], (3, 3, in_channels), jnp.float32)
    pw1 = jax.random.normal(ks[1], (in_channels, sconv_out), jnp.float32) / jnp.sqrt(in_channels)
    bn1_scale, bn1_bias = folded_bn(ks[2], ks[3], ks[4], ks[5], sconv_out)
    dw2 = 0.2 * jax.random.normal(ks[6], (3, 3, sconv_out), jnp.float32)
    pw2 = jax.random.normal(ks[7], (sconv_out, sconv_out), jnp.float32) / jnp.sqrt(sconv_out)
    bn2_scale, bn2_bias = folded_bn(ks[8], ks[9], ks[10], ks[11], sconv_out)
    return dict(dw1=dw1, pw1=pw1, bn1_scale=bn1_scale, bn1_bias=bn1_bias,
                dw2=dw2, pw2=pw2, bn2_scale=bn2_scale, bn2_bias=bn2_bias)


def inner_block_reference(x, p):
    """Pure-JAX NCHW reference (mirrors the PyTorch module, eval-mode BN, f32)."""
    Cin = x.shape[1]
    dn = ("NCHW", "OIHW", "NCHW")

    w_dw1 = jnp.transpose(p["dw1"], (2, 0, 1))[:, None, :, :]      # (Cin,1,3,3)
    y = lax.conv_general_dilated(x, w_dw1, (1, 1), ((1, 1), (1, 1)),
                                 dimension_numbers=dn, feature_group_count=Cin)
    w_pw1 = jnp.transpose(p["pw1"], (1, 0))[:, :, None, None]      # (Cout,Cin,1,1)
    y = lax.conv_general_dilated(y, w_pw1, (1, 1), ((0, 0), (0, 0)),
                                 dimension_numbers=dn)
    y = y * p["bn1_scale"][None, :, None, None] + p["bn1_bias"][None, :, None, None]
    y = jnp.maximum(y, 0.0)

    Cout = y.shape[1]
    w_dw2 = jnp.transpose(p["dw2"], (2, 0, 1))[:, None, :, :]      # (Cout,1,3,3)
    z = lax.conv_general_dilated(y, w_dw2, (1, 1), ((1, 1), (1, 1)),
                                 dimension_numbers=dn, feature_group_count=Cout)
    w_pw2 = jnp.transpose(p["pw2"], (1, 0))[:, :, None, None]      # (Cout,Cout,1,1)
    z = lax.conv_general_dilated(z, w_pw2, (1, 1), ((0, 0), (0, 0)),
                                 dimension_numbers=dn)
    z = z * p["bn2_scale"][None, :, None, None] + p["bn2_bias"][None, :, None, None]
    z = lax.reduce_window(z, -jnp.inf, lax.max, (1, 1, 3, 3), (1, 1, 2, 2),
                          ((0, 0), (0, 0), (1, 1), (1, 1)))
    return jnp.maximum(z, 0.0)


if __name__ == "__main__":
    key = jax.random.PRNGKey(0)
    kx, kp = jax.random.split(key)

    N, CIN, H, W = 2, 4, 16, 16
    SCONV_OUT = 128   # module default

    x = jax.random.normal(kx, (N, CIN, H, W), jnp.float32)
    params = init_params(kp, CIN, SCONV_OUT)

    out = inner_block(x, params)
    out = jax.block_until_ready(out)

    ref = inner_block_reference(x, params)
    assert out.shape == ref.shape == (N, SCONV_OUT, H // 2, W // 2), out.shape
    max_err = float(jnp.max(jnp.abs(out - ref)))
    assert max_err < 3e-2, f"mismatch vs reference: max abs err = {max_err}"

    print("KERNEL_OK")
</pallas_src>

<mosaic_0001>
module attributes {stable_mosaic.version = 11 : i64} {
  func.func @_inner_block_kernel(%arg0: i32, %arg1: memref<512x64xbf16, #tpu.memory_space<vmem>>, %arg2: memref<64x128xbf16, #tpu.memory_space<vmem>>, %arg3: memref<1x128xf32, #tpu.memory_space<vmem>>, %arg4: memref<1152x128xbf16, #tpu.memory_space<vmem>>, %arg5: memref<1x128xf32, #tpu.memory_space<vmem>>, %arg6: memref<2x8x8x128xf32, #tpu.memory_space<vmem>>, %arg7: memref<512x1152xbf16, #tpu.memory_space<vmem>>, %arg8: memref<256x128xf32, #tpu.memory_space<vmem>>) attributes {dimension_semantics = [#tpu.dimension_semantics<parallel>], iteration_bounds = array<i64: 1>, scalar_prefetch = 0 : i64, scratch_operands = 2 : i64, tpu.core_type = #tpu.core_type<tc>, window_params = [{transform_indices = @transform_0, window_bounds = array<i64: 512, 64>}, {pipeline_mode = #tpu.pipeline_mode<synchronous>, transform_indices = @transform_1, window_bounds = array<i64: 64, 128>}, {pipeline_mode = #tpu.pipeline_mode<synchronous>, transform_indices = @transform_2, window_bounds = array<i64: 1, 128>}, {pipeline_mode = #tpu.pipeline_mode<synchronous>, transform_indices = @transform_3, window_bounds = array<i64: 1152, 128>}, {pipeline_mode = #tpu.pipeline_mode<synchronous>, transform_indices = @transform_4, window_bounds = array<i64: 1, 128>}, {transform_indices = @transform_5, window_bounds = array<i64: 2, 8, 8, 128>}]} {
    %c0 = arith.constant 0 : index
    %c0_0 = arith.constant 0 : index
    %0 = vector.load %arg1[%c0, %c0_0] : memref<512x64xbf16, #tpu.memory_space<vmem>>, vector<512x64xbf16>
    %c0_1 = arith.constant 0 : index
    %c0_2 = arith.constant 0 : index
    %1 = vector.load %arg2[%c0_1, %c0_2] : memref<64x128xbf16, #tpu.memory_space<vmem>>, vector<64x128xbf16>
    %cst = arith.constant dense<0.000000e+00> : vector<512x128xf32>
    %2 = tpu.matmul %0, %1, %cst {dimension_numbers = #tpu.dot_dimension_numbers<[1], [0], [0], [1], [0, 0, 1, 1], [], []>} : vector<512x64xbf16>, vector<64x128xbf16>, vector<512x128xf32> -> vector<512x128xf32>
    %c0_3 = arith.constant 0 : index
    %c0_4 = arith.constant 0 : index
    %3 = vector.load %arg3[%c0_3, %c0_4] : memref<1x128xf32, #tpu.memory_space<vmem>>, vector<1x128xf32>
    %4 = vector.broadcast %3 : vector<1x128xf32> to vector<512x128xf32>
    %5 = arith.addf %2, %4 : vector<512x128xf32>
    %cst_5 = arith.constant 0.000000e+00 : f32
    %6 = vector.broadcast %cst_5 : f32 to vector<512x128xf32>
    %7 = arith.maximumf %5, %6 : vector<512x128xf32>
    %8 = arith.truncf %7 : vector<512x128xf32> to vector<512x128xbf16>
    %9 = vector.shape_cast %8 : vector<512x128xbf16> to vector<2x16x16x128xbf16>
    %cst_6 = arith.constant 0.000000e+00 : bf16
    %10 = vector.broadcast %cst_6 : bf16 to vector<2x1x16x128xbf16>
    %cst_7 = arith.constant 0.000000e+00 : bf16
    %11 = vector.broadcast %cst_7 : bf16 to vector<2x16x1x128xbf16>
    %12 = vector.extract_strided_slice %9 {offsets = [0, 0, 0, 0], sizes = [2, 15, 16, 128], strides = [1, 1, 1, 1]} : vector<2x16x16x128xbf16> to vector<2x15x16x128xbf16>
    %13 = tpu.concatenate %10, %12 in 1 : vector<2x1x16x128xbf16>, vector<2x15x16x128xbf16> -> vector<2x16x16x128xbf16>
    %14 = vector.extract_strided_slice %13 {offsets = [0, 0, 0, 0], sizes = [2, 16, 15, 128], strides = [1, 1, 1, 1]} : vector<2x16x16x128xbf16> to vector<2x16x15x128xbf16>
    %15 = tpu.concatenate %11, %14 in 2 : vector<2x16x1x128xbf16>, vector<2x16x15x128xbf16> -> vector<2x16x16x128xbf16>
    %16 = vector.shape_cast %15 : vector<2x16x16x128xbf16> to vector<512x128xbf16>
    %c0_8 = arith.constant 0 : index
    %c0_9 = arith.constant 0 : index
    %17 = vector.load %arg7[%c0_8, %c0_9] : memref<512x1152xbf16, #tpu.memory_space<vmem>>, vector<512x128xbf16>
    tpu.vector_store %arg7[%c0_8, %c0_9], %16 {strides = array<i32>} : memref<512x1152xbf16, #tpu.memory_space<vmem>>, vector<512x128xbf16>,
    %18 = vector.shape_cast %13 : vector<2x16x16x128xbf16> to vector<512x128xbf16>
    %c0_10 = arith.constant 0 : index
    %c128 = arith.constant 128 : index
    %19 = vector.load %arg7[%c0_10, %c128] : memref<512x1152xbf16, #tpu.memory_space<vmem>>, vector<512x128xbf16>
    tpu.vector_store %arg7[%c0_10, %c128], %18 {strides = array<i32>} : memref<512x1152xbf16, #tpu.memory_space<vmem>>, vector<512x128xbf16>,
    %20 = vector.extract_strided_slice %13 {offsets = [0, 0, 1, 0], sizes = [2, 16, 15, 128], strides = [1, 1, 1, 1]} : vector<2x16x16x128xbf16> to vector<2x16x15x128xbf16>
    %21 = tpu.concatenate %20, %11 in 2 : vector<2x16x15x128xbf16>, vector<2x16x1x128xbf16> -> vector<2x16x16x128xbf16>
    %22 = vector.shape_cast %21 : vector<2x16x16x128xbf16> to vector<512x128xbf16>
    %c0_11 = arith.constant 0 : index
    %c256 = arith.constant 256 : index
    %23 = vector.load %arg7[%c0_11, %c256] : memref<512x1152xbf16, #tpu.memory_space<vmem>>, vector<512x128xbf16>
    tpu.vector_store %arg7[%c0_11, %c256], %22 {strides = array<i32>} : memref<512x1152xbf16, #tpu.memory_space<vmem>>, vector<512x128xbf16>,
    %24 = vector.extract_strided_slice %9 {offsets = [0, 0, 0, 0], sizes = [2, 16, 15, 128], strides = [1, 1, 1, 1]} : vector<2x16x16x128xbf16> to vector<2x16x15x128xbf16>
    %25 = tpu.concatenate %11, %24 in 2 : vector<2x16x1x128xbf16>, vector<2x16x15x128xbf16> -> vector<2x16x16x128xbf16>
    %26 = vector.shape_cast %25 : vector<2x16x16x128xbf16> to vector<512x128xbf16>
    %c0_12 = arith.constant 0 : index
    %c384 = arith.constant 384 : index
    %27 = vector.load %arg7[%c0_12, %c384] : memref<512x1152xbf16, #tpu.memory_space<vmem>>, vector<512x128xbf16>
    tpu.vector_store %arg7[%c0_12, %c384], %26 {strides = array<i32>} : memref<512x1152xbf16, #tpu.memory_space<vmem>>, vector<512x128xbf16>,
    %28 = vector.shape_cast %9 : vector<2x16x16x128xbf16> to vector<512x128xbf16>
    %c0_13 = arith.constant 0 : index
    %c512 = arith.constant 512 : index
    %29 = vector.load %arg7[%c0_13, %c512] : memref<512x1152xbf16, #tpu.memory_space<vmem>>, vector<512x128xbf16>
    tpu.vector_store %arg7[%c0_13, %c512], %28 {strides = array<i32>} : memref<512x1152xbf16, #tpu.memory_space<vmem>>, vector<512x128xbf16>,
    %30 = vector.extract_strided_slice %9 {offsets = [0, 0, 1, 0], sizes = [2, 16, 15, 128], strides = [1, 1, 1, 1]} : vector<2x16x16x128xbf16> to vector<2x16x15x128xbf16>
    %31 = tpu.concatenate %30, %11 in 2 : vector<2x16x15x128xbf16>, vector<2x16x1x128xbf16> -> vector<2x16x16x128xbf16>
    %32 = vector.shape_cast %31 : vector<2x16x16x128xbf16> to vector<512x128xbf16>
    %c0_14 = arith.constant 0 : index
    %c640 = arith.constant 640 : index
    %33 = vector.load %arg7[%c0_14, %c640] : memref<512x1152xbf16, #tpu.memory_space<vmem>>, vector<512x128xbf16>
    tpu.vector_store %arg7[%c0_14, %c640], %32 {strides = array<i32>} : memref<512x1152xbf16, #tpu.memory_space<vmem>>, vector<512x128xbf16>,
    %34 = vector.extract_strided_slice %9 {offsets = [0, 1, 0, 0], sizes = [2, 15, 16, 128], strides = [1, 1, 1, 1]} : vector<2x16x16x128xbf16> to vector<2x15x16x128xbf16>
    %35 = tpu.concatenate %34, %10 in 1 : vector<2x15x16x128xbf16>, vector<2x1x16x128xbf16> -> vector<2x16x16x128xbf16>
    %36 = vector.extract_strided_slice %35 {offsets = [0, 0, 0, 0], sizes = [2, 16, 15, 128], strides = [1, 1, 1, 1]} : vector<2x16x16x128xbf16> to vector<2x16x15x128xbf16>
    %37 = tpu.concatenate %11, %36 in 2 : vector<2x16x1x128xbf16>, vector<2x16x15x128xbf16> -> vector<2x16x16x128xbf16>
    %38 = vector.shape_cast %37 : vector<2x16x16x128xbf16> to vector<512x128xbf16>
    %c0_15 = arith.constant 0 : index
    %c768 = arith.constant 768 : index
    %39 = vector.load %arg7[%c0_15, %c768] : memref<512x1152xbf16, #tpu.memory_space<vmem>>, vector<512x128xbf16>
    tpu.vector_store %arg7[%c0_15, %c768], %38 {strides = array<i32>} : memref<512x1152xbf16, #tpu.memory_space<vmem>>, vector<512x128xbf16>,
    %40 = vector.shape_cast %35 : vector<2x16x16x128xbf16> to vector<512x128xbf16>
    %c0_16 = arith.constant 0 : index
    %c896 = arith.constant 896 : index
    %41 = vector.load %arg7[%c0_16, %c896] : memref<512x1152xbf16, #tpu.memory_space<vmem>>, vector<512x128xbf16>
    tpu.vector_store %arg7[%c0_16, %c896], %40 {strides = array<i32>} : memref<512x1152xbf16, #tpu.memory_space<vmem>>, vector<512x128xbf16>,
    %42 = vector.extract_strided_slice %35 {offsets = [0, 0, 1, 0], sizes = [2, 16, 15, 128], strides = [1, 1, 1, 1]} : vector<2x16x16x128xbf16> to vector<2x16x15x128xbf16>
    %43 = tpu.concatenate %42, %11 in 2 : vector<2x16x15x128xbf16>, vector<2x16x1x128xbf16> -> vector<2x16x16x128xbf16>
    %44 = vector.shape_cast %43 : vector<2x16x16x128xbf16> to vector<512x128xbf16>
    %c0_17 = arith.constant 0 : index
    %c1024 = arith.constant 1024 : index
    %45 = vector.load %arg7[%c0_17, %c1024] : memref<512x1152xbf16, #tpu.memory_space<vmem>>, vector<512x128xbf16>
    tpu.vector_store %arg7[%c0_17, %c1024], %44 {strides = array<i32>} : memref<512x1152xbf16, #tpu.memory_space<vmem>>, vector<512x128xbf16>,
    %c0_18 = arith.constant 0 : index
    %c0_19 = arith.constant 0 : index
    %46 = vector.load %arg7[%c0_18, %c0_19] : memref<512x1152xbf16, #tpu.memory_space<vmem>>, vector<512x1152xbf16>
    %c0_20 = arith.constant 0 : index
    %c0_21 = arith.constant 0 : index
    %47 = vector.load %arg4[%c0_20, %c0_21] : memref<1152x128xbf16, #tpu.memory_space<vmem>>, vector<1152x128xbf16>
    %cst_22 = arith.constant dense<0.000000e+00> : vector<512x128xf32>
    %48 = tpu.matmul %46, %47, %cst_22 {dimension_numbers = #tpu.dot_dimension_numbers<[1], [0], [0], [1], [0, 0, 1, 1], [], []>} : vector<512x1152xbf16>, vector<1152x128xbf16>, vector<512x128xf32> -> vector<512x128xf32>
    %c0_23 = arith.constant 0 : index
    %c0_24 = arith.constant 0 : index
    %49 = vector.load %arg5[%c0_23, %c0_24] : memref<1x128xf32, #tpu.memory_space<vmem>>, vector<1x128xf32>
    %50 = vector.broadcast %49 : vector<1x128xf32> to vector<512x128xf32>
    %51 = arith.addf %48, %50 : vector<512x128xf32>
    %52 = vector.shape_cast %51 : vector<512x128xf32> to vector<2x8x2x16x128xf32>
    %53 = vector.extract_strided_slice %52 {offsets = [0, 0, 0, 0, 0], sizes = [2, 8, 1, 16, 128], strides = [1, 1, 1, 1, 1]} : vector<2x8x2x16x128xf32> to vector<2x8x1x16x128xf32>
    %54 = vector.shape_cast %53 : vector<2x8x1x16x128xf32> to vector<2x8x16x128xf32>
    %55 = vector.extract_strided_slice %52 {offsets = [0, 0, 1, 0, 0], sizes = [2, 8, 1, 16, 128], strides = [1, 1, 1, 1, 1]} : vector<2x8x2x16x128xf32> to vector<2x8x1x16x128xf32>
    %56 = vector.shape_cast %55 : vector<2x8x1x16x128xf32> to vector<2x8x16x128xf32>
    %cst_25 = arith.constant 0.000000e+00 : f32
    %57 = vector.broadcast %cst_25 : f32 to vector<2x1x16x128xf32>
    %58 = vector.extract_strided_slice %56 {offsets = [0, 0, 0, 0], sizes = [2, 7, 16, 128], strides = [1, 1, 1, 1]} : vector<2x8x16x128xf32> to vector<2x7x16x128xf32>
    %59 = tpu.concatenate %57, %58 in 1 : vector<2x1x16x128xf32>, vector<2x7x16x128xf32> -> vector<2x8x16x128xf32>
    %60 = arith.maximumf %54, %56 : vector<2x8x16x128xf32>
    %61 = arith.maximumf %60, %59 : vector<2x8x16x128xf32>
    %cst_26 = arith.constant 0.000000e+00 : f32
    %62 = vector.broadcast %cst_26 : f32 to vector<2x8x1x128xf32>
    %63 = vector.extract_strided_slice %61 {offsets = [0, 0, 0, 0], sizes = [2, 8, 15, 128], strides = [1, 1, 1, 1]} : vector<2x8x16x128xf32> to vector<2x8x15x128xf32>
    %64 = tpu.concatenate %62, %63 in 2 : vector<2x8x1x128xf32>, vector<2x8x15x128xf32> -> vector<2x8x16x128xf32>
    %65 = vector.extract_strided_slice %61 {offsets = [0, 0, 1, 0], sizes = [2, 8, 15, 128], strides = [1, 1, 1, 1]} : vector<2x8x16x128xf32> to vector<2x8x15x128xf32>
    %66 = tpu.concatenate %65, %62 in 2 : vector<2x8x15x128xf32>, vector<2x8x1x128xf32> -> vector<2x8x16x128xf32>
    %67 = arith.maximumf %61, %64 : vector<2x8x16x128xf32>
    %68 = arith.maximumf %67, %66 : vector<2x8x16x128xf32>
    %69 = vector.shape_cast %68 : vector<2x8x16x128xf32> to vector<256x128xf32>
    %c0_27 = arith.constant 0 : index
    %c0_28 = arith.constant 0 : index
    %70 = vector.load %arg8[%c0_27, %c0_28] : memref<256x128xf32, #tpu.memory_space<vmem>>, vector<256x128xf32>
    tpu.vector_store %arg8[%c0_27, %c0_28], %69 {strides = array<i32>} : memref<256x128xf32, #tpu.memory_space<vmem>>, vector<256x128xf32>,
    %c0_29 = arith.constant 0 : index
    %c0_30 = arith.constant 0 : index
    %71 = tpu.strided_load %arg8[%c0_29, %c0_30] {strides = array<i32: 2, 1>} : memref<256x128xf32, #tpu.memory_space<vmem>>, vector<128x128xf32>
    %cst_31 = arith.constant 0.000000e+00 : f32
    %72 = vector.broadcast %cst_31 : f32 to vector<128x128xf32>
    %73 = arith.maximumf %71, %72 : vector<128x128xf32>
    %74 = vector.shape_cast %73 : vector<128x128xf32> to vector<2x8x8x128xf32>
    %c0_32 = arith.constant 0 : index
    %c0_33 = arith.constant 0 : index
    %c0_34 = arith.constant 0 : index
    %c0_35 = arith.constant 0 : index
    %75 = vector.load %arg6[%c0_32, %c0_33, %c0_34, %c0_35] : memref<2x8x8x128xf32, #tpu.memory_space<vmem>>, vector<2x8x8x128xf32>
    tpu.vector_store %arg6[%c0_32, %c0_33, %c0_34, %c0_35], %74 {strides = array<i32>} : memref<2x8x8x128xf32, #tpu.memory_space<vmem>>, vector<2x8x8x128xf32>,
    return
  }
  func.func @transform_0(%arg0: i32) -> (i32, i32) {
    %c0_i32 = arith.constant 0 : i32
    %c0_i32_0 = arith.constant 0 : i32
    return %arg0, %c0_i32 : i32, i32
  }
  func.func @transform_1(%arg0: i32) -> (i32, i32) {
    %c0_i32 = arith.constant 0 : i32
    %c0_i32_0 = arith.constant 0 : i32
    %c0_i32_1 = arith.constant 0 : i32
    return %c0_i32, %c0_i32_0 : i32, i32
  }
  func.func @transform_2(%arg0: i32) -> (i32, i32) {
    %c0_i32 = arith.constant 0 : i32
    %c0_i32_0 = arith.constant 0 : i32
    %c0_i32_1 = arith.constant 0 : i32
    return %c0_i32, %c0_i32_0 : i32, i32
  }
  func.func @transform_3(%arg0: i32) -> (i32, i32) {
    %c0_i32 = arith.constant 0 : i32
    %c0_i32_0 = arith.constant 0 : i32
    %c0_i32_1 = arith.constant 0 : i32
    return %c0_i32, %c0_i32_0 : i32, i32
  }
  func.func @transform_4(%arg0: i32) -> (i32, i32) {
    %c0_i32 = arith.constant 0 : i32
    %c0_i32_0 = arith.constant 0 : i32
    %c0_i32_1 = arith.constant 0 : i32
    return %c0_i32, %c0_i32_0 : i32, i32
  }
  func.func @transform_5(%arg0: i32) -> (i32, i32, i32, i32) {
    %c0_i32 = arith.constant 0 : i32
    %c0_i32_0 = arith.constant 0 : i32
    %c0_i32_1 = arith.constant 0 : i32
    %c0_i32_2 = arith.constant 0 : i32
    return %arg0, %c0_i32, %c0_i32_0, %c0_i32_1 : i32, i32, i32, i32
  }
}

</mosaic_0001>

<bundles_post_ra>
// kernel: inner_block.1
= control target key start
LH: loop header
LB: loop body
LE: loop exit
PB: predicated region body
PF: predicated region fallthrough
CT: control target
= control target key end

     0   :  { %vm285_vm0 = vcmask 523264   ;;  %v7156_v5 = vmov 0   ;;  %s7144_s0 = inlined_call_operand.vmem [shape: bf16[512,64], index: 0, kind: input, shape index: {}]   ;;  %s7145_s1 = inlined_call_operand.vmem [shape: bf16[64,128], index: 1, kind: input, shape index: {}]   ;;  %s7146_s2 = inlined_call_operand.vmem [shape: f32[1,128], index: 2, kind: input, shape index: {}]   ;;  %s7147_s3 = inlined_call_operand.vmem [shape: bf16[1152,128], index: 3, kind: input, shape index: {}]   ;;  %s7148_s4 = inlined_call_operand.vmem [shape: f32[1,128], index: 4, kind: input, shape index: {}]   ;;  %s7149_s5 = inlined_call_operand.hbm [shape: f32[2,8,8,128], index: 5, kind: output, shape index: {}]  }
   0x1   :  { %v5061_v0 = vld [vmem:[%s7145_s1] sm:$0xff]   ;;  %v5062_v1 = vld [vmem:[%s7145_s1 + $0x8] sm:$0xff]   ;;  %v5063_v2 = vld [vmem:[%s7145_s1 + $0x10] sm:$0xff]   ;;  %4641 = vmatprep.subr.bf16.mxu1 %v7156_v5 }
   0x2   :  { %4489 = vmatprep.subr.bf16.mxu0 %v5061_v0  ;;  %v5065_v3 = vld [vmem:[%s7144_s0] sm:$0xff]   ;;  %v5064_v4 = vld [vmem:[%s7145_s1 + $0x18] sm:$0xff]   ;;  %v5066_v6 = vld [vmem:[%s7144_s0 + $0x8] sm:$0xff]  }
   0x3   :  { %4490 = vmatpush3.bf16.msra.mxu0 %v5061_v0  ;;  %4497 = vmatprep.mubr.msk.bf16.mxu0 %vm285_vm0, %v5065_v3  ;;  %v5067_v7 = vld [vmem:[%s7144_s0 + $0x10] sm:$0xff]   ;;  %v5068_v8 = vld [vmem:[%s7144_s0 + $0x18] sm:$0xff]   ;;  %v5069_v9 = vld [vmem:[%s7144_s0 + $0x20] sm:$0xff]  }
   0x4   :  { %4491 = vmatprep.subr.bf16.mxu0 %v5062_v1  ;;  %v5070_v10 = vld [vmem:[%s7144_s0 + $0x28] sm:$0xff]   ;;  %v5071_v11 = vld [vmem:[%s7144_s0 + $0x30] sm:$0xff]   ;;  %v5097_v12 = vld [vmem:[%s7147_s3] sm:$0xff]  }
   0x5   :  { %v5072_v13 = vld [vmem:[%s7144_s0 + $0x38] sm:$0xff]   ;;  %v5073_v14 = vld [vmem:[%s7144_s0 + $0x40] sm:$0xff]   ;;  %v5098_v15 = vld [vmem:[%s7147_s3 + $0x8] sm:$0xff]  }
   0x6   :  { %v5099_v16 = vld [vmem:[%s7147_s3 + $0x10] sm:$0xff]   ;;  %v5074_v17 = vld [vmem:[%s7144_s0 + $0x48] sm:$0xff]   ;;  %v5100_v19 = vld [vmem:[%s7147_s3 + $0x18] sm:$0xff]  }
   0x7   :  { %4492 = vmatpush3.bf16.msra.mxu0 %v5062_v1  ;;  %v5075_v18 = vld [vmem:[%s7144_s0 + $0x50] sm:$0xff]   ;;  %v5101_v20 = vld [vmem:[%s7147_s3 + $0x20] sm:$0xff]   ;;  %v5076_v21 = vld [vmem:[%s7144_s0 + $0x58] sm:$0xff]  }
   0x8   :  { %4493 = vmatprep.subr.bf16.mxu0 %v5063_v2  ;;  %v5077_v22 = vld [vmem:[%s7144_s0 + $0x60] sm:$0xff]   ;;  %v5102_v23 = vld [vmem:[%s7147_s3 + $0x28] sm:$0xff]   ;;  %v5103_v24 = vld [vmem:[%s7147_s3 + $0x30] sm:$0xff]  }
   0x9   :  { %v5078_v25 = vld [vmem:[%s7144_s0 + $0x68] sm:$0xff]   ;;  %v5079_v26 = vld [vmem:[%s7144_s0 + $0x70] sm:$0xff]   ;;  %v5104_v27 = vld [vmem:[%s7147_s3 + $0x38] sm:$0xff]  }
   0xa   :  { %v5105_v28 = vld [vmem:[%s7147_s3 + $0x40] sm:$0xff]   ;;  %v5080_v29 = vld [vmem:[%s7144_s0 + $0x78] sm:$0xff]   ;;  %v5106_v31 = vld [vmem:[%s7147_s3 + $0x48] sm:$0xff]  }
   0xb   :  { %4494 = vmatpush3.bf16.msra.mxu0 %v5063_v2  ;;  %v5081_v30 = vld [vmem:[%s7144_s0 + $0x80] sm:$0xff]   ;;  %v5107_v32 = vld [vmem:[%s7147_s3 + $0x50] sm:$0xff]   ;;  %v5082_v33 = vld [vmem:[%s7144_s0 + $0x88] sm:$0xff]  }
   0xc   :  { %4495 = vmatprep.subr.bf16.mxu0 %v5064_v4  ;;  %v5083_v34 = vld [vmem:[%s7144_s0 + $0x90] sm:$0xff]   ;;  %v5108_v35 = vld [vmem:[%s7147_s3 + $0x58] sm:$0xff]   ;;  %v5109_v36 = vld [vmem:[%s7147_s3 + $0x60] sm:$0xff]  }
   0xd   :  { %v5084_v37 = vld [vmem:[%s7144_s0 + $0x98] sm:$0xff]   ;;  %v5085_v38 = vld [vmem:[%s7144_s0 + $0xa0] sm:$0xff]   ;;  %v5110_v39 = vld [vmem:[%s7147_s3 + $0x68] sm:$0xff]  }
   0xf   :  { %4496 = vmatpush3.bf16.msra.mxu0 %v5064_v4 }
  0x10   :  { %2361 = vmatprep.subr.bf16.mxu0 %v7156_v5 }
  0x12   :  { %4498 = vmatmul.mubr.msk.bf16.vlgmr.msra.gmra.mrb[0].mxu0 %vm285_vm0, %v5066_v6 }
  0x13   :  { %4501 = vmatprep.mubr.msk.bf16.mxu0 %vm285_vm0, %v5067_v7  ;;  %2362 = vmatpush1.bf16.msra.mxu0 %v5097_v12 }
  0x14   :  { %2363 = vmatprep.subr.bf16.mxu0 %v7156_v5 }
  0x17   :  { %2364 = vmatpush1.bf16.msra.mxu0 %v5098_v15 }
  0x18   :  { %2365 = vmatprep.subr.bf16.mxu0 %v7156_v5 }
  0x1a   :  { %4502 = vmatmul.mubr.msk.bf16.gmra.mrb[4].mxu0 %vm285_vm0, %v5068_v8 }
  0x1b   :  { %4505 = vmatprep.mubr.msk.bf16.mxu0 %vm285_vm0, %v5069_v9  ;;  %2366 = vmatpush1.bf16.msra.mxu0 %v5099_v16 }
  0x1c   :  { %2367 = vmatprep.subr.bf16.mxu0 %v7156_v5 }
  0x1f   :  { %2368 = vmatpush1.bf16.msra.mxu0 %v5100_v19 }
  0x20   :  { %2369 = vmatprep.subr.bf16.mxu0 %v7156_v5 }
  0x22   :  { %4506 = vmatmul.mubr.msk.bf16.gmra.mrb[8].mxu0 %vm285_vm0, %v5070_v10 }
  0x23   :  { %4509 = vmatprep.mubr.msk.bf16.mxu0 %vm285_vm0, %v5071_v11  ;;  %2370 = vmatpush1.bf16.msra.mxu0 %v5101_v20 }
  0x24   :  { %2371 = vmatprep.subr.bf16.mxu0 %v7156_v5 }
  0x27   :  { %2372 = vmatpush1.bf16.msra.mxu0 %v5102_v23 }
  0x28   :  { %2373 = vmatprep.subr.bf16.mxu0 %v7156_v5 }
  0x2a   :  { %4510 = vmatmul.mubr.msk.bf16.gmra.mrb[12].mxu0 %vm285_vm0, %v5072_v13 }
  0x2b   :  { %4513 = vmatprep.mubr.msk.bf16.mxu0 %vm285_vm0, %v5073_v14  ;;  %2374 = vmatpush1.bf16.msra.mxu0 %v5103_v24 }
  0x2c   :  { %2375 = vmatprep.subr.bf16.mxu0 %v7156_v5 }
  0x2f   :  { %2376 = vmatpush1.bf16.msra.mxu0 %v5104_v27 }
  0x30   :  { %2377 = vmatprep.subr.bf16.mxu0 %v7156_v5 }
  0x32   :  { %4514 = vmatmul.mubr.msk.bf16.gmra.mrb[16].mxu0 %vm285_vm0, %v5074_v17 }
  0x33   :  { %4517 = vmatprep.mubr.msk.bf16.mxu0 %vm285_vm0, %v5075_v18  ;;  %2378 = vmatpush1.bf16.msra.mxu0 %v5105_v28 }
  0x34   :  { %2379 = vmatprep.subr.bf16.mxu0 %v7156_v5 }
  0x37   :  { %2380 = vmatpush1.bf16.msra.mxu0 %v5106_v31 }
  0x38   :  { %2381 = vmatprep.subr.bf16.mxu0 %v7156_v5 }
  0x3a   :  { %4518 = vmatmul.mubr.msk.bf16.gmra.mrb[20].mxu0 %vm285_vm0, %v5076_v21 }
  0x3b   :  { %4521 = vmatprep.mubr.msk.bf16.mxu0 %vm285_vm0, %v5077_v22  ;;  %2382 = vmatpush1.bf16.msra.mxu0 %v5107_v32 }
  0x3c   :  { %2383 = vmatprep.subr.bf16.mxu0 %v7156_v5 }
  0x3f   :  { %2384 = vmatpush1.bf16.msra.mxu0 %v5108_v35 }
  0x40   :  { %2385 = vmatprep.subr.bf16.mxu0 %v7156_v5 }
  0x42   :  { %4522 = vmatmul.mubr.msk.bf16.gmra.mrb[24].mxu0 %vm285_vm0, %v5078_v25 }
  0x43   :  { %4525 = vmatprep.mubr.msk.bf16.mxu0 %vm285_vm0, %v5079_v26  ;;  %2386 = vmatpush1.bf16.msra.mxu0 %v5109_v36 }
  0x44   :  { %2387 = vmatprep.subr.bf16.mxu0 %v7156_v5 }
  0x4a   :  { %4526 = vmatmul.mubr.msk.bf16.gmra.mrb[28].mxu0 %vm285_vm0, %v5080_v29 }
  0x4b   :  { %4529 = vmatprep.mubr.msk.bf16.mxu0 %vm285_vm0, %v5081_v30 }
  0x52   :  { %4530 = vmatmul.mubr.msk.bf16.gmra.mrb[32].mxu0 %vm285_vm0, %v5082_v33 }
  0x53   :  { %4533 = vmatprep.mubr.msk.bf16.mxu0 %vm285_vm0, %v5083_v34 }
  0x54   :  { %10 = vsyncpa [#allocation5], 0  ;;  %2388 = vmatpush1.bf16.msra.mxu0 %v5110_v39  ;;  %v5086_v40 = vld [vmem:[%s7144_s0 + $0xa8] sm:$0xff]   ;;  %v5087_v41 = vld [vmem:[%s7144_s0 + $0xb0] sm:$0xff]   ;;  %vm1015_vm1 = vcmask 1040384   ;;  %v770_v57 = vrot.slane %v7156_v5, 7 }
  0x55   :  { %2389 = vmatprep.subr.bf16.mxu0 %v7156_v5  ;;  %v5111_v42 = vld [vmem:[%s7147_s3 + $0x70] sm:$0xff]   ;;  %v5088_v43 = vld [vmem:[%s7144_s0 + $0xb8] sm:$0xff]   ;;  %v5089_v44 = vld [vmem:[%s7144_s0 + $0xc0] sm:$0xff]   ;;  %vm1016_vm2 = vsmask.f32 256  ;;  %vm1206_vm4 = vcmask 1047552  }
  0x56   :  { %v5112_v45 = vld [vmem:[%s7147_s3 + $0x78] sm:$0xff]   ;;  %v5090_v46 = vld [vmem:[%s7144_s0 + $0xc8] sm:$0xff]   ;;  %v5091_v47 = vld [vmem:[%s7144_s0 + $0xd0] sm:$0xff]   ;;  %vm1207_vm5 = vsmask.f32 7424  ;;  %vm3999_vm7 = vcmask 1046528  }
  0x57   :  { %v5092_v48 = vld [vmem:[%s7144_s0 + $0xd8] sm:$0xff]   ;;  %v5093_v49 = vld [vmem:[%s7144_s0 + $0xe0] sm:$0xff]   ;;  %v5094_v51 = vld [vmem:[%s7144_s0 + $0xe8] sm:$0xff]  }
  0x58   :  { %2390 = vmatpush1.bf16.msra.mxu0 %v5111_v42  ;;  %v5113_v50 = vld [vmem:[%s7147_s3 + $0x80] sm:$0xff]   ;;  %v5095_v52 = vld [vmem:[%s7144_s0 + $0xf0] sm:$0xff]   ;;  %v5114_v53 = vld [vmem:[%s7147_s3 + $0x88] sm:$0xff]  }
  0x59   :  { %2391 = vmatprep.subr.bf16.mxu0 %v7156_v5  ;;  %4657 = vmatpush1.bf16.msra.mxu1 %v5113_v50  ;;  %v5115_v54 = vld [vmem:[%s7147_s3 + $0x90] sm:$0xff]   ;;  %v5096_v55 = vld [vmem:[%s7144_s0 + $0xf8] sm:$0xff]   ;;  %vm5452_vm3 = vmand %vm1015_vm1, %vm1016_vm2 }
  0x5a   :  { %4534 = vmatmul.mubr.msk.bf16.gmra.mrb[36].mxu0 %vm285_vm0, %v5084_v37  ;;  %4642 = vmatprep.subr.bf16.mxu1 %v7156_v5  ;;  %v5116_v56 = vld [vmem:[%s7147_s3 + $0x98] sm:$0xff]   ;;  %v5117_v59 = vld [vmem:[%s7147_s3 + $0xa0] sm:$0xff]   ;;  %v5462_v60 = vsel %vm5452_vm3, 0, %v770_v57  ;;  %v5118_v61 = vld [vmem:[%s7147_s3 + $0xa8] sm:$0xff]  }
  0x5b   :  { %4537 = vmatprep.mubr.msk.bf16.mxu0 %vm285_vm0, %v5085_v38  ;;  %7270 = vst [vmem:[#allocation7_spill] sm:$0xff] %v5462_v60  ;;  %v5119_v62 = vld [vmem:[%s7147_s3 + $0xb0] sm:$0xff]   ;;  %v5120_v63 = vld [vmem:[%s7147_s3 + $0xb8] sm:$0xff]   ;;  %v5121_v0 = vld [vmem:[%s7147_s3 + $0xc0] sm:$0xff]  }
  0x5c   :  { %2392 = vmatpush1.bf16.msra.mxu0 %v5112_v45  ;;  %v5122_v1 = vld [vmem:[%s7147_s3 + $0xc8] sm:$0xff]   ;;  %v5123_v2 = vld [vmem:[%s7147_s3 + $0xd0] sm:$0xff]   ;;  %v5124_v3 = vld [vmem:[%s7147_s3 + $0xd8] sm:$0xff]  }
  0x5d   :  { %2650 = vmatprep.subr.bf16.mxu0 %v7156_v5  ;;  %4658 = vmatpush1.bf16.msra.mxu1 %v5114_v53  ;;  %v5125_v4 = vld [vmem:[%s7147_s3 + $0xe0] sm:$0xff]   ;;  %v5126_v6 = vld [vmem:[%s7147_s3 + $0xe8] sm:$0xff]   ;;  %v5127_v7 = vld [vmem:[%s7147_s3 + $0xf0] sm:$0xff]  }
  0x5e   :  { %4643 = vmatprep.subr.bf16.mxu1 %v7156_v5  ;;  %v5128_v8 = vld [vmem:[%s7147_s3 + $0xf8] sm:$0xff]   ;;  %v5528_v9 = vld [vmem:[%s7146_s2] ss:$0 sm:$0xff]  ;;  %vm5836_vm6 = vmand %vm1206_vm4, %vm1207_vm5 }
  0x61   :  { %4659 = vmatpush1.bf16.msra.mxu1 %v5115_v54 }
  0x62   :  { %4538 = vmatmul.mubr.msk.bf16.gmra.mrb[40].mxu0 %vm285_vm0, %v5086_v40  ;;  %4644 = vmatprep.subr.bf16.mxu1 %v7156_v5 }
  0x63   :  { %4541 = vmatprep.mubr.msk.bf16.mxu0 %vm285_vm0, %v5087_v41 }
  0x65   :  { %4660 = vmatpush1.bf16.msra.mxu1 %v5116_v56 }
  0x66   :  { %4645 = vmatprep.subr.bf16.mxu1 %v7156_v5 }
  0x69   :  { %4661 = vmatpush1.bf16.msra.mxu1 %v5117_v59 }
  0x6a   :  { %4542 = vmatmul.mubr.msk.bf16.gmra.mrb[44].mxu0 %vm285_vm0, %v5088_v43  ;;  %4646 = vmatprep.subr.bf16.mxu1 %v7156_v5 }
  0x6b   :  { %4545 = vmatprep.mubr.msk.bf16.mxu0 %vm285_vm0, %v5089_v44 }
  0x6d   :  { %4662 = vmatpush1.bf16.msra.mxu1 %v5118_v61 }
  0x6e   :  { %4647 = vmatprep.subr.bf16.mxu1 %v7156_v5 }
  0x71   :  { %4663 = vmatpush1.bf16.msra.mxu1 %v5119_v62 }
  0x72   :  { %4546 = vmatmul.mubr.msk.bf16.gmra.mrb[48].mxu0 %vm285_vm0, %v5090_v46  ;;  %4648 = vmatprep.subr.bf16.mxu1 %v7156_v5 }
  0x73   :  { %4549 = vmatprep.mubr.msk.bf16.mxu0 %vm285_vm0, %v5091_v47 }
  0x75   :  { %4664 = vmatpush1.bf16.msra.mxu1 %v5120_v63 }
  0x76   :  { %4649 = vmatprep.subr.bf16.mxu1 %v7156_v5 }
  0x79   :  { %4665 = vmatpush1.bf16.msra.mxu1 %v5121_v0 }
  0x7a   :  { %4550 = vmatmul.mubr.msk.bf16.gmra.mrb[52].mxu0 %vm285_vm0, %v5092_v48  ;;  %4650 = vmatprep.subr.bf16.mxu1 %v7156_v5 }
  0x7b   :  { %4553 = vmatprep.mubr.msk.bf16.mxu0 %vm285_vm0, %v5093_v49 }
  0x7d   :  { %4666 = vmatpush1.bf16.msra.mxu1 %v5122_v1 }
  0x7e   :  { %4651 = vmatprep.subr.bf16.mxu1 %v7156_v5 }
  0x81   :  { %4667 = vmatpush1.bf16.msra.mxu1 %v5123_v2 }
  0x82   :  { %4554 = vmatmul.mubr.msk.bf16.gmra.mrb[56].mxu0 %vm285_vm0, %v5094_v51  ;;  %4652 = vmatprep.subr.bf16.mxu1 %v7156_v5 }
  0x83   :  { %4557 = vmatprep.mubr.msk.bf16.mxu0 %vm285_vm0, %v5095_v52 }
  0x85   :  { %4668 = vmatpush1.bf16.msra.mxu1 %v5124_v3 }
  0x86   :  { %4653 = vmatprep.subr.bf16.mxu1 %v7156_v5 }
  0x89   :  { %4669 = vmatpush1.bf16.msra.mxu1 %v5125_v4 }
  0x8a   :  { %4558 = vmatmul.mubr.msk.bf16.gmra.mrb[60].mxu0 %vm285_vm0, %v5096_v55  ;;  %4654 = vmatprep.subr.bf16.mxu1 %v7156_v5 }
  0x8b   :  { %2393 = vmatprep.mubr.bf16.mxu0 %v7156_v5 }
  0x8d   :  { %4670 = vmatpush1.bf16.msra.mxu1 %v5126_v6 }
  0x8e   :  { %4655 = vmatprep.subr.bf16.mxu1 %v7156_v5 }
  0x91   :  { %4671 = vmatpush1.bf16.msra.mxu1 %v5127_v7 }
  0x92   :  { %2394 = vmatmul.mubr.bf16.vlgmr.msra.gmra.mrb[64].mxu0 %v5462_v60  ;;  %4656 = vmatprep.subr.bf16.mxu1 %v7156_v5 }
  0x93   :  { %2651 = vmatpush1.bf16.msra.mxu0 %v5113_v50 }
  0x94   :  { %2652 = vmatprep.subr.bf16.mxu0 %v7156_v5 }
  0x95   :  { %4672 = vmatpush1.bf16.msra.mxu1 %v5128_v8 }
  0x96   :  { %2939 = vmatprep.subr.bf16.mxu1 %v7156_v5 }
  0x97   :  { %2653 = vmatpush1.bf16.msra.mxu0 %v5114_v53 }
  0x98   :  { %2654 = vmatprep.subr.bf16.mxu0 %v7156_v5 }
  0x9b   :  { %2655 = vmatpush1.bf16.msra.mxu0 %v5115_v54 }
  0x9c   :  { %2656 = vmatprep.subr.bf16.mxu0 %v7156_v5 }
  0x9f   :  { %2657 = vmatpush1.bf16.msra.mxu0 %v5116_v56 }
  0xa0   :  { %2658 = vmatprep.subr.bf16.mxu0 %v7156_v5 }
  0xa3   :  { %2659 = vmatpush1.bf16.msra.mxu0 %v5117_v59 }
  0xa4   :  { %2660 = vmatprep.subr.bf16.mxu0 %v7156_v5 }
  0xa7   :  { %2661 = vmatpush1.bf16.msra.mxu0 %v5118_v61 }
  0xa8   :  { %2662 = vmatprep.subr.bf16.mxu0 %v7156_v5 }
  0xab   :  { %2663 = vmatpush1.bf16.msra.mxu0 %v5119_v62 }
  0xac   :  { %2664 = vmatprep.subr.bf16.mxu0 %v7156_v5 }
  0xaf   :  { %2665 = vmatpush1.bf16.msra.mxu0 %v5120_v63 }
  0xb0   :  { %2666 = vmatprep.subr.bf16.mxu0 %v7156_v5 }
  0xb3   :  { %2667 = vmatpush1.bf16.msra.mxu0 %v5121_v0 }
  0xb4   :  { %2668 = vmatprep.subr.bf16.mxu0 %v7156_v5 }
  0xb7   :  { %2669 = vmatpush1.bf16.msra.mxu0 %v5122_v1 }
  0xb8   :  { %2670 = vmatprep.subr.bf16.mxu0 %v7156_v5 }
  0xbb   :  { %2671 = vmatpush1.bf16.msra.mxu0 %v5123_v2 }
  0xbc   :  { %2672 = vmatprep.subr.bf16.mxu0 %v7156_v5 }
  0xbf   :  { %2673 = vmatpush1.bf16.msra.mxu0 %v5124_v3 }
  0xc0   :  { %2674 = vmatprep.subr.bf16.mxu0 %v7156_v5 }
  0xc3   :  { %2675 = vmatpush1.bf16.msra.mxu0 %v5125_v4 }
  0xc4   :  { %2676 = vmatprep.subr.bf16.mxu0 %v7156_v5 }
  0xc7   :  { %2677 = vmatpush1.bf16.msra.mxu0 %v5126_v6 }
  0xc8   :  { %2678 = vmatprep.subr.bf16.mxu0 %v7156_v5 }
  0xcb   :  { %2679 = vmatpush1.bf16.msra.mxu0 %v5127_v7 }
  0xcc   :  { %2680 = vmatprep.subr.bf16.mxu0 %v7156_v5 }
  0xcf   :  { %2681 = vmatpush1.bf16.msra.mxu0 %v5128_v8 }
  0xe5   :  { %v4499_v10 = vpop.f32.mrb[0].mxu0 }
  0xe6   :  { %v425_v11 = vadd.f32 %v4499_v10, %v5528_v9  ;;  %v416_v12 = vpop.f32.mrb[1].mxu0 }
  0xe7   :  { %v417_v13 = vadd.f32 %v5528_v9, %v416_v12  ;;  %v4500_v14 = vpop.f32.mrb[2].mxu0 }
  0xe8   :  { %v428_v15 = vadd.f32 %v4500_v14, %v5528_v9  ;;  %v419_v16 = vpop.f32.mrb[3].mxu0  ;;  %v673_v18 = vmax.f32 %v425_v11, 0.0 }
  0xe9   :  { %v420_v17 = vadd.f32 %v5528_v9, %v419_v16  ;;  %v671_v20 = vmax.f32 %v417_v13, 0.0 }
  0xea   :  { %v674_v19 = vmax.f32 %v428_v15, 0.0 }
  0xeb   :  { %v672_v21 = vmax.f32 %v420_v17, 0.0 }
  0xec   :  { %v5534_v22 = vpack.c.bf16 %v674_v19, %v673_v18 }
  0xed   :  { %v5536_v23 = vpack.c.bf16 %v672_v21, %v671_v20  ;;  %v4503_v24 = vpop.f32.mrb[4].mxu0 }
  0xee   :  { %v441_v25 = vadd.f32 %v4503_v24, %v5528_v9  ;;  %v432_v26 = vpop.f32.mrb[5].mxu0  ;;  %v785_v27 = vshll.u32 %v5534_v22, 16  ;;  %v782_v34 = vshrl.u32 %v5534_v22, 16 }
  0xef   :  { %v433_v28 = vadd.f32 %v5528_v9, %v432_v26  ;;  %v4504_v29 = vpop.f32.mrb[6].mxu0  ;;  %2401 = vmatprep.mubr.bf16.mxu0 %v5536_v23  ;;  %v775_v30 = vshrl.u32 %v5536_v23, 16  ;;  %v778_v31 = vshll.u32 %v5536_v23, 16 }
  0xf0   :  { %v444_v32 = vadd.f32 %v4504_v29, %v5528_v9  ;;  %v435_v33 = vpop.f32.mrb[7].mxu0  ;;  %v1117_v35 = vrot.slane %v785_v27, 1  ;;  %v677_v39 = vmax.f32 %v441_v25, 0.0  ;;  %v784_v50 = vrot.slane %v782_v34, 7 }
  0xf1   :  { %v436_v36 = vadd.f32 %v5528_v9, %v435_v33  ;;  %v777_v37 = vrot.slane %v775_v30, 7  ;;  %v1115_v38 = vrot.slane %v778_v31, 1  ;;  %v675_v42 = vmax.f32 %v433_v28, 0.0 }
  0xf2   :  { %v678_v40 = vmax.f32 %v444_v32, 0.0  ;;  %v5547_v41 = vor.u32 %v1117_v35, %v782_v34  ;;  %v787_v0 = vor.u32 %v785_v27, %v784_v50 }
  0xf3   :  { %v676_v43 = vmax.f32 %v436_v36, 0.0  ;;  %v780_v44 = vor.u32 %v778_v31, %v777_v37  ;;  %v5549_v45 = vor.u32 %v1115_v38, %v775_v30 }
  0xf4   :  { %v5551_v46 = vpack.c.bf16 %v678_v40, %v677_v39  ;;  %v5581_v14 = vsel %vm5452_vm3, 0, %v787_v0 }
  0xf5   :  { %v5553_v47 = vpack.c.bf16 %v676_v43, %v675_v42  ;;  %v4507_v48 = vpop.f32.mrb[8].mxu0  ;;  %v5557_v49 = vsel %vm5452_vm3, 0, %v780_v44  ;;  %7272 = vst [vmem:[#allocation9_spill] sm:$0xff] %v5581_v14 }
  0xf6   :  { %7271 = vst [vmem:[#allocation8_spill] sm:$0xff] %v5557_v49  ;;  %v457_v51 = vadd.f32 %v4507_v48, %v5528_v9  ;;  %v448_v52 = vpop.f32.mrb[9].mxu0  ;;  %2402 = vmatmul.mubr.bf16.gmra.mrb[68].mxu0 %v5557_v49  ;;  %v799_v53 = vshll.u32 %v5551_v46, 16  ;;  %v796_v61 = vshrl.u32 %v5551_v46, 16 }
  0xf7   :  { %v449_v54 = vadd.f32 %v5528_v9, %v448_v52  ;;  %v4508_v55 = vpop.f32.mrb[10].mxu0  ;;  %2409 = vmatprep.mubr.bf16.mxu0 %v5534_v22  ;;  %v792_v56 = vshll.u32 %v5553_v47, 16  ;;  %v789_v1 = vshrl.u32 %v5553_v47, 16 }
  0xf8   :  { %v460_v57 = vadd.f32 %v4508_v55, %v5528_v9  ;;  %v451_v59 = vpop.f32.mrb[11].mxu0  ;;  %v1121_v62 = vrot.slane %v799_v53, 1  ;;  %v681_v3 = vmax.f32 %v457_v51, 0.0  ;;  %v798_v43 = vrot.slane %v796_v61, 7 }
  0xf9   :  { %v452_v63 = vadd.f32 %v5528_v9, %v451_v59  ;;  %v1119_v2 = vrot.slane %v792_v56, 1  ;;  %v679_v7 = vmax.f32 %v449_v54, 0.0  ;;  %v791_v15 = vrot.slane %v789_v1, 7 }
  0xfa   :  { %v682_v4 = vmax.f32 %v460_v57, 0.0  ;;  %v5571_v6 = vor.u32 %v1121_v62, %v796_v61  ;;  %v801_v62 = vor.u32 %v799_v53, %v798_v43 }
  0xfb   :  { %v680_v8 = vmax.f32 %v452_v63, 0.0  ;;  %v5573_v10 = vor.u32 %v1119_v2, %v789_v1  ;;  %v794_v29 = vor.u32 %v792_v56, %v791_v15 }
  0xfc   :  { %v5575_v11 = vpack.c.bf16 %v682_v4, %v681_v3 }
  0xfd   :  { %v5577_v12 = vpack.c.bf16 %v680_v8, %v679_v7  ;;  %v4511_v13 = vpop.f32.mrb[12].mxu0  ;;  %v5607_v42 = vsel %vm5452_vm3, 0, %v794_v29 }
  0xfe   :  { %v473_v16 = vadd.f32 %v4511_v13, %v5528_v9  ;;  %v464_v17 = vpop.f32.mrb[13].mxu0  ;;  %2410 = vmatmul.mubr.bf16.gmra.mrb[72].mxu0 %v5581_v14  ;;  %v813_v18 = vshll.u32 %v5575_v11, 16  ;;  %v810_v26 = vshrl.u32 %v5575_v11, 16  ;;  %7273 = vst [vmem:[#allocation10_spill] sm:$0xff] %v5607_v42 }
  0xff   :  { %v465_v19 = vadd.f32 %v5528_v9, %v464_v17  ;;  %v4512_v20 = vpop.f32.mrb[14].mxu0  ;;  %2417 = vmatprep.mubr.bf16.mxu0 %v5553_v47  ;;  %v806_v21 = vshll.u32 %v5577_v12, 16  ;;  %v803_v30 = vshrl.u32 %v5577_v12, 16 }
 0x100   :  { %v476_v24 = vadd.f32 %v4512_v20, %v5528_v9  ;;  %v467_v25 = vpop.f32.mrb[15].mxu0  ;;  %v1125_v27 = vrot.slane %v813_v18, 1  ;;  %v685_v32 = vmax.f32 %v473_v16, 0.0  ;;  %v5639_v16 = vsel %vm5452_vm3, 0, %v801_v62 }
 0x101   :  { %v468_v28 = vadd.f32 %v5528_v9, %v467_v25  ;;  %v1123_v31 = vrot.slane %v806_v21, 1  ;;  %v683_v35 = vmax.f32 %v465_v19, 0.0  ;;  %7276 = vst [vmem:[#allocation13_spill] sm:$0xff] %v5639_v16  ;;  %v805_v17 = vrot.slane %v803_v30, 7 }
 0x102   :  { %v686_v33 = vmax.f32 %v476_v24, 0.0  ;;  %v5597_v34 = vor.u32 %v1125_v27, %v810_v26  ;;  %v812_v62 = vrot.slane %v810_v26, 7 }
 0x103   :  { %v684_v36 = vmax.f32 %v468_v28, 0.0  ;;  %v5599_v37 = vor.u32 %v1123_v31, %v803_v30 }
 0x104   :  { %v5601_v38 = vpack.c.bf16 %v686_v33, %v685_v32 }
 0x105   :  { %v5603_v39 = vpack.c.bf16 %v684_v36, %v683_v35  ;;  %v4515_v40 = vpop.f32.mrb[16].mxu0  ;;  %v808_v35 = vor.u32 %v806_v21, %v805_v17 }
 0x106   :  { %v489_v44 = vadd.f32 %v4515_v40, %v5528_v9  ;;  %v480_v48 = vpop.f32.mrb[17].mxu0  ;;  %2418 = vmatmul.mubr.bf16.gmra.mrb[76].mxu0 %v5607_v42  ;;  %v827_v50 = vshll.u32 %v5601_v38, 16  ;;  %v824_v57 = vshrl.u32 %v5601_v38, 16 }
 0x107   :  { %v481_v51 = vadd.f32 %v5528_v9, %v480_v48  ;;  %v4516_v52 = vpop.f32.mrb[18].mxu0  ;;  %2425 = vmatprep.mubr.bf16.mxu0 %v5551_v46  ;;  %v820_v54 = vshll.u32 %v5603_v39, 16  ;;  %v817_v63 = vshrl.u32 %v5603_v39, 16 }
 0x108   :  { %v492_v55 = vadd.f32 %v4516_v52, %v5528_v9  ;;  %v483_v56 = vpop.f32.mrb[19].mxu0  ;;  %v1129_v59 = vrot.slane %v827_v50, 1  ;;  %v689_v1 = vmax.f32 %v489_v44, 0.0 }
 0x109   :  { %v484_v61 = vadd.f32 %v5528_v9, %v483_v56  ;;  %v1127_v0 = vrot.slane %v820_v54, 1  ;;  %v687_v4 = vmax.f32 %v481_v51, 0.0 }
 0x10a   :  { %v690_v2 = vmax.f32 %v492_v55, 0.0  ;;  %v5627_v3 = vor.u32 %v1129_v59, %v824_v57 }
 0x10b   :  { %v688_v7 = vmax.f32 %v484_v61, 0.0  ;;  %v5631_v8 = vor.u32 %v1127_v0, %v817_v63  ;;  %v5669_v61 = vsel %vm5452_vm3, 0, %v808_v35 }
 0x10c   :  { %v5633_v13 = vpack.c.bf16 %v690_v2, %v689_v1  ;;  %7281 = vst [vmem:[#allocation18_spill] sm:$0xff] %v5669_v61 }
 0x10d   :  { %v5635_v53 = vpack.c.bf16 %v688_v7, %v687_v4  ;;  %v4519_v15 = vpop.f32.mrb[20].mxu0 }
 0x10e   :  { %7274 = vst [vmem:[#allocation11_spill] sm:$0xff] %v5633_v13  ;;  %v505_v19 = vadd.f32 %v4519_v15, %v5528_v9  ;;  %v496_v20 = vpop.f32.mrb[21].mxu0  ;;  %2426 = vmatmul.mubr.bf16.gmra.mrb[80].mxu0 %v5639_v16  ;;  %v7164_v24 = vshll.u32 %v5633_v13, 16  ;;  %v7165_v32 = vshrl.u32 %v5633_v13, 16 }
 0x10f   :  { %7275 = vst [vmem:[#allocation12_spill] sm:$0xff] %v5635_v53  ;;  %v497_v25 = vadd.f32 %v5528_v9, %v496_v20  ;;  %v4520_v27 = vpop.f32.mrb[22].mxu0  ;;  %2433 = vmatprep.mubr.bf16.mxu0 %v5577_v12  ;;  %v834_v28 = vshll.u32 %v5635_v53, 16  ;;  %v831_v36 = vshrl.u32 %v5635_v53, 16 }
 0x110   :  { %v508_v29 = vadd.f32 %v4520_v27, %v5528_v9  ;;  %v499_v31 = vpop.f32.mrb[23].mxu0  ;;  %v1133_v30 = vrot.slane %v7164_v24, 1  ;;  %v693_v43 = vmax.f32 %v505_v19, 0.0  ;;  %v815_v27 = vor.u32 %v813_v18, %v812_v62 }
 0x111   :  { %v500_v33 = vadd.f32 %v5528_v9, %v499_v31  ;;  %v1131_v40 = vrot.slane %v834_v28, 1  ;;  %v691_v51 = vmax.f32 %v497_v25, 0.0  ;;  %v819_v62 = vrot.slane %v817_v63, 7 }
 0x112   :  { %v694_v44 = vmax.f32 %v508_v29, 0.0  ;;  %v5657_v48 = vor.u32 %v1133_v30, %v7165_v32 }
 0x113   :  { %v692_v52 = vmax.f32 %v500_v33, 0.0  ;;  %v5661_v55 = vor.u32 %v1131_v40, %v831_v36 }
 0x114   :  { %7277 = vst [vmem:[#allocation14_spill] sm:$0xff] %v5657_v48  ;;  %v5663_v56 = vpack.c.bf16 %v694_v44, %v693_v43 }
 0x115   :  { %7278 = vst [vmem:[#allocation15_spill] sm:$0xff] %v5661_v55  ;;  %v5665_v21 = vpack.c.bf16 %v692_v52, %v691_v51  ;;  %v4523_v59 = vpop.f32.mrb[24].mxu0 }
 0x116   :  { %7279 = vst [vmem:[#allocation16_spill] sm:$0xff] %v5663_v56  ;;  %v521_v0 = vadd.f32 %v4523_v59, %v5528_v9  ;;  %v512_v1 = vpop.f32.mrb[25].mxu0  ;;  %2434 = vmatmul.mubr.bf16.gmra.mrb[84].mxu0 %v5669_v61  ;;  %v7150_v2 = vshll.u32 %v5663_v56, 16  ;;  %v7155_v20 = vshrl.u32 %v5663_v56, 16  ;;  %v5703_v59 = vsel %vm5452_vm3, 0, %v815_v27 }
 0x117   :  { %7280 = vst [vmem:[#allocation17_spill] sm:$0xff] %v5665_v21  ;;  %v513_v4 = vadd.f32 %v5528_v9, %v512_v1  ;;  %v4524_v7 = vpop.f32.mrb[26].mxu0  ;;  %2441 = vmatprep.mubr.bf16.mxu0 %v5575_v11  ;;  %v7158_v15 = vshll.u32 %v5665_v21, 16  ;;  %v7163_v29 = vshrl.u32 %v5665_v21, 16  ;;  %7286 = vst [vmem:[#allocation23_spill] sm:$0xff] %v5703_v59 }
 0x118   :  { %v524_v17 = vadd.f32 %v4524_v7, %v5528_v9  ;;  %v515_v19 = vpop.f32.mrb[27].mxu0  ;;  %v1137_v26 = vrot.slane %v7150_v2, 1  ;;  %v697_v30 = vmax.f32 %v521_v0, 0.0 }
 0x119   :  { %v516_v25 = vadd.f32 %v5528_v9, %v515_v19  ;;  %v1135_v31 = vrot.slane %v7158_v15, 1  ;;  %v695_v40 = vmax.f32 %v513_v4, 0.0 }
 0x11a   :  { %v698_v33 = vmax.f32 %v524_v17, 0.0  ;;  %v5691_v35 = vor.u32 %v1137_v26, %v7155_v20 }
 0x11b   :  { %v696_v43 = vmax.f32 %v516_v25, 0.0  ;;  %v5695_v44 = vor.u32 %v1135_v31, %v7163_v29 }
 0x11c   :  { %7282 = vst [vmem:[#allocation19_spill] sm:$0xff] %v5691_v35  ;;  %v5697_v51 = vpack.c.bf16 %v698_v33, %v697_v30  ;;  %v822_v30 = vor.u32 %v820_v54, %v819_v62 }
 0x11d   :  { %7283 = vst [vmem:[#allocation20_spill] sm:$0xff] %v5695_v44  ;;  %v5699_v18 = vpack.c.bf16 %v696_v43, %v695_v40  ;;  %v4527_v52 = vpop.f32.mrb[28].mxu0 }
 0x11e   :  { %7284 = vst [vmem:[#allocation21_spill] sm:$0xff] %v5697_v51  ;;  %v537_v0 = vadd.f32 %v4527_v52, %v5528_v9  ;;  %v528_v1 = vpop.f32.mrb[29].mxu0  ;;  %2442 = vmatmul.mubr.bf16.gmra.mrb[88].mxu0 %v5703_v59  ;;  %v7151_v4 = vshll.u32 %v5697_v51, 16  ;;  %v7153_v27 = vshrl.u32 %v5697_v51, 16 }
 0x11f   :  { %7285 = vst [vmem:[#allocation22_spill] sm:$0xff] %v5699_v18  ;;  %v529_v7 = vadd.f32 %v5528_v9, %v528_v1  ;;  %v4528_v17 = vpop.f32.mrb[30].mxu0  ;;  %2449 = vmatprep.mubr.bf16.mxu0 %v5603_v39  ;;  %v7152_v19 = vshll.u32 %v5699_v18, 16  ;;  %v7154_v33 = vshrl.u32 %v5699_v18, 16 }
 0x120   :  { %v540_v26 = vadd.f32 %v4528_v17, %v5528_v9  ;;  %v531_v25 = vpop.f32.mrb[31].mxu0  ;;  %v1141_v63 = vrot.slane %v7151_v4, 1  ;;  %v701_v43 = vmax.f32 %v537_v0, 0.0  ;;  %v826_v0 = vrot.slane %v824_v57, 7 }
 0x121   :  { %v532_v31 = vadd.f32 %v5528_v9, %v531_v25  ;;  %v1139_v40 = vrot.slane %v7152_v19, 1  ;;  %v699_v17 = vmax.f32 %v529_v7, 0.0  ;;  %v5737_v19 = vsel %vm5452_vm3, 0, %v822_v30 }
 0x122   :  { %v702_v52 = vmax.f32 %v540_v26, 0.0  ;;  %v5725_v1 = vor.u32 %v1141_v63, %v7153_v27  ;;  %7291 = vst [vmem:[#allocation28_spill] sm:$0xff] %v5737_v19 }
 0x123   :  { %v700_v2 = vmax.f32 %v532_v31, 0.0  ;;  %v5729_v4 = vor.u32 %v1139_v40, %v7154_v33 }
 0x124   :  { %7287 = vst [vmem:[#allocation24_spill] sm:$0xff] %v5725_v1  ;;  %v5731_v25 = vpack.c.bf16 %v702_v52, %v701_v43  ;;  %v5129_v1 = vld [vmem:[%s7147_s3 + $0x100] sm:$0xff]  }
 0x125   :  { %7288 = vst [vmem:[#allocation25_spill] sm:$0xff] %v5729_v4  ;;  %v5733_v54 = vpack.c.bf16 %v700_v2, %v699_v17  ;;  %v4531_v62 = vpop.f32.mrb[32].mxu0 }
 0x126   :  { %7289 = vst [vmem:[#allocation26_spill] sm:$0xff] %v5731_v25  ;;  %v553_v26 = vadd.f32 %v4531_v62, %v5528_v9  ;;  %v544_v7 = vpop.f32.mrb[33].mxu0  ;;  %2450 = vmatmul.mubr.bf16.gmra.mrb[92].mxu0 %v5737_v19  ;;  %v7159_v63 = vshrl.u32 %v5731_v25, 16  ;;  %v7161_v52 = vshll.u32 %v5731_v25, 16  ;;  %v829_v62 = vor.u32 %v827_v50, %v826_v0 }
 0x127   :  { %7290 = vst [vmem:[#allocation27_spill] sm:$0xff] %v5733_v54  ;;  %v545_v31 = vadd.f32 %v5528_v9, %v544_v7  ;;  %v4532_v40 = vpop.f32.mrb[34].mxu0  ;;  %2457 = vmatprep.mubr.bf16.mxu0 %v5601_v38  ;;  %v7160_v2 = vshll.u32 %v5733_v54, 16  ;;  %v7162_v7 = vshrl.u32 %v5733_v54, 16  ;;  %v7303_v19 = vshrl.u32 %v5665_v21, 16 }
 0x128   :  { %v556_v30 = vadd.f32 %v4532_v40, %v5528_v9  ;;  %v547_v43 = vpop.f32.mrb[35].mxu0  ;;  %v1275_v57 = vrot.slane %v7159_v63, 7  ;;  %v705_v33 = vmax.f32 %v553_v26, 0.0  ;;  %v833_v26 = vrot.slane %v831_v36, 7 }
 0x129   :  { %v548_v17 = vadd.f32 %v5528_v9, %v547_v43  ;;  %v1143_v27 = vrot.slane %v7160_v2, 1  ;;  %v703_v5 = vmax.f32 %v545_v31, 0.0  ;;  %v5771_v2 = vsel %vm5452_vm3, 0, %v829_v62 }
 0x12a   :  { %v706_v20 = vmax.f32 %v556_v30, 0.0  ;;  %v5759_v40 = vor.u32 %v7161_v52, %v1275_v57  ;;  %7295 = vst [vmem:[#allocation32_spill] sm:$0xff] %v5771_v2  ;;  %v847_v25 = vrot.slane %v7303_v19, 7 }
 0x12b   :  { %v704_v15 = vmax.f32 %v548_v17, 0.0  ;;  %v5763_v63 = vor.u32 %v1143_v27, %v7162_v7 }
 0x12c   :  { %7292 = vst [vmem:[#allocation29_spill] sm:$0xff] %v5759_v40  ;;  %v5765_v43 = vpack.c.bf16 %v706_v20, %v705_v33 }
 0x12d   :  { %7293 = vst [vmem:[#allocation30_spill] sm:$0xff] %v5763_v63  ;;  %v5767_v50 = vpack.c.bf16 %v704_v15, %v703_v5  ;;  %v4535_v0 = vpop.f32.mrb[36].mxu0 }
 0x12e   :  { %7294 = vst [vmem:[#allocation31_spill] sm:$0xff] %v5765_v43  ;;  %v569_v30 = vadd.f32 %v4535_v0, %v5528_v9  ;;  %v560_v31 = vpop.f32.mrb[37].mxu0  ;;  %2458 = vmatmul.mubr.bf16.gmra.mrb[96].mxu0 %v5771_v2  ;;  %v7166_v27 = vshll.u32 %v5765_v43, 16  ;;  %v7168_v17 = vshrl.u32 %v5765_v43, 16  ;;  %v836_v0 = vor.u32 %v834_v28, %v833_v26 }
 0x12f   :  { %v561_v20 = vadd.f32 %v5528_v9, %v560_v31  ;;  %v4536_v33 = vpop.f32.mrb[38].mxu0  ;;  %2465 = vmatprep.mubr.bf16.mxu0 %v5635_v53  ;;  %v7167_v5 = vshll.u32 %v5767_v50, 16  ;;  %v7169_v31 = vshrl.u32 %v5767_v50, 16 }
 0x130   :  { %v572_v15 = vadd.f32 %v4536_v33, %v5528_v9  ;;  %v563_v57 = vpop.f32.mrb[39].mxu0  ;;  %v1147_v36 = vrot.slane %v7166_v27, 1  ;;  %v709_v7 = vmax.f32 %v569_v30, 0.0  ;;  %v7301_v30 = vshrl.u32 %v5633_v13, 16 }
 0x131   :  { %v564_v62 = vadd.f32 %v5528_v9, %v563_v57  ;;  %v1145_v52 = vrot.slane %v7167_v5, 1  ;;  %v707_v24 = vmax.f32 %v561_v20, 0.0  ;;  %v5805_v5 = vsel %vm5452_vm3, 0, %v836_v0 }
 0x132   :  { %v710_v29 = vmax.f32 %v572_v15, 0.0  ;;  %v5793_v33 = vor.u32 %v1147_v36, %v7168_v17  ;;  %7300 = vst [vmem:[#allocation37_spill] sm:$0xff] %v5805_v5  ;;  %v840_v15 = vrot.slane %v7301_v30, 7 }
 0x133   :  { %v708_v32 = vmax.f32 %v564_v62, 0.0  ;;  %v5797_v27 = vor.u32 %v1145_v52, %v7169_v31  ;;  %v7302_v31 = vshll.u32 %v5633_v13, 16 }
 0x134   :  { %7296 = vst [vmem:[#allocation33_spill] sm:$0xff] %v5793_v33  ;;  %v5799_v57 = vpack.c.bf16 %v710_v29, %v709_v7 }
 0x135   :  { %7297 = vst [vmem:[#allocation34_spill] sm:$0xff] %v5797_v27  ;;  %v5801_v28 = vpack.c.bf16 %v708_v32, %v707_v24  ;;  %v4539_v26 = vpop.f32.mrb[40].mxu0 }
 0x136   :  { %7298 = vst [vmem:[#allocation35_spill] sm:$0xff] %v5799_v57  ;;  %v585_v36 = vadd.f32 %v4539_v26, %v5528_v9  ;;  %v576_v20 = vpop.f32.mrb[41].mxu0  ;;  %2466 = vmatmul.mubr.bf16.gmra.mrb[100].mxu0 %v5805_v5  ;;  %v901_v52 = vshrl.u32 %v5799_v57, 16  ;;  %v904_v26 = vshll.u32 %v5799_v57, 16 }
 0x137   :  { %7299 = vst [vmem:[#allocation36_spill] sm:$0xff] %v5801_v28  ;;  %v577_v29 = vadd.f32 %v5528_v9, %v576_v20  ;;  %v4540_v7 = vpop.f32.mrb[42].mxu0  ;;  %2473 = vmatprep.mubr.bf16.mxu0 %v5633_v13  ;;  %v894_v24 = vshrl.u32 %v5801_v28, 16  ;;  %v897_v32 = vshll.u32 %v5801_v28, 16  ;;  %v843_v20 = vor.u32 %v7302_v31, %v840_v15 }
 0x138   :  { %v588_v62 = vadd.f32 %v4540_v7, %v5528_v9  ;;  %v579_v0 = vpop.f32.mrb[43].mxu0  ;;  %v903_v30 = vrot.slane %v901_v52, 7  ;;  %v713_v5 = vmax.f32 %v585_v36, 0.0 }
 0x139   :  { %v580_v17 = vadd.f32 %v5528_v9, %v579_v0  ;;  %v1149_v40 = vrot.slane %v897_v32, 1  ;;  %v896_v33 = vrot.slane %v894_v24, 7  ;;  %v711_v63 = vmax.f32 %v577_v29, 0.0 }
 0x13a   :  { %v714_v27 = vmax.f32 %v588_v62, 0.0  ;;  %v906_v2 = vor.u32 %v904_v26, %v903_v30  ;;  %v5130_v62 = vld [vmem:[%s7147_s3 + $0x108] sm:$0xff]  }
 0x13b   :  { %v712_v7 = vmax.f32 %v580_v17, 0.0  ;;  %v1150_v59 = vor.u32 %v1149_v40, %v894_v24  ;;  %v5826_v61 = vor.u32 %v897_v32, %v896_v33  ;;  %v5845_v40 = vsel %vm5452_vm3, 0, %v843_v20 }
 0x13c   :  { %v5828_v0 = vpack.c.bf16 %v714_v27, %v713_v5  ;;  %v5832_v31 = vsel %vm5452_vm3, 0, %v906_v2  ;;  %7309 = vst [vmem:[#allocation41_spill] sm:$0xff] %v5845_v40 }
 0x13d   :  { %7305 = vst [vmem:[#allocation39_spill] sm:$0xff] %v5832_v31  ;;  %v5840_v19 = vpack.c.bf16 %v712_v7, %v711_v63  ;;  %2834 = vmatprep.mubr.bf16.mxu1 %v5832_v31  ;;  %v5849_v27 = vsel %vm5836_vm6, %v1150_v59, 0  ;;  %v4543_v2 = vpop.f32.mrb[44].mxu0  ;;  %v1151_v63 = vrot.slane %v904_v26, 1  ;;  %v7311_v59 = vshll.u32 %v5665_v21, 16 }
 0x13e   :  { %7304 = vst [vmem:[#allocation38_spill] sm:$0xff] %v5828_v0  ;;  %7310 = vst [vmem:[#allocation42_spill] sm:$0xff] %v5849_v27  ;;  %2474 = vmatmul.mubr.bf16.gmra.mrb[104].mxu0 %v5845_v40  ;;  %2835 = vmatmul.mubr.bf16.vlgmr.msra.gmra.mrb[0].mxu1 %v5849_v27  ;;  %v601_v5 = vadd.f32 %v4543_v2, %v5528_v9  ;;  %v592_v17 = vpop.f32.mrb[45].mxu0  ;;  %v7188_v33 = vshrl.u32 %v5828_v0, 16  ;;  %v7312_v7 = vmov 0   ;;  %v918_v2 = vshll.u32 %v5828_v0, 16 }
 0x13f   :  { %7308 = vst [vmem:[#allocation40_spill] sm:$0xff] %v5840_v19  ;;  %2481 = vmatprep.mubr.bf16.mxu0 %v5665_v21  ;;  %2940 = vmatpush1.bf16.msra.mxu1 %v5129_v1  ;;  %v593_v36 = vadd.f32 %v5528_v9, %v592_v17  ;;  %v4544_v29 = vpop.f32.mrb[46].mxu0  ;;  %v850_v24 = vor.u32 %v7311_v59, %v847_v25  ;;  %v908_v32 = vshrl.u32 %v5840_v19, 16  ;;  %v911_v27 = vshll.u32 %v5840_v19, 16 }
 0x140   :  { %v717_v30 = vmax.f32 %v601_v5, 0.0  ;;  %v604_v26 = vadd.f32 %v4544_v29, %v5528_v9  ;;  %v595_v20 = vpop.f32.mrb[47].mxu0  ;;  %2941 = vmatprep.subr.bf16.mxu1 %v7312_v7  ;;  %v917_v1 = vrot.slane %v7188_v33, 7  ;;  %v1152_v4 = vor.u32 %v1151_v63, %v901_v52  ;;  %v5131_v33 = vld [vmem:[%s7147_s3 + $0x110] sm:$0xff]  }
 0x141   :  { %v715_v17 = vmax.f32 %v593_v36, 0.0  ;;  %v596_v25 = vadd.f32 %v5528_v9, %v595_v20  ;;  %v910_v59 = vrot.slane %v908_v32, 7  ;;  %v7314_v36 = vshrl.u32 %v5663_v56, 16 }
 0x142   :  { %v718_v40 = vmax.f32 %v604_v26, 0.0  ;;  %v920_v29 = vor.u32 %v918_v2, %v917_v1  ;;  %v5882_v52 = vsel %vm5452_vm3, 0, %v850_v24 }
 0x143   :  { %v716_v16 = vmax.f32 %v596_v25, 0.0  ;;  %v913_v5 = vor.u32 %v911_v27, %v910_v59  ;;  %2942 = vmatpush1.bf16.msra.mxu1 %v5130_v62  ;;  %v854_v20 = vrot.slane %v7314_v36, 7  ;;  %7316 = vst [vmem:[#allocation45_spill] sm:$0xff] %v5882_v52  ;;  %v5892_v62 = vsel %vm5836_vm6, %v1152_v4, 0 }
 0x144   :  { %v5870_v35 = vpack.c.bf16 %v718_v40, %v717_v30  ;;  %2943 = vmatprep.subr.bf16.mxu1 %v7312_v7  ;;  %7318 = vst [vmem:[#allocation47_spill] sm:$0xff] %v5892_v62  ;;  %v1153_v30 = vrot.slane %v911_v27, 1  ;;  %v5899_v24 = vsel %vm5452_vm3, 0, %v920_v29  ;;  %v7320_v4 = vshll.u32 %v5663_v56, 16  ;;  %v5132_v29 = vld [vmem:[%s7147_s3 + $0x118] sm:$0xff]  }
 0x145   :  { %v5878_v21 = vpack.c.bf16 %v716_v16, %v715_v17  ;;  %v5886_v63 = vsel %vm5452_vm3, 0, %v913_v5  ;;  %v4547_v40 = vpop.f32.mrb[48].mxu0  ;;  %7319 = vst [vmem:[#allocation48_spill] sm:$0xff] %v5899_v24 }
 0x146   :  { %7313 = vst [vmem:[#allocation43_spill] sm:$0xff] %v5870_v35  ;;  %7317 = vst [vmem:[#allocation46_spill] sm:$0xff] %v5886_v63  ;;  %2482 = vmatmul.mubr.bf16.gmra.mrb[108].mxu0 %v5882_v52  ;;  %2842 = vmatprep.mubr.bf16.mxu1 %v5886_v63  ;;  %v617_v16 = vadd.f32 %v4547_v40, %v5528_v9  ;;  %v608_v26 = vpop.f32.mrb[49].mxu0  ;;  %v857_v27 = vor.u32 %v7320_v4, %v854_v20 }
 0x147   :  { %7315 = vst [vmem:[#allocation44_spill] sm:$0xff] %v5878_v21  ;;  %2489 = vmatprep.mubr.bf16.mxu0 %v5663_v56  ;;  %2843 = vmatmul.mubr.bf16.gmra.mrb[4].mxu1 %v5892_v62  ;;  %v609_v1 = vadd.f32 %v5528_v9, %v608_v26  ;;  %v7199_v17 = vshrl.u32 %v5878_v21, 16  ;;  %v4548_v25 = vpop.f32.mrb[50].mxu0  ;;  %v925_v62 = vshll.u32 %v5878_v21, 16  ;;  %v1154_v52 = vor.u32 %v1153_v30, %v908_v32 }
 0x148   :  { %2850 = vmatprep.mubr.bf16.mxu1 %v5899_v24  ;;  %2944 = vmatpush1.bf16.msra.mxu1 %v5131_v33  ;;  %v721_v59 = vmax.f32 %v617_v16, 0.0  ;;  %v620_v5 = vadd.f32 %v4548_v25, %v5528_v9  ;;  %v611_v36 = vpop.f32.mrb[51].mxu0  ;;  %v7200_v25 = vshrl.u32 %v5870_v35, 16  ;;  %v5925_v44 = vsel %vm5452_vm3, 0, %v857_v27 }
 0x149   :  { %v719_v40 = vmax.f32 %v609_v1, 0.0  ;;  %v924_v26 = vrot.slane %v7199_v17, 7  ;;  %2945 = vmatprep.subr.bf16.mxu1 %v7312_v7  ;;  %v612_v33 = vadd.f32 %v5528_v9, %v611_v36  ;;  %v7322_v1 = vshrl.u32 %v5699_v18, 16  ;;  %v5133_v17 = vld [vmem:[%s7147_s3 + $0x120] sm:$0xff]   ;;  %7323 = vst [vmem:[#allocation50_spill] sm:$0xff] %v5925_v44 }
 0x14a   :  { %v722_v20 = vmax.f32 %v620_v5, 0.0  ;;  %v5937_v5 = vsel %vm5836_vm6, %v1154_v52, 0  ;;  %v1155_v36 = vrot.slane %v918_v2, 1  ;;  %v7335_v14 = vshrl.u32 %v5878_v21, 16 }
 0x14b   :  { %v927_v16 = vor.u32 %v925_v62, %v924_v26  ;;  %v720_v4 = vmax.f32 %v612_v33, 0.0  ;;  %v861_v42 = vrot.slane %v7322_v1, 7  ;;  %7326 = vst [vmem:[#allocation53_spill] sm:$0xff] %v5937_v5 }
 0x14c   :  { %v5916_v56 = vpack.c.bf16 %v722_v20, %v721_v59  ;;  %2946 = vmatpush1.bf16.msra.mxu1 %v5132_v29  ;;  %v7327_v20 = vshll.u32 %v5699_v18, 16 }
 0x14d   :  { %v5929_v32 = vsel %vm5452_vm3, 0, %v927_v16  ;;  %v5931_v30 = vpack.c.bf16 %v720_v4, %v719_v40  ;;  %2947 = vmatprep.subr.bf16.mxu1 %v7312_v7  ;;  %v4551_v59 = vpop.f32.mrb[52].mxu0  ;;  %v931_v40 = vrot.slane %v7200_v25, 7  ;;  %v5134_v16 = vld [vmem:[%s7147_s3 + $0x128] sm:$0xff]   ;;  %v7330_v25 = vshrl.u32 %v5697_v51, 16 }
 0x14e   :  { %7321 = vst [vmem:[#allocation49_spill] sm:$0xff] %v5916_v56  ;;  %7324 = vst [vmem:[#allocation51_spill] sm:$0xff] %v5929_v32  ;;  %2490 = vmatmul.mubr.bf16.gmra.mrb[112].mxu0 %v5925_v44  ;;  %v633_v29 = vadd.f32 %v4551_v59, %v5528_v9  ;;  %v624_v27 = vpop.f32.mrb[53].mxu0  ;;  %v864_v52 = vor.u32 %v7327_v20, %v861_v42  ;;  %v932_v59 = vshll.u32 %v5870_v35, 16  ;;  %v7328_v42 = vshrl.u32 %v5828_v0, 16 }
 0x14f   :  { %7325 = vst [vmem:[#allocation52_spill] sm:$0xff] %v5931_v30  ;;  %2497 = vmatprep.mubr.bf16.mxu0 %v5699_v18  ;;  %2851 = vmatmul.mubr.bf16.gmra.mrb[8].mxu1 %v5937_v5  ;;  %v625_v26 = vadd.f32 %v5528_v9, %v624_v27  ;;  %v4552_v33 = vpop.f32.mrb[54].mxu0  ;;  %v7331_v13 = vshrl.u32 %v5931_v30, 16  ;;  %v7218_v53 = vshrl.u32 %v5916_v56, 16 }
 0x150   :  { %2858 = vmatprep.mubr.bf16.mxu1 %v5929_v32  ;;  %2948 = vmatpush1.bf16.msra.mxu1 %v5133_v17  ;;  %v725_v2 = vmax.f32 %v633_v29, 0.0  ;;  %v636_v4 = vadd.f32 %v4552_v33, %v5528_v9  ;;  %v627_v1 = vpop.f32.mrb[55].mxu0  ;;  %v1156_v17 = vor.u32 %v1155_v36, %v7328_v42  ;;  %v934_v20 = vor.u32 %v932_v59, %v931_v40  ;;  %v5135_v33 = vld [vmem:[%s7147_s3 + $0x130] sm:$0xff]  }
 0x151   :  { %2949 = vmatprep.subr.bf16.mxu1 %v7312_v7  ;;  %v723_v27 = vmax.f32 %v625_v26, 0.0  ;;  %v628_v5 = vadd.f32 %v5528_v9, %v627_v1  ;;  %v5965_v26 = vsel %vm5452_vm3, 0, %v864_v52  ;;  %v868_v1 = vrot.slane %v7330_v25, 7 }
 0x152   :  { %v726_v29 = vmax.f32 %v636_v4, 0.0  ;;  %7329 = vst [vmem:[#allocation54_spill] sm:$0xff] %v5965_v26  ;;  %v938_v36 = vrot.slane %v7331_v13, 7  ;;  %v5977_v40 = vsel %vm5836_vm6, %v1156_v17, 0  ;;  %v5984_v13 = vsel %vm5452_vm3, 0, %v934_v20 }
 0x153   :  { %v724_v44 = vmax.f32 %v628_v5, 0.0  ;;  %7332 = vst [vmem:[#allocation55_spill] sm:$0xff] %v5977_v40  ;;  %7333 = vst [vmem:[#allocation56_spill] sm:$0xff] %v5984_v13 }
 0x154   :  { %2950 = vmatpush1.bf16.msra.mxu1 %v5134_v16  ;;  %v5958_v18 = vpack.c.bf16 %v726_v29, %v725_v2  ;;  %v1157_v2 = vrot.slane %v925_v62, 1  ;;  %v5136_v62 = vld [vmem:[%s7147_s3 + $0x138] sm:$0xff]  }
 0x155   :  { %v5971_v4 = vpack.c.bf16 %v724_v44, %v723_v27  ;;  %2951 = vmatprep.subr.bf16.mxu1 %v7312_v7  ;;  %v4555_v5 = vpop.f32.mrb[56].mxu0  ;;  %v939_v44 = vshll.u32 %v5931_v30, 16 }
 0x156   :  { %2498 = vmatmul.mubr.bf16.gmra.mrb[116].mxu0 %v5965_v26  ;;  %v649_v52 = vadd.f32 %v4555_v5, %v5528_v9  ;;  %v640_v16 = vpop.f32.mrb[57].mxu0  ;;  %v7334_v5 = vshll.u32 %v5697_v51, 16 }
 0x157   :  { %2505 = vmatprep.mubr.bf16.mxu0 %v5697_v51  ;;  %2859 = vmatmul.mubr.bf16.gmra.mrb[12].mxu1 %v5977_v40  ;;  %v641_v25 = vadd.f32 %v5528_v9, %v640_v16  ;;  %v4556_v27 = vpop.f32.mrb[58].mxu0  ;;  %v941_v40 = vor.u32 %v939_v44, %v938_v36 }
 0x158   :  { %2866 = vmatprep.mubr.bf16.mxu1 %v5984_v13  ;;  %2952 = vmatpush1.bf16.msra.mxu1 %v5135_v33  ;;  %v729_v42 = vmax.f32 %v649_v52, 0.0  ;;  %v652_v17 = vadd.f32 %v4556_v27, %v5528_v9  ;;  %v643_v29 = vpop.f32.mrb[59].mxu0  ;;  %v871_v20 = vor.u32 %v7334_v5, %v868_v1  ;;  %v1158_v33 = vor.u32 %v1157_v2, %v7335_v14  ;;  %v5137_v1 = vld [vmem:[%s7147_s3 + $0x140] sm:$0xff]  }
 0x159   :  { %2953 = vmatprep.subr.bf16.mxu1 %v7312_v7  ;;  %v727_v26 = vmax.f32 %v641_v25, 0.0  ;;  %v644_v16 = vadd.f32 %v5528_v9, %v643_v29  ;;  %v7336_v52 = vshrl.u32 %v5733_v54, 16  ;;  %v6013_v14 = vsel %vm5452_vm3, 0, %v941_v40 }
 0x15a   :  { %v730_v48 = vmax.f32 %v652_v17, 0.0  ;;  %v6009_v36 = vsel %vm5452_vm3, 0, %v871_v20  ;;  %7338 = vst [vmem:[#allocation58_spill] sm:$0xff] %v6013_v14  ;;  %v945_v40 = vrot.slane %v7218_v53, 7  ;;  %v7340_v29 = vshll.u32 %v5733_v54, 16 }
 0x15b   :  { %v728_v49 = vmax.f32 %v644_v16, 0.0  ;;  %v875_v27 = vrot.slane %v7336_v52, 7  ;;  %7337 = vst [vmem:[#allocation57_spill] sm:$0xff] %v6009_v36  ;;  %v946_v52 = vshll.u32 %v5916_v56, 16 }
 0x15c   :  { %2954 = vmatpush1.bf16.msra.mxu1 %v5136_v62  ;;  %v6002_v55 = vpack.c.bf16 %v730_v48, %v729_v42  ;;  %v6021_v48 = vsel %vm5836_vm6, %v1158_v33, 0  ;;  %v1159_v62 = vrot.slane %v932_v59, 1  ;;  %v5138_v59 = vld [vmem:[%s7147_s3 + $0x148] sm:$0xff]  }
 0x15d   :  { %2955 = vmatprep.subr.bf16.mxu1 %v7312_v7  ;;  %v6016_v2 = vpack.c.bf16 %v728_v49, %v727_v26  ;;  %v4559_v25 = vpop.f32.mrb[60].mxu0  ;;  %7339 = vst [vmem:[#allocation59_spill] sm:$0xff] %v6021_v48  ;;  %v878_v5 = vor.u32 %v7340_v29, %v875_v27  ;;  %v7341_v27 = vshrl.u32 %v5870_v35, 16 }
 0x15e   :  { %2506 = vmatmul.mubr.bf16.gmra.mrb[120].mxu0 %v6009_v36  ;;  %v665_v42 = vadd.f32 %v4559_v25, %v5528_v9  ;;  %v656_v17 = vpop.f32.mrb[61].mxu0 }
 0x15f   :  { %2513 = vmatprep.mubr.bf16.mxu0 %v5733_v54  ;;  %2867 = vmatmul.mubr.bf16.gmra.mrb[16].mxu1 %v6021_v48  ;;  %v657_v49 = vadd.f32 %v5528_v9, %v656_v17  ;;  %v4560_v26 = vpop.f32.mrb[62].mxu0  ;;  %v948_v48 = vor.u32 %v946_v52, %v945_v40  ;;  %v6049_v25 = vsel %vm5452_vm3, 0, %v878_v5  ;;  %v1161_v40 = vrot.slane %v939_v44, 1 }
 0x160   :  { %2874 = vmatprep.mubr.bf16.mxu1 %v6013_v14  ;;  %2956 = vmatpush1.bf16.msra.mxu1 %v5137_v1  ;;  %v733_v20 = vmax.f32 %v665_v42, 0.0  ;;  %v668_v16 = vadd.f32 %v4560_v26, %v5528_v9  ;;  %v659_v33 = vpop.f32.mrb[63].mxu0  ;;  %v1160_v1 = vor.u32 %v1159_v62, %v7341_v27  ;;  %v5139_v42 = vld [vmem:[%s7147_s3 + $0x150] sm:$0xff]   ;;  %7342 = vst [vmem:[#allocation60_spill] sm:$0xff] %v6049_v25 }
 0x161   :  { %2957 = vmatprep.subr.bf16.mxu1 %v7312_v7  ;;  %v731_v17 = vmax.f32 %v657_v49, 0.0  ;;  %v660_v53 = vadd.f32 %v5528_v9, %v659_v33  ;;  %v7343_v49 = vshrl.u32 %v5971_v4, 16  ;;  %v6065_v5 = vsel %vm5452_vm3, 0, %v948_v48 }
 0x162   :  { %v734_v29 = vmax.f32 %v668_v16, 0.0  ;;  %7345 = vst [vmem:[#allocation62_spill] sm:$0xff] %v6065_v5  ;;  %v7346_v48 = vshrl.u32 %v5931_v30, 16 }
 0x163   :  { %v732_v36 = vmax.f32 %v660_v53, 0.0  ;;  %v952_v9 = vrot.slane %v7343_v49, 7  ;;  %v6059_v53 = vsel %vm5836_vm6, %v1160_v1, 0  ;;  %v957_v1 = vshrl.u32 %v5958_v18, 16 }
 0x164   :  { %2958 = vmatpush1.bf16.msra.mxu1 %v5138_v59  ;;  %v6045_v26 = vpack.c.bf16 %v734_v29, %v733_v20  ;;  %7344 = vst [vmem:[#allocation61_spill] sm:$0xff] %v6059_v53  ;;  %v5140_v20 = vld [vmem:[%s7147_s3 + $0x158] sm:$0xff]   ;;  %v5141_v29 = vld [vmem:[%s7147_s3 + $0x160] sm:$0xff]   ;;  %v7349_v49 = vshrl.u32 %v5767_v50, 16 }
 0x165   :  { %2959 = vmatprep.subr.bf16.mxu1 %v7312_v7  ;;  %v6054_v62 = vpack.c.bf16 %v732_v36, %v731_v17  ;;  %v953_v36 = vshll.u32 %v5971_v4, 16  ;;  %v1162_v17 = vor.u32 %v1161_v40, %v7346_v48  ;;  %v7351_v48 = vshll.u32 %v5767_v50, 16 }
 0x166   :  { %2514 = vmatmul.mubr.bf16.gmra.mrb[124].mxu0 %v6049_v25  ;;  %v7223_v59 = vshll.u32 %v6045_v26, 16  ;;  %v7224_v44 = vshrl.u32 %v6045_v26, 16 }
 0x167   :  { %2875 = vmatmul.mubr.bf16.gmra.mrb[20].mxu1 %v6059_v53  ;;  %2521 = vmatprep.mubr.bf16.mxu0 %v7312_v7  ;;  %v955_v33 = vor.u32 %v953_v36, %v952_v9  ;;  %v882_v9 = vrot.slane %v7349_v49, 7  ;;  %v6097_v40 = vsel %vm5836_vm6, %v1162_v17, 0  ;;  %v964_v17 = vshrl.u32 %v6016_v2, 16 }
 0x168   :  { %2882 = vmatprep.mubr.bf16.mxu1 %v6065_v5  ;;  %2960 = vmatpush1.bf16.msra.mxu1 %v5139_v42  ;;  %v1356_v16 = vrot.slane %v7223_v59, 1  ;;  %7350 = vst [vmem:[#allocation65_spill] sm:$0xff] %v6097_v40  ;;  %v960_v59 = vshll.u32 %v5958_v18, 16 }
 0x169   :  { %2961 = vmatprep.subr.bf16.mxu1 %v7312_v7  ;;  %v6089_v42 = vsel %vm5452_vm3, 0, %v955_v33  ;;  %v5142_v33 = vld [vmem:[%s7147_s3 + $0x168] sm:$0xff]   ;;  %v885_v49 = vor.u32 %v7351_v48, %v882_v9  ;;  %v7354_v9 = vshrl.u32 %v5765_v43, 16 }
 0x16a   :  { %v6081_v27 = vor.u32 %v1356_v16, %v7224_v44  ;;  %7348 = vst [vmem:[#allocation64_spill] sm:$0xff] %v6089_v42  ;;  %v959_v16 = vrot.slane %v957_v1, 7 }
 0x16b   :  { %v889_v48 = vrot.slane %v7354_v9, 7 }
 0x16c   :  { %7347 = vst [vmem:[#allocation63_spill] sm:$0xff] %v6081_v27  ;;  %2962 = vmatpush1.bf16.msra.mxu1 %v5140_v20  ;;  %v1163_v20 = vrot.slane %v946_v52, 1  ;;  %v7352_v52 = vshrl.u32 %v5916_v56, 16  ;;  %v6117_v27 = vsel %vm5452_vm3, 0, %v885_v49  ;;  %v967_v49 = vshll.u32 %v6016_v2, 16 }
 0x16d   :  { %2963 = vmatprep.subr.bf16.mxu1 %v7312_v7  ;;  %7353 = vst [vmem:[#allocation66_spill] sm:$0xff] %v6117_v27 }
 0x16e   :  { %2522 = vmatmul.mubr.bf16.gmra.mrb[128].mxu0 %v5462_v60  ;;  %v1164_v44 = vor.u32 %v1163_v20, %v7352_v52  ;;  %v962_v60 = vor.u32 %v960_v59, %v959_v16  ;;  %v1165_v16 = vrot.slane %v953_v36, 1  ;;  %v5144_v52 = vld [vmem:[%s7147_s3 + $0x178] sm:$0xff]  }
 0x16f   :  { %2529 = vmatprep.mubr.bf16.mxu0 %v5767_v50  ;;  %2883 = vmatmul.mubr.bf16.gmra.mrb[24].mxu1 %v6097_v40  ;;  %v966_v40 = vrot.slane %v964_v17, 7 }
 0x170   :  { %2890 = vmatprep.mubr.bf16.mxu1 %v6089_v42  ;;  %2964 = vmatpush1.bf16.msra.mxu1 %v5141_v29  ;;  %v5143_v29 = vld [vmem:[%s7147_s3 + $0x170] sm:$0xff]   ;;  %v6125_v20 = vsel %vm5836_vm6, %v1164_v44, 0  ;;  %v7357_v44 = vshll.u32 %v5765_v43, 16 }
 0x171   :  { %2965 = vmatprep.subr.bf16.mxu1 %v7312_v7  ;;  %7355 = vst [vmem:[#allocation67_spill] sm:$0xff] %v6125_v20  ;;  %v969_v9 = vor.u32 %v967_v49, %v966_v40 }
 0x172   :  { %v892_v36 = vor.u32 %v7357_v44, %v889_v48  ;;  %v1167_v48 = vrot.slane %v960_v59, 1 }
 0x174   :  { %2966 = vmatpush1.bf16.msra.mxu1 %v5142_v33  ;;  %v6131_v33 = vsel %vm5452_vm3, 0, %v962_v60  ;;  %v971_v60 = vshrl.u32 %v6002_v55, 16  ;;  %v6146_v53 = vsel %vm5452_vm3, 0, %v892_v36  ;;  %v1168_v44 = vor.u32 %v1167_v48, %v957_v1 }
 0x175   :  { %2967 = vmatprep.subr.bf16.mxu1 %v7312_v7  ;;  %7356 = vst [vmem:[#allocation68_spill] sm:$0xff] %v6131_v33  ;;  %v981_v48 = vshll.u32 %v6054_v62, 16 }
 0x176   :  { %2530 = vmatmul.mubr.bf16.gmra.mrb[132].mxu0 %v6117_v27  ;;  %v6171_v59 = vsel %vm5836_vm6, %v1168_v44, 0 }
 0x177   :  { %2537 = vmatprep.mubr.bf16.mxu0 %v5765_v43  ;;  %2891 = vmatmul.mubr.bf16.gmra.mrb[28].mxu1 %v6125_v20  ;;  %v7358_v20 = vshrl.u32 %v5971_v4, 16  ;;  %7362 = vst [vmem:[#allocation72_spill] sm:$0xff] %v6171_v59 }
 0x178   :  { %2898 = vmatprep.mubr.bf16.mxu1 %v6131_v33  ;;  %2968 = vmatpush1.bf16.msra.mxu1 %v5143_v29  ;;  %v6150_v29 = vsel %vm5452_vm3, 0, %v969_v9  ;;  %v6166_v9 = vsel %vm5452_vm3, 0, %v5826_v61  ;;  %v7413_v58 = vld [vmem:[#allocation67_spill] sm:$0xff] }
 0x179   :  { %2969 = vmatprep.subr.bf16.mxu1 %v7312_v7  ;;  %v1166_v27 = vor.u32 %v1165_v16, %v7358_v20  ;;  %7359 = vst [vmem:[#allocation69_spill] sm:$0xff] %v6150_v29  ;;  %v973_v20 = vrot.slane %v971_v60, 7  ;;  %v974_v16 = vshll.u32 %v6002_v55, 16  ;;  %7361 = vst [vmem:[#allocation71_spill] sm:$0xff] %v6166_v9 }
 0x17b   :  { %v6156_v40 = vsel %vm5836_vm6, %v1166_v27, 0  ;;  %v976_v36 = vor.u32 %v974_v16, %v973_v20  ;;  %v1171_v44 = vrot.slane %v974_v16, 1  ;;  %v1173_v16 = vrot.slane %v981_v48, 1 }
 0x17c   :  { %2970 = vmatpush1.bf16.msra.mxu1 %v5144_v52  ;;  %7360 = vst [vmem:[#allocation70_spill] sm:$0xff] %v6156_v40  ;;  %v978_v52 = vshrl.u32 %v6054_v62, 16 }
 0x17d   :  { %3228 = vmatprep.subr.bf16.mxu1 %v7312_v7  ;;  %v6177_v1 = vsel %vm5452_vm3, 0, %v976_v36  ;;  %v7365_v36 = vshrl.u32 %v6045_v26, 16 }
 0x17e   :  { %2538 = vmatmul.mubr.bf16.gmra.mrb[136].mxu0 %v6146_v53  ;;  %v980_v27 = vrot.slane %v978_v52, 7  ;;  %7363 = vst [vmem:[#allocation73_spill] sm:$0xff] %v6177_v1 }
 0x17f   :  { %2545 = vmatprep.mubr.bf16.mxu0 %v5801_v28  ;;  %2899 = vmatmul.mubr.bf16.gmra.mrb[32].mxu1 %v6156_v40  ;;  %v1169_v40 = vrot.slane %v967_v49, 1 }
 0x180   :  { %2906 = vmatprep.mubr.bf16.mxu1 %v6150_v29  ;;  %v983_v61 = vor.u32 %v981_v48, %v980_v27  ;;  %v6219_v48 = vsel %vm5836_vm6, %v5549_v45, 0  ;;  %v5146_v45 = vld [vmem:[%s7147_s3 + $0x188] sm:$0xff]  }
 0x181   :  { %v1170_v20 = vor.u32 %v1169_v40, %v964_v17  ;;  %v1172_v17 = vor.u32 %v1171_v44, %v971_v60  ;;  %v7366_v40 = vshll.u32 %v6045_v26, 16  ;;  %v1174_v60 = vor.u32 %v1173_v16, %v978_v52  ;;  %v5145_v52 = vld [vmem:[%s7147_s3 + $0x180] sm:$0xff]   ;;  %v5152_v16 = vld [vmem:[%s7147_s3 + $0x1b8] sm:$0xff]  }
 0x182   :  { %v6231_v44 = vsel %vm5836_vm6, %v5547_v41, 0  ;;  %v5148_v41 = vld [vmem:[%s7147_s3 + $0x198] sm:$0xff]  }
 0x183   :  { %v6188_v49 = vsel %vm5836_vm6, %v1170_v20, 0 }
 0x186   :  { %2546 = vmatmul.mubr.bf16.gmra.mrb[140].mxu0 %v6166_v9  ;;  %v6183_v9 = vsel %vm5452_vm3, 0, %v983_v61  ;;  %v6200_v61 = vsel %vm5836_vm6, %v1172_v17, 0  ;;  %v5149_v17 = vld [vmem:[%s7147_s3 + $0x1a0] sm:$0xff]  }
 0x187   :  { %2553 = vmatprep.mubr.bf16.mxu0 %v5799_v57  ;;  %2907 = vmatmul.mubr.bf16.gmra.mrb[36].mxu1 %v6171_v59  ;;  %7364 = vst [vmem:[#allocation74_spill] sm:$0xff] %v6183_v9  ;;  %v1282_v59 = vrot.slane %v7365_v36, 7  ;;  %v5147_v36 = vld [vmem:[%s7147_s3 + $0x190] sm:$0xff]  }
 0x188   :  { %2914 = vmatprep.mubr.bf16.mxu1 %v6177_v1 }
 0x189   :  { %v1285_v27 = vor.u32 %v7366_v40, %v1282_v59  ;;  %v6212_v59 = vsel %vm5836_vm6, %v1174_v60, 0  ;;  %v5150_v40 = vld [vmem:[%s7147_s3 + $0x1a8] sm:$0xff]   ;;  %v5153_v60 = vld [vmem:[%s7147_s3 + $0x1c0] sm:$0xff]  }
 0x18b   :  { %v6206_v20 = vsel %vm5452_vm3, 0, %v1285_v27  ;;  %v5151_v27 = vld [vmem:[%s7147_s3 + $0x1b0] sm:$0xff]  }
 0x18c   :  { %7367 = vst [vmem:[#allocation75_spill] sm:$0xff] %v6206_v20 }
 0x18e   :  { %2554 = vmatmul.mubr.bf16.gmra.mrb[144].mxu0 %v5832_v31 }
 0x18f   :  { %2561 = vmatprep.mubr.bf16.mxu0 %v5840_v19  ;;  %2915 = vmatmul.mubr.bf16.gmra.mrb[40].mxu1 %v6188_v49 }
 0x190   :  { %2922 = vmatprep.mubr.bf16.mxu1 %v6183_v9 }
 0x196   :  { %2562 = vmatmul.mubr.bf16.gmra.mrb[148].mxu0 %v5886_v63  ;;  %v7386_v63 = vld [vmem:[#allocation26_spill] sm:$0xff] }
 0x197   :  { %2569 = vmatprep.mubr.bf16.mxu0 %v5828_v0  ;;  %2923 = vmatmul.mubr.bf16.gmra.mrb[44].mxu1 %v6200_v61  ;;  %v7387_v31 = vshll.u32 %v7386_v63, 16 }
 0x198   :  { %2930 = vmatprep.mubr.bf16.mxu1 %v6206_v20  ;;  %v7374_v20 = vld [vmem:[#allocation20_spill] sm:$0xff] }
 0x19e   :  { %2570 = vmatmul.mubr.bf16.gmra.mrb[152].mxu0 %v5899_v24 }
 0x19f   :  { %2577 = vmatprep.mubr.bf16.mxu0 %v5878_v21  ;;  %2931 = vmatmul.mubr.bf16.gmra.mrb[48].mxu1 %v6212_v59 }
 0x1a0   :  { %2971 = vmatprep.mubr.bf16.mxu1 %v6219_v48 }
 0x1a6   :  { %2578 = vmatmul.mubr.bf16.gmra.mrb[156].mxu0 %v5929_v32  ;;  %v7384_v32 = vld [vmem:[#allocation23_spill] sm:$0xff] }
 0x1a7   :  { %2585 = vmatprep.mubr.bf16.mxu0 %v5870_v35  ;;  %2972 = vmatmul.mubr.bf16.vlgmr.msra.gmra.mrb[52].mxu1 %v5536_v23  ;;  %v6248_v23 = vsel %vm5836_vm6, %v5573_v10, 0  ;;  %v6265_v10 = vsel %vm5836_vm6, %v5571_v6, 0  ;;  %v6282_v6 = vsel %vm5836_vm6, %v5599_v37, 0  ;;  %v6299_v37 = vsel %vm5836_vm6, %v5597_v34, 0 }
 0x1a8   :  { %3229 = vmatpush1.bf16.msra.mxu1 %v5145_v52  ;;  %2979 = vmatprep.mubr.bf16.mxu1 %v6231_v44  ;;  %v5154_v52 = vld [vmem:[%s7147_s3 + $0x1c8] sm:$0xff]   ;;  %v6316_v34 = vsel %vm5836_vm6, %v5631_v8, 0  ;;  %v5156_v8 = vld [vmem:[%s7147_s3 + $0x1d8] sm:$0xff]  }
 0x1a9   :  { %3230 = vmatprep.subr.bf16.mxu1 %v7312_v7 }
 0x1ac   :  { %3231 = vmatpush1.bf16.msra.mxu1 %v5146_v45  ;;  %v5155_v45 = vld [vmem:[%s7147_s3 + $0x1d0] sm:$0xff]  }
 0x1ad   :  { %3232 = vmatprep.subr.bf16.mxu1 %v7312_v7 }
 0x1ae   :  { %2586 = vmatmul.mubr.bf16.gmra.mrb[160].mxu0 %v5984_v13  ;;  %v7383_v13 = vld [vmem:[#allocation24_spill] sm:$0xff] }
 0x1af   :  { %2593 = vmatprep.mubr.bf16.mxu0 %v5931_v30  ;;  %2980 = vmatmul.mubr.bf16.gmra.mrb[56].mxu1 %v5534_v22 }
 0x1b0   :  { %2987 = vmatprep.mubr.bf16.mxu1 %v6248_v23  ;;  %3233 = vmatpush1.bf16.msra.mxu1 %v5147_v36  ;;  %v6326_v36 = vsel %vm5836_vm6, %v5627_v3, 0 }
 0x1b1   :  { %3234 = vmatprep.subr.bf16.mxu1 %v7312_v7 }
 0x1b4   :  { %3235 = vmatpush1.bf16.msra.mxu1 %v5148_v41  ;;  %v7368_v41 = vld [vmem:[#allocation15_spill] sm:$0xff] }
 0x1b5   :  { %3236 = vmatprep.subr.bf16.mxu1 %v7312_v7  ;;  %v6339_v3 = vsel %vm5836_vm6, %v7368_v41, 0  ;;  %v5159_v41 = vld [vmem:[%s7147_s3 + $0x208] sm:$0xff]  }
 0x1b6   :  { %2594 = vmatmul.mubr.bf16.gmra.mrb[164].mxu0 %v6013_v14  ;;  %v7381_v14 = vld [vmem:[#allocation18_spill] sm:$0xff] }
 0x1b7   :  { %2601 = vmatprep.mubr.bf16.mxu0 %v5916_v56  ;;  %2988 = vmatmul.mubr.bf16.gmra.mrb[60].mxu1 %v5553_v47 }
 0x1b8   :  { %2995 = vmatprep.mubr.bf16.mxu1 %v6265_v10  ;;  %3237 = vmatpush1.bf16.msra.mxu1 %v5149_v17  ;;  %v5157_v17 = vld [vmem:[%s7147_s3 + $0x200] sm:$0xff]  }
 0x1b9   :  { %3238 = vmatprep.subr.bf16.mxu1 %v7312_v7  ;;  %4561 = vmatprep.subr.bf16.mxu0 %v5157_v17 }
 0x1bc   :  { %3239 = vmatpush1.bf16.msra.mxu1 %v5150_v40  ;;  %v7369_v40 = vld [vmem:[#allocation8_spill] sm:$0xff] }
 0x1bd   :  { %3240 = vmatprep.subr.bf16.mxu1 %v7312_v7 }
 0x1be   :  { %2602 = vmatmul.mubr.bf16.gmra.mrb[168].mxu0 %v6065_v5 }
 0x1bf   :  { %2609 = vmatprep.mubr.bf16.mxu0 %v5971_v4  ;;  %2996 = vmatmul.mubr.bf16.gmra.mrb[64].mxu1 %v5551_v46 }
 0x1c0   :  { %3003 = vmatprep.mubr.bf16.mxu1 %v6282_v6  ;;  %3241 = vmatpush1.bf16.msra.mxu1 %v5151_v27  ;;  %v7370_v27 = vld [vmem:[#allocation12_spill] sm:$0xff] }
 0x1c1   :  { %3242 = vmatprep.subr.bf16.mxu1 %v7312_v7 }
 0x1c4   :  { %3243 = vmatpush1.bf16.msra.mxu1 %v5152_v16  ;;  %v7371_v16 = vld [vmem:[#allocation14_spill] sm:$0xff] }
 0x1c5   :  { %3244 = vmatprep.subr.bf16.mxu1 %v7312_v7 }
 0x1c6   :  { %2610 = vmatmul.mubr.bf16.gmra.mrb[172].mxu0 %v6089_v42  ;;  %v7379_v42 = vld [vmem:[#allocation16_spill] sm:$0xff] }
 0x1c7   :  { %2617 = vmatprep.mubr.bf16.mxu0 %v5958_v18  ;;  %3004 = vmatmul.mubr.bf16.gmra.mrb[68].mxu1 %v5577_v12 }
 0x1c8   :  { %3011 = vmatprep.mubr.bf16.mxu1 %v6299_v37  ;;  %3245 = vmatpush1.bf16.msra.mxu1 %v5153_v60  ;;  %v6351_v60 = vsel %vm5836_vm6, %v7371_v16, 0  ;;  %v7373_v16 = vld [vmem:[#allocation11_spill] sm:$0xff] }
 0x1c9   :  { %3246 = vmatprep.subr.bf16.mxu1 %v7312_v7 }
 0x1cc   :  { %3247 = vmatpush1.bf16.msra.mxu1 %v5154_v52  ;;  %v1113_v52 = vrot.slane %v7312_v7, 1 }
 0x1cd   :  { %3248 = vmatprep.subr.bf16.mxu1 %v7312_v7 }
 0x1ce   :  { %2618 = vmatmul.mubr.bf16.gmra.mrb[176].mxu0 %v6131_v33  ;;  %v7378_v33 = vld [vmem:[#allocation13_spill] sm:$0xff] }
 0x1cf   :  { %2625 = vmatprep.mubr.bf16.mxu0 %v6016_v2  ;;  %3012 = vmatmul.mubr.bf16.gmra.mrb[72].mxu1 %v5575_v11 }
 0x1d0   :  { %3019 = vmatprep.mubr.bf16.mxu1 %v6316_v34  ;;  %3249 = vmatpush1.bf16.msra.mxu1 %v5155_v45  ;;  %v5158_v45 = vld [vmem:[%s7147_s3 + $0x1e0] sm:$0xff]  }
 0x1d1   :  { %3250 = vmatprep.subr.bf16.mxu1 %v7312_v7 }
 0x1d4   :  { %3251 = vmatpush1.bf16.msra.mxu1 %v5156_v8  ;;  %v6361_v8 = vsel %vm5836_vm6, %v1113_v52, 0  ;;  %v5160_v52 = vld [vmem:[%s7147_s3 + $0x210] sm:$0xff]  }
 0x1d5   :  { %3252 = vmatprep.subr.bf16.mxu1 %v7312_v7 }
 0x1d6   :  { %2626 = vmatmul.mubr.bf16.gmra.mrb[180].mxu0 %v6150_v29  ;;  %v7377_v29 = vld [vmem:[#allocation19_spill] sm:$0xff] }
 0x1d7   :  { %2633 = vmatprep.mubr.bf16.mxu0 %v6002_v55  ;;  %3020 = vmatmul.mubr.bf16.gmra.mrb[76].mxu1 %v5603_v39 }
 0x1d8   :  { %3027 = vmatprep.mubr.bf16.mxu1 %v6326_v36  ;;  %3253 = vmatpush1.bf16.msra.mxu1 %v5158_v45  ;;  %v6372_v45 = vsel %vm5836_vm6, %v7374_v20, 0  ;;  %v7376_v20 = vld [vmem:[#allocation17_spill] sm:$0xff] }
 0x1d9   :  { %3254 = vmatprep.subr.bf16.mxu1 %v7312_v7 }
 0x1de   :  { %2634 = vmatmul.mubr.bf16.gmra.mrb[184].mxu0 %v6177_v1  ;;  %v7375_v1 = vld [vmem:[#allocation10_spill] sm:$0xff] }
 0x1df   :  { %2641 = vmatprep.mubr.bf16.mxu0 %v6054_v62  ;;  %3028 = vmatmul.mubr.bf16.gmra.mrb[80].mxu1 %v5601_v38 }
 0x1e0   :  { %3035 = vmatprep.mubr.bf16.mxu1 %v6339_v3 }
 0x1e6   :  { %2642 = vmatmul.mubr.bf16.gmra.mrb[188].mxu0 %v6183_v9  ;;  %v5161_v9 = vld [vmem:[%s7147_s3 + $0x218] sm:$0xff]  }
 0x1e7   :  { %2682 = vmatprep.mubr.bf16.mxu0 %v7369_v40  ;;  %3036 = vmatmul.mubr.bf16.gmra.mrb[84].mxu1 %v7370_v27  ;;  %v7372_v40 = vld [vmem:[#allocation9_spill] sm:$0xff] }
 0x1e8   :  { %3043 = vmatprep.mubr.bf16.mxu1 %v6351_v60 }
 0x1ee   :  { %2683 = vmatmul.mubr.bf16.vlgmr.msra.gmra.mrb[64].mxu0 %v6361_v8 }
 0x1ef   :  { %2690 = vmatprep.mubr.bf16.mxu0 %v7372_v40  ;;  %3044 = vmatmul.mubr.bf16.gmra.mrb[88].mxu1 %v7373_v16 }
 0x1f0   :  { %3051 = vmatprep.mubr.bf16.mxu1 %v6372_v45  ;;  %4562 = vmatpush3.bf16.msra.mxu0 %v5157_v17  ;;  %v6387_v17 = vsel %vm5836_vm6, %v7377_v29, 0  ;;  %v5164_v29 = vld [vmem:[%s7147_s3 + $0x228] sm:$0xff]  }
 0x1f1   :  { %4563 = vmatprep.subr.bf16.mxu0 %v5159_v41 }
 0x1f4   :  { %4564 = vmatpush3.bf16.msra.mxu0 %v5159_v41  ;;  %v5163_v41 = vld [vmem:[%s7147_s3 + $0x1e8] sm:$0xff]  }
 0x1f5   :  { %4565 = vmatprep.subr.bf16.mxu0 %v5160_v52  ;;  %3255 = vmatpush1.bf16.msra.mxu1 %v5163_v41  ;;  %v5166_v41 = vld [vmem:[%s7147_s3 + $0x238] sm:$0xff]  }
 0x1f6   :  { %2691 = vmatmul.mubr.bf16.gmra.mrb[68].mxu0 %v6219_v48  ;;  %v5162_v48 = vld [vmem:[%s7147_s3 + $0x220] sm:$0xff]   ;;  %3256 = vmatprep.subr.bf16.mxu1 %v7312_v7 }
 0x1f7   :  { %2698 = vmatprep.mubr.bf16.mxu0 %v7375_v1  ;;  %3052 = vmatmul.mubr.bf16.gmra.mrb[92].mxu1 %v7376_v20  ;;  %v7401_v20 = vld [vmem:[#allocation55_spill] sm:$0xff] }
 0x1f8   :  { %3059 = vmatprep.mubr.bf16.mxu1 %v6387_v17  ;;  %4566 = vmatpush3.bf16.msra.mxu0 %v5160_v52  ;;  %v7380_v52 = vld [vmem:[#allocation25_spill] sm:$0xff] }
 0x1f9   :  { %4567 = vmatprep.subr.bf16.mxu0 %v5161_v9  ;;  %v6406_v5 = vsel %vm5836_vm6, %v7380_v52, 0  ;;  %v7382_v52 = vld [vmem:[#allocation22_spill] sm:$0xff] }
 0x1fc   :  { %4568 = vmatpush3.bf16.msra.mxu0 %v5161_v9  ;;  %v5165_v9 = vld [vmem:[%s7147_s3 + $0x230] sm:$0xff]  }
 0x1fd   :  { %4569 = vmatprep.subr.bf16.mxu0 %v5162_v48 }
 0x1fe   :  { %2699 = vmatmul.mubr.bf16.gmra.mrb[72].mxu0 %v6231_v44 }
 0x1ff   :  { %2706 = vmatprep.mubr.bf16.mxu0 %v7378_v33  ;;  %3060 = vmatmul.mubr.bf16.gmra.mrb[96].mxu1 %v7379_v42  ;;  %v7399_v42 = vld [vmem:[#allocation53_spill] sm:$0xff] }
 0x200   :  { %3067 = vmatprep.mubr.bf16.mxu1 %v6406_v5  ;;  %4570 = vmatpush3.bf16.msra.mxu0 %v5162_v48  ;;  %v6421_v48 = vsel %vm5836_vm6, %v7383_v13, 0  ;;  %v7385_v13 = vld [vmem:[#allocation30_spill] sm:$0xff] }
 0x201   :  { %4571 = vmatprep.subr.bf16.mxu0 %v5164_v29  ;;  %v6434_v24 = vsel %vm5836_vm6, %v7385_v13, 0  ;;  %v5168_v13 = vld [vmem:[%s7147_s3 + $0x1f8] sm:$0xff]  }
 0x204   :  { %4572 = vmatpush3.bf16.msra.mxu0 %v5164_v29  ;;  %v5167_v29 = vld [vmem:[%s7147_s3 + $0x1f0] sm:$0xff]  }
 0x205   :  { %4573 = vmatprep.subr.bf16.mxu0 %v5165_v9  ;;  %3257 = vmatpush1.bf16.msra.mxu1 %v5167_v29 }
 0x206   :  { %2707 = vmatmul.mubr.bf16.gmra.mrb[76].mxu0 %v6248_v23  ;;  %3258 = vmatprep.subr.bf16.mxu1 %v7312_v7 }
 0x207   :  { %2714 = vmatprep.mubr.bf16.mxu0 %v7381_v14  ;;  %3068 = vmatmul.mubr.bf16.gmra.mrb[100].mxu1 %v7382_v52  ;;  %v1354_v52 = vrot.slane %v7387_v31, 1  ;;  %v7390_v31 = vld [vmem:[#allocation32_spill] sm:$0xff] }
 0x208   :  { %3075 = vmatprep.mubr.bf16.mxu1 %v6421_v48  ;;  %4574 = vmatpush3.bf16.msra.mxu0 %v5165_v9  ;;  %v7388_v9 = vshrl.u32 %v7386_v63, 16 }
 0x209   :  { %4575 = vmatprep.subr.bf16.mxu0 %v5166_v41  ;;  %3259 = vmatpush1.bf16.msra.mxu1 %v5168_v13 }
 0x20a   :  { %v1355_v29 = vor.u32 %v1354_v52, %v7388_v9  ;;  %v7391_v52 = vld [vmem:[#allocation34_spill] sm:$0xff] }
 0x20b   :  { %v1225_v9 = vsel %vm5836_vm6, %v7391_v52, 0  ;;  %v7395_v52 = vld [vmem:[#allocation42_spill] sm:$0xff] }
 0x20c   :  { %4576 = vmatpush3.bf16.msra.mxu0 %v5166_v41  ;;  %v7389_v41 = vld [vmem:[#allocation28_spill] sm:$0xff]  ;;  %v6446_v7 = vsel %vm5836_vm6, %v1355_v29, 0  ;;  %v7392_v29 = vld [vmem:[#allocation37_spill] sm:$0xff] }
 0x20e   :  { %2715 = vmatmul.mubr.bf16.gmra.mrb[80].mxu0 %v6265_v10 }
 0x20f   :  { %2722 = vmatprep.mubr.bf16.mxu0 %v7384_v32  ;;  %3076 = vmatmul.mubr.bf16.gmra.mrb[104].mxu1 %v5697_v51  ;;  %v7396_v51 = vld [vmem:[#allocation45_spill] sm:$0xff] }
 0x210   :  { %3083 = vmatprep.mubr.bf16.mxu1 %v6434_v24 }
 0x216   :  { %2723 = vmatmul.mubr.bf16.gmra.mrb[84].mxu0 %v6282_v6 }
 0x217   :  { %2730 = vmatprep.mubr.bf16.mxu0 %v7389_v41  ;;  %3084 = vmatmul.mubr.bf16.gmra.mrb[108].mxu1 %v5733_v54  ;;  %v7393_v54 = vld [vmem:[#allocation33_spill] sm:$0xff] }
 0x218   :  { %3091 = vmatprep.mubr.bf16.mxu1 %v6446_v7  ;;  %v6464_v13 = vsel %vm5836_vm6, %v7393_v54, 0  ;;  %v7398_v54 = vld [vmem:[#allocation50_spill] sm:$0xff] }
 0x21e   :  { %2731 = vmatmul.mubr.bf16.gmra.mrb[88].mxu0 %v6299_v37 }
 0x21f   :  { %2738 = vmatprep.mubr.bf16.mxu0 %v7390_v31  ;;  %3092 = vmatmul.mubr.bf16.gmra.mrb[112].mxu1 %v7386_v63  ;;  %v7394_v63 = vld [vmem:[#allocation41_spill] sm:$0xff] }
 0x220   :  { %3099 = vmatprep.mubr.bf16.mxu1 %v1225_v9 }
 0x226   :  { %2739 = vmatmul.mubr.bf16.gmra.mrb[92].mxu0 %v6316_v34 }
 0x227   :  { %2746 = vmatprep.mubr.bf16.mxu0 %v7392_v29  ;;  %3100 = vmatmul.mubr.bf16.gmra.mrb[116].mxu1 %v5767_v50  ;;  %v7397_v50 = vld [vmem:[#allocation47_spill] sm:$0xff] }
 0x228   :  { %3107 = vmatprep.mubr.bf16.mxu1 %v6464_v13 }
 0x22e   :  { %2747 = vmatmul.mubr.bf16.gmra.mrb[96].mxu0 %v6326_v36 }
 0x22f   :  { %2754 = vmatprep.mubr.bf16.mxu0 %v7394_v63  ;;  %3108 = vmatmul.mubr.bf16.gmra.mrb[120].mxu1 %v5765_v43  ;;  %v7400_v43 = vld [vmem:[#allocation54_spill] sm:$0xff] }
 0x230   :  { %3115 = vmatprep.mubr.bf16.mxu1 %v7395_v52 }
 0x236   :  { %2755 = vmatmul.mubr.bf16.gmra.mrb[100].mxu0 %v6339_v3 }
 0x237   :  { %2762 = vmatprep.mubr.bf16.mxu0 %v7396_v51  ;;  %3116 = vmatmul.mubr.bf16.gmra.mrb[124].mxu1 %v5801_v28  ;;  %v7402_v28 = vld [vmem:[#allocation57_spill] sm:$0xff]  ;;  %v7403_v51 = vld [vmem:[#allocation59_spill] sm:$0xff] }
 0x238   :  { %3123 = vmatprep.mubr.bf16.mxu1 %v7397_v50 }
 0x23e   :  { %2763 = vmatmul.mubr.bf16.gmra.mrb[104].mxu0 %v6351_v60 }
 0x23f   :  { %2770 = vmatprep.mubr.bf16.mxu0 %v7398_v54  ;;  %3124 = vmatmul.mubr.bf16.gmra.mrb[0].mxu1 %v5799_v57  ;;  %v7404_v57 = vld [vmem:[#allocation61_spill] sm:$0xff] }
 0x240   :  { %3131 = vmatprep.mubr.bf16.mxu1 %v7399_v42 }
 0x246   :  { %2771 = vmatmul.mubr.bf16.gmra.mrb[108].mxu0 %v6372_v45 }
 0x247   :  { %2778 = vmatprep.mubr.bf16.mxu0 %v7400_v43  ;;  %3132 = vmatmul.mubr.bf16.gmra.mrb[4].mxu1 %v5840_v19 }
 0x248   :  { %3139 = vmatprep.mubr.bf16.mxu1 %v7401_v20 }
 0x24e   :  { %2779 = vmatmul.mubr.bf16.gmra.mrb[112].mxu0 %v6387_v17 }
 0x24f   :  { %2786 = vmatprep.mubr.bf16.mxu0 %v7402_v28  ;;  %3140 = vmatmul.mubr.bf16.gmra.mrb[8].mxu1 %v5828_v0  ;;  %v7407_v28 = vld [vmem:[#allocation29_spill] sm:$0xff] }
 0x250   :  { %3147 = vmatprep.mubr.bf16.mxu1 %v7403_v51  ;;  %v6499_v0 = vsel %vm5452_vm3, 0, %v7407_v28 }
 0x251   :  { %7408 = vst [vmem:[#allocation12_spill] sm:$0xff] %v6499_v0 }
 0x256   :  { %2787 = vmatmul.mubr.bf16.gmra.mrb[116].mxu0 %v6406_v5 }
 0x257   :  { %2794 = vmatprep.mubr.bf16.mxu0 %v6049_v25  ;;  %3148 = vmatmul.mubr.bf16.gmra.mrb[12].mxu1 %v5878_v21  ;;  %v7409_v21 = vld [vmem:[#allocation65_spill] sm:$0xff] }
 0x258   :  { %3155 = vmatprep.mubr.bf16.mxu1 %v7404_v57 }
 0x259   :  { %v6491_v43 = vpop.f32.mrb[140].mxu0 }
 0x25a   :  { %7405 = vst [vmem:[#allocation15_spill] sm:$0xff] %v6491_v43  ;;  %v2549_v19 = vpop.f32.mrb[141].mxu0 }
 0x25b   :  { %v6493_v54 = vpop.f32.mrb[142].mxu0 }
 0x25c   :  { %7406 = vst [vmem:[#allocation8_spill] sm:$0xff] %v6493_v54  ;;  %v2552_v63 = vpop.f32.mrb[143].mxu0 }
 0x25d   :  { %v7412_v63 = vld [vmem:[#allocation66_spill] sm:$0xff] }
 0x25e   :  { %2795 = vmatmul.mubr.bf16.gmra.mrb[120].mxu0 %v6421_v48 }
 0x25f   :  { %2802 = vmatprep.mubr.bf16.mxu0 %v6499_v0  ;;  %3156 = vmatmul.mubr.bf16.gmra.mrb[16].mxu1 %v5870_v35 }
 0x260   :  { %3163 = vmatprep.mubr.bf16.mxu1 %v7409_v21 }
 0x261   :  { %v6504_v25 = vpop.f32.mrb[144].mxu0 }
 0x262   :  { %7410 = vst [vmem:[#allocation14_spill] sm:$0xff] %v6504_v25  ;;  %v2557_v43 = vpop.f32.mrb[145].mxu0 }
 0x263   :  { %v6506_v19 = vpop.f32.mrb[146].mxu0  ;;  %v7416_v43 = vld [vmem:[#allocation70_spill] sm:$0xff] }
 0x264   :  { %7411 = vst [vmem:[#allocation9_spill] sm:$0xff] %v6506_v19  ;;  %v2560_v54 = vpop.f32.mrb[147].mxu0 }
 0x266   :  { %2803 = vmatmul.mubr.bf16.gmra.mrb[124].mxu0 %v6434_v24 }
 0x267   :  { %2810 = vmatprep.mubr.bf16.mxu0 %v7412_v63  ;;  %3164 = vmatmul.mubr.bf16.gmra.mrb[20].mxu1 %v5931_v30 }
 0x268   :  { %3171 = vmatprep.mubr.bf16.mxu1 %v7413_v58 }
 0x269   :  { %v6512_v28 = vpop.f32.mrb[148].mxu0 }
 0x26a   :  { %7414 = vst [vmem:[#allocation20_spill] sm:$0xff] %v6512_v28  ;;  %v2565_v0 = vpop.f32.mrb[149].mxu0  ;;  %v7419_v28 = vld [vmem:[#allocation71_spill] sm:$0xff] }
 0x26b   :  { %v6514_v35 = vpop.f32.mrb[150].mxu0  ;;  %v7420_v0 = vld [vmem:[#allocation72_spill] sm:$0xff] }
 0x26c   :  { %7415 = vst [vmem:[#allocation10_spill] sm:$0xff] %v6514_v35  ;;  %v2568_v16 = vpop.f32.mrb[151].mxu0 }
 0x26e   :  { %2811 = vmatmul.mubr.bf16.gmra.mrb[128].mxu0 %v6361_v8 }
 0x26f   :  { %2818 = vmatprep.mubr.bf16.mxu0 %v6146_v53  ;;  %3172 = vmatmul.mubr.bf16.gmra.mrb[24].mxu1 %v5916_v56 }
 0x270   :  { %3179 = vmatprep.mubr.bf16.mxu1 %v7416_v43 }
 0x271   :  { %v6520_v54 = vpop.f32.mrb[152].mxu0 }
 0x272   :  { %7417 = vst [vmem:[#allocation19_spill] sm:$0xff] %v6520_v54  ;;  %v2573_v63 = vpop.f32.mrb[153].mxu0  ;;  %v6767_v54 = vld [vmem:[%s7148_s4] ss:$0 sm:$0xff] }
 0x273   :  { %v6522_v19 = vpop.f32.mrb[154].mxu0 }
 0x274   :  { %7418 = vst [vmem:[#allocation13_spill] sm:$0xff] %v6522_v19  ;;  %v2576_v25 = vpop.f32.mrb[155].mxu0 }
 0x276   :  { %2819 = vmatmul.mubr.bf16.gmra.mrb[132].mxu0 %v1225_v9 }
 0x277   :  { %2826 = vmatprep.mubr.bf16.mxu0 %v7419_v28  ;;  %3180 = vmatmul.mubr.bf16.gmra.mrb[28].mxu1 %v5971_v4 }
 0x278   :  { %3187 = vmatprep.mubr.bf16.mxu1 %v7420_v0 }
 0x279   :  { %v6527_v16 = vpop.f32.mrb[156].mxu0 }
 0x27a   :  { %7421 = vst [vmem:[#allocation25_spill] sm:$0xff] %v6527_v16  ;;  %v2581_v35 = vpop.f32.mrb[157].mxu0 }
 0x27b   :  { %v6529_v30 = vpop.f32.mrb[158].mxu0 }
 0x27c   :  { %7422 = vst [vmem:[#allocation18_spill] sm:$0xff] %v6529_v30  ;;  %v2584_v56 = vpop.f32.mrb[159].mxu0 }
 0x27e   :  { %2827 = vmatmul.mubr.bf16.gmra.mrb[136].mxu0 %v6464_v13 }
 0x27f   :  { %3188 = vmatmul.mubr.bf16.gmra.mrb[32].mxu1 %v5958_v18  ;;  %4577 = vmatprep.mubr.bf16.mxu0 %v6231_v44 }
 0x280   :  { %3195 = vmatprep.mubr.bf16.mxu1 %v6188_v49 }
 0x281   :  { %v6535_v25 = vpop.f32.mrb[160].mxu0 }
 0x282   :  { %7423 = vst [vmem:[#allocation24_spill] sm:$0xff] %v6535_v25  ;;  %v2589_v9 = vpop.f32.mrb[161].mxu0 }
 0x283   :  { %v6537_v63 = vpop.f32.mrb[162].mxu0 }
 0x284   :  { %7424 = vst [vmem:[#allocation23_spill] sm:$0xff] %v6537_v63  ;;  %v2592_v19 = vpop.f32.mrb[163].mxu0 }
 0x286   :  { %4578 = vmatmul.mubr.bf16.vlgmr.msra.gmra.mrb[192].mxu0 %v6248_v23 }
 0x287   :  { %3196 = vmatmul.mubr.bf16.gmra.mrb[36].mxu1 %v6016_v2  ;;  %4581 = vmatprep.mubr.bf16.mxu0 %v6265_v10 }
 0x288   :  { %3203 = vmatprep.mubr.bf16.mxu1 %v6200_v61 }
 0x289   :  { %v6543_v56 = vpop.f32.mrb[164].mxu0 }
 0x28a   :  { %7425 = vst [vmem:[#allocation30_spill] sm:$0xff] %v6543_v56  ;;  %v2597_v35 = vpop.f32.mrb[165].mxu0 }
 0x28b   :  { %v6545_v44 = vpop.f32.mrb[166].mxu0 }
 0x28c   :  { %7426 = vst [vmem:[#allocation28_spill] sm:$0xff] %v6545_v44  ;;  %v2600_v30 = vpop.f32.mrb[167].mxu0 }
 0x28d   :  { %v7429_v30 = vld [vmem:[#allocation63_spill] sm:$0xff] }
 0x28e   :  { %4582 = vmatmul.mubr.bf16.gmra.mrb[196].mxu0 %v6282_v6  ;;  %v6561_v6 = vsel %vm5836_vm6, %v7429_v30, 0 }
 0x28f   :  { %3204 = vmatmul.mubr.bf16.gmra.mrb[40].mxu1 %v6002_v55  ;;  %4585 = vmatprep.mubr.bf16.mxu0 %v6299_v37 }
 0x290   :  { %3211 = vmatprep.mubr.bf16.mxu1 %v6212_v59 }
 0x291   :  { %v6551_v23 = vpop.f32.mrb[168].mxu0 }
 0x292   :  { %7427 = vst [vmem:[#allocation32_spill] sm:$0xff] %v6551_v23  ;;  %v2605_v19 = vpop.f32.mrb[169].mxu0  ;;  %v7483_v23 = vld [vmem:[#allocation58_spill] sm:$0xff] }
 0x293   :  { %v6553_v10 = vpop.f32.mrb[170].mxu0 }
 0x294   :  { %7428 = vst [vmem:[#allocation34_spill] sm:$0xff] %v6553_v10  ;;  %v2608_v9 = vpop.f32.mrb[171].mxu0 }
 0x296   :  { %4586 = vmatmul.mubr.bf16.gmra.mrb[200].mxu0 %v6316_v34 }
 0x297   :  { %3212 = vmatmul.mubr.bf16.gmra.mrb[44].mxu1 %v6054_v62  ;;  %4589 = vmatprep.mubr.bf16.mxu0 %v6326_v36 }
 0x298   :  { %3219 = vmatprep.mubr.bf16.mxu1 %v6561_v6 }
 0x299   :  { %v6564_v37 = vpop.f32.mrb[172].mxu0 }
 0x29a   :  { %7430 = vst [vmem:[#allocation37_spill] sm:$0xff] %v6564_v37  ;;  %v2613_v35 = vpop.f32.mrb[173].mxu0 }
 0x29b   :  { %v6566_v19 = vpop.f32.mrb[174].mxu0  ;;  %v7440_v35 = vld [vmem:[#allocation11_spill] sm:$0xff] }
 0x29c   :  { %7431 = vst [vmem:[#allocation33_spill] sm:$0xff] %v6566_v19  ;;  %v2616_v10 = vpop.f32.mrb[175].mxu0 }
 0x29e   :  { %4590 = vmatmul.mubr.bf16.gmra.mrb[204].mxu0 %v6339_v3 }
 0x29f   :  { %3220 = vmatmul.mubr.bf16.gmra.mrb[48].mxu1 %v6045_v26  ;;  %4593 = vmatprep.mubr.bf16.mxu0 %v6351_v60 }
 0x2a0   :  { %3260 = vmatprep.mubr.bf16.mxu1 %v5534_v22 }
 0x2a1   :  { %v6572_v34 = vpop.f32.mrb[176].mxu0 }
 0x2a2   :  { %7432 = vst [vmem:[#allocation42_spill] sm:$0xff] %v6572_v34  ;;  %v2621_v15 = vpop.f32.mrb[177].mxu0  ;;  %v7481_v34 = vld [vmem:[#allocation56_spill] sm:$0xff] }
 0x2a3   :  { %v6574_v36 = vpop.f32.mrb[178].mxu0  ;;  %v7441_v15 = vld [vmem:[#allocation41_spill] sm:$0xff] }
 0x2a4   :  { %7433 = vst [vmem:[#allocation47_spill] sm:$0xff] %v6574_v36  ;;  %v2624_v9 = vpop.f32.mrb[179].mxu0 }
 0x2a5   :  { %v7442_v9 = vld [vmem:[#allocation17_spill] sm:$0xff] }
 0x2a6   :  { %4594 = vmatmul.mubr.bf16.gmra.mrb[208].mxu0 %v6372_v45 }
 0x2a7   :  { %3261 = vmatmul.mubr.bf16.vlgmr.msra.gmra.mrb[52].mxu1 %v7372_v40  ;;  %4597 = vmatprep.mubr.bf16.mxu0 %v6387_v17 }
 0x2a8   :  { %3268 = vmatprep.mubr.bf16.mxu1 %v5553_v47 }
 0x2a9   :  { %v6580_v3 = vpop.f32.mrb[180].mxu0 }
 0x2aa   :  { %7434 = vst [vmem:[#allocation53_spill] sm:$0xff] %v6580_v3  ;;  %v2629_v10 = vpop.f32.mrb[181].mxu0  ;;  %v7477_v3 = vld [vmem:[#allocation51_spill] sm:$0xff] }
 0x2ab   :  { %v6582_v60 = vpop.f32.mrb[182].mxu0 }
 0x2ac   :  { %7435 = vst [vmem:[#allocation55_spill] sm:$0xff] %v6582_v60  ;;  %v2632_v22 = vpop.f32.mrb[183].mxu0 }
 0x2ad   :  { %v7443_v22 = vld [vmem:[#allocation45_spill] sm:$0xff] }
 0x2ae   :  { %4598 = vmatmul.mubr.bf16.gmra.mrb[212].mxu0 %v6406_v5 }
 0x2af   :  { %3269 = vmatmul.mubr.bf16.gmra.mrb[56].mxu1 %v7375_v1  ;;  %4601 = vmatprep.mubr.bf16.mxu0 %v6421_v48 }
 0x2b0   :  { %3276 = vmatprep.mubr.bf16.mxu1 %v5551_v46 }
 0x2b1   :  { %v6588_v45 = vpop.f32.mrb[184].mxu0 }
 0x2b2   :  { %7436 = vst [vmem:[#allocation59_spill] sm:$0xff] %v6588_v45  ;;  %v2637_v40 = vpop.f32.mrb[185].mxu0  ;;  %v7473_v45 = vld [vmem:[#allocation48_spill] sm:$0xff] }
 0x2b3   :  { %v6590_v17 = vpop.f32.mrb[186].mxu0  ;;  %v7444_v40 = vld [vmem:[#allocation16_spill] sm:$0xff] }
 0x2b4   :  { %7437 = vst [vmem:[#allocation61_spill] sm:$0xff] %v6590_v17  ;;  %v2640_v47 = vpop.f32.mrb[187].mxu0 }
 0x2b6   :  { %4602 = vmatmul.mubr.bf16.gmra.mrb[216].mxu0 %v6434_v24 }
 0x2b7   :  { %3277 = vmatmul.mubr.bf16.gmra.mrb[60].mxu1 %v7378_v33  ;;  %4605 = vmatprep.mubr.bf16.mxu0 %v6446_v7 }
 0x2b8   :  { %3284 = vmatprep.mubr.bf16.mxu1 %v5577_v12 }
 0x2b9   :  { %v6596_v5 = vpop.f32.mrb[188].mxu0 }
 0x2ba   :  { %7438 = vst [vmem:[#allocation29_spill] sm:$0xff] %v6596_v5  ;;  %v2645_v1 = vpop.f32.mrb[189].mxu0  ;;  %v7469_v5 = vld [vmem:[#allocation46_spill] sm:$0xff] }
 0x2bb   :  { %v6598_v48 = vpop.f32.mrb[190].mxu0 }
 0x2bc   :  { %7439 = vst [vmem:[#allocation65_spill] sm:$0xff] %v6598_v48  ;;  %v2648_v46 = vpop.f32.mrb[191].mxu0 }
 0x2bd   :  { %v7445_v46 = vld [vmem:[#allocation50_spill] sm:$0xff] }
 0x2be   :  { %4606 = vmatmul.mubr.bf16.gmra.mrb[220].mxu0 %v6361_v8 }
 0x2bf   :  { %3285 = vmatmul.mubr.bf16.gmra.mrb[64].mxu1 %v7381_v14  ;;  %4609 = vmatprep.mubr.bf16.mxu0 %v6464_v13 }
 0x2c0   :  { %3292 = vmatprep.mubr.bf16.mxu1 %v5575_v11 }
 0x2c1   :  { %v6604_v24 = vpop.f32.mrb[64].mxu0 }
 0x2c2   :  { %v2686_v33 = vpop.f32.mrb[65].mxu0 }
 0x2c3   :  { %v6606_v7 = vpop.f32.mrb[66].mxu0  ;;  %v7446_v33 = vld [vmem:[#allocation22_spill] sm:$0xff] }
 0x2c4   :  { %v2689_v12 = vpop.f32.mrb[67].mxu0 }
 0x2c6   :  { %4610 = vmatmul.mubr.bf16.gmra.mrb[224].mxu0 %v7395_v52 }
 0x2c7   :  { %3293 = vmatmul.mubr.bf16.gmra.mrb[68].mxu1 %v7384_v32  ;;  %4613 = vmatprep.mubr.bf16.mxu0 %v7397_v50 }
 0x2c8   :  { %3300 = vmatprep.mubr.bf16.mxu1 %v5603_v39 }
 0x2c9   :  { %v6612_v30 = vpop.f32.mrb[68].mxu0 }
 0x2ca   :  { %v2694_v14 = vpop.f32.mrb[69].mxu0 }
 0x2cb   :  { %v6614_v13 = vpop.f32.mrb[70].mxu0 }
 0x2cc   :  { %v2697_v11 = vpop.f32.mrb[71].mxu0 }
 0x2cd   :  { %v7447_v11 = vld [vmem:[#allocation54_spill] sm:$0xff] }
 0x2ce   :  { %4614 = vmatmul.mubr.bf16.gmra.mrb[228].mxu0 %v7399_v42 }
 0x2cf   :  { %3301 = vmatmul.mubr.bf16.gmra.mrb[72].mxu1 %v7389_v41  ;;  %4617 = vmatprep.mubr.bf16.mxu0 %v7401_v20 }
 0x2d0   :  { %3308 = vmatprep.mubr.bf16.mxu1 %v5601_v38 }
 0x2d1   :  { %v6620_v52 = vpop.f32.mrb[72].mxu0 }
 0x2d2   :  { %v2702_v32 = vpop.f32.mrb[73].mxu0 }
 0x2d3   :  { %v6622_v50 = vpop.f32.mrb[74].mxu0  ;;  %v7448_v32 = vld [vmem:[#allocation21_spill] sm:$0xff] }
 0x2d4   :  { %v2705_v39 = vpop.f32.mrb[75].mxu0 }
 0x2d6   :  { %4618 = vmatmul.mubr.bf16.gmra.mrb[232].mxu0 %v7403_v51 }
 0x2d7   :  { %3309 = vmatmul.mubr.bf16.gmra.mrb[76].mxu1 %v7390_v31  ;;  %4621 = vmatprep.mubr.bf16.mxu0 %v7404_v57 }
 0x2d8   :  { %3316 = vmatprep.mubr.bf16.mxu1 %v7370_v27 }
 0x2d9   :  { %v6628_v42 = vpop.f32.mrb[76].mxu0 }
 0x2da   :  { %v2710_v41 = vpop.f32.mrb[77].mxu0 }
 0x2db   :  { %v6630_v20 = vpop.f32.mrb[78].mxu0 }
 0x2dc   :  { %v2713_v38 = vpop.f32.mrb[79].mxu0 }
 0x2dd   :  { %v7449_v38 = vld [vmem:[#allocation57_spill] sm:$0xff] }
 0x2de   :  { %4622 = vmatmul.mubr.bf16.gmra.mrb[236].mxu0 %v7409_v21 }
 0x2df   :  { %3317 = vmatmul.mubr.bf16.gmra.mrb[80].mxu1 %v7392_v29  ;;  %4625 = vmatprep.mubr.bf16.mxu0 %v7413_v58 }
 0x2e0   :  { %3324 = vmatprep.mubr.bf16.mxu1 %v7440_v35  ;;  %v7450_v35 = vld [vmem:[#allocation27_spill] sm:$0xff] }
 0x2e1   :  { %v6636_v51 = vpop.f32.mrb[80].mxu0 }
 0x2e2   :  { %v2718_v31 = vpop.f32.mrb[81].mxu0 }
 0x2e3   :  { %v6638_v57 = vpop.f32.mrb[82].mxu0 }
 0x2e4   :  { %v2721_v27 = vpop.f32.mrb[83].mxu0 }
 0x2e6   :  { %4626 = vmatmul.mubr.bf16.gmra.mrb[240].mxu0 %v7416_v43 }
 0x2e7   :  { %3325 = vmatmul.mubr.bf16.gmra.mrb[84].mxu1 %v7441_v15  ;;  %4629 = vmatprep.mubr.bf16.mxu0 %v7420_v0 }
 0x2e8   :  { %3332 = vmatprep.mubr.bf16.mxu1 %v7442_v9  ;;  %v7451_v9 = vld [vmem:[#allocation60_spill] sm:$0xff] }
 0x2e9   :  { %v6644_v21 = vpop.f32.mrb[84].mxu0 }
 0x2ea   :  { %v2726_v29 = vpop.f32.mrb[85].mxu0 }
 0x2eb   :  { %v6646_v58 = vpop.f32.mrb[86].mxu0  ;;  %v7452_v29 = vld [vmem:[#allocation26_spill] sm:$0xff] }
 0x2ec   :  { %v2729_v10 = vpop.f32.mrb[87].mxu0 }
 0x2ee   :  { %4630 = vmatmul.mubr.bf16.gmra.mrb[244].mxu0 %v6188_v49 }
 0x2ef   :  { %3333 = vmatmul.mubr.bf16.gmra.mrb[88].mxu1 %v7443_v22  ;;  %4633 = vmatprep.mubr.bf16.mxu0 %v6200_v61 }
 0x2f0   :  { %3340 = vmatprep.mubr.bf16.mxu1 %v7444_v40 }
 0x2f1   :  { %v6652_v43 = vpop.f32.mrb[88].mxu0 }
 0x2f2   :  { %v2734_v47 = vpop.f32.mrb[89].mxu0 }
 0x2f3   :  { %v6654_v0 = vpop.f32.mrb[90].mxu0 }
 0x2f4   :  { %v2737_v1 = vpop.f32.mrb[91].mxu0 }
 0x2f5   :  { %v7453_v1 = vld [vmem:[#allocation12_spill] sm:$0xff] }
 0x2f6   :  { %4634 = vmatmul.mubr.bf16.gmra.mrb[248].mxu0 %v6212_v59 }
 0x2f7   :  { %3341 = vmatmul.mubr.bf16.gmra.mrb[92].mxu1 %v7445_v46  ;;  %4637 = vmatprep.mubr.bf16.mxu0 %v6561_v6  ;;  %v7454_v46 = vmov 0  }
 0x2f8   :  { %3348 = vmatprep.mubr.bf16.mxu1 %v7446_v33 }
 0x2f9   :  { %v6660_v49 = vpop.f32.mrb[92].mxu0 }
 0x2fa   :  { %v2742_v12 = vpop.f32.mrb[93].mxu0 }
 0x2fb   :  { %v6662_v61 = vpop.f32.mrb[94].mxu0 }
 0x2fc   :  { %v2745_v14 = vpop.f32.mrb[95].mxu0 }
 0x2fe   :  { %4638 = vmatmul.mubr.bf16.gmra.mrb[252].mxu0 %v6361_v8 }
 0x2ff   :  { %3349 = vmatmul.mubr.bf16.gmra.mrb[96].mxu1 %v7447_v11 }
 0x300   :  { %3356 = vmatprep.mubr.bf16.mxu1 %v7448_v32  ;;  %v7455_v32 = vld [vmem:[#allocation7_spill] sm:$0xff] }
 0x301   :  { %v6667_v39 = vpop.f32.mrb[96].mxu0 }
 0x302   :  { %v2750_v59 = vpop.f32.mrb[97].mxu0 }
 0x303   :  { %v6669_v41 = vpop.f32.mrb[98].mxu0  ;;  %v7456_v59 = vld [vmem:[#allocation31_spill] sm:$0xff] }
 0x304   :  { %v2753_v6 = vpop.f32.mrb[99].mxu0 }
 0x307   :  { %3357 = vmatmul.mubr.bf16.gmra.mrb[100].mxu1 %v7449_v38 }
 0x308   :  { %3364 = vmatprep.mubr.bf16.mxu1 %v7450_v35 }
 0x309   :  { %v6673_v31 = vpop.f32.mrb[100].mxu0 }
 0x30a   :  { %v2758_v27 = vpop.f32.mrb[101].mxu0 }
 0x30b   :  { %v6675_v15 = vpop.f32.mrb[102].mxu0 }
 0x30c   :  { %v2761_v8 = vpop.f32.mrb[103].mxu0 }
 0x30d   :  { %v7459_v8 = vld [vmem:[#allocation36_spill] sm:$0xff] }
 0x30f   :  { %3365 = vmatmul.mubr.bf16.gmra.mrb[104].mxu1 %v7451_v9 }
 0x310   :  { %3372 = vmatprep.mubr.bf16.mxu1 %v7452_v29 }
 0x311   :  { %v6679_v10 = vpop.f32.mrb[104].mxu0 }
 0x312   :  { %v2766_v22 = vpop.f32.mrb[105].mxu0 }
 0x313   :  { %v6681_v40 = vpop.f32.mrb[106].mxu0 }
 0x314   :  { %v2769_v47 = vpop.f32.mrb[107].mxu0 }
 0x317   :  { %3373 = vmatmul.mubr.bf16.gmra.mrb[108].mxu1 %v7453_v1  ;;  %v7462_v1 = vld [vmem:[#allocation35_spill] sm:$0xff] }
 0x318   :  { %3380 = vmatprep.mubr.bf16.mxu1 %v7454_v46 }
 0x319   :  { %v6685_v33 = vpop.f32.mrb[108].mxu0 }
 0x31a   :  { %v2774_v12 = vpop.f32.mrb[109].mxu0 }
 0x31b   :  { %v6687_v14 = vpop.f32.mrb[110].mxu0 }
 0x31c   :  { %v2777_v11 = vpop.f32.mrb[111].mxu0 }
 0x31f   :  { %3381 = vmatmul.mubr.bf16.gmra.mrb[112].mxu1 %v7455_v32 }
 0x320   :  { %3388 = vmatprep.mubr.bf16.mxu1 %v7456_v59 }
 0x321   :  { %v6691_v6 = vpop.f32.mrb[112].mxu0 }
 0x322   :  { %7457 = vst [vmem:[#allocation66_spill] sm:$0xff] %v6691_v6  ;;  %v2782_v38 = vpop.f32.mrb[113].mxu0 }
 0x323   :  { %v6693_v35 = vpop.f32.mrb[114].mxu0 }
 0x324   :  { %7458 = vst [vmem:[#allocation67_spill] sm:$0xff] %v6693_v35  ;;  %v2785_v27 = vpop.f32.mrb[115].mxu0  ;;  %v4681_v35 = vadd.f32 %v6767_v54, %v6620_v52 }
 0x325   :  { %v7465_v27 = vld [vmem:[#allocation39_spill] sm:$0xff] }
 0x327   :  { %3389 = vmatmul.mubr.bf16.gmra.mrb[116].mxu1 %v6146_v53  ;;  %v7466_v53 = vld [vmem:[#allocation40_spill] sm:$0xff] }
 0x328   :  { %3396 = vmatprep.mubr.bf16.mxu1 %v7459_v8 }
 0x329   :  { %v6697_v9 = vpop.f32.mrb[116].mxu0 }
 0x32a   :  { %7460 = vst [vmem:[#allocation70_spill] sm:$0xff] %v6697_v9  ;;  %v2790_v29 = vpop.f32.mrb[117].mxu0 }
 0x32b   :  { %v6699_v22 = vpop.f32.mrb[118].mxu0 }
 0x32c   :  { %7461 = vst [vmem:[#allocation71_spill] sm:$0xff] %v6699_v22  ;;  %v2793_v47 = vpop.f32.mrb[119].mxu0  ;;  %v4677_v22 = vadd.f32 %v6767_v54, %v6612_v30 }
 0x32f   :  { %3397 = vmatmul.mubr.bf16.gmra.mrb[120].mxu1 %v7419_v28  ;;  %v7470_v28 = vld [vmem:[#allocation38_spill] sm:$0xff] }
 0x330   :  { %3404 = vmatprep.mubr.bf16.mxu1 %v7462_v1 }
 0x331   :  { %v6703_v12 = vpop.f32.mrb[120].mxu0 }
 0x332   :  { %7463 = vst [vmem:[#allocation72_spill] sm:$0xff] %v6703_v12  ;;  %v2798_v11 = vpop.f32.mrb[121].mxu0 }
 0x333   :  { %v6705_v59 = vpop.f32.mrb[122].mxu0 }
 0x334   :  { %7464 = vst [vmem:[#allocation63_spill] sm:$0xff] %v6705_v59  ;;  %v2801_v38 = vpop.f32.mrb[123].mxu0 }
 0x337   :  { %3405 = vmatmul.mubr.bf16.gmra.mrb[124].mxu1 %v7465_v27  ;;  %v7474_v27 = vld [vmem:[#allocation44_spill] sm:$0xff] }
 0x338   :  { %3412 = vmatprep.mubr.bf16.mxu1 %v7466_v53 }
 0x339   :  { %v6709_v8 = vpop.f32.mrb[124].mxu0 }
 0x33a   :  { %7467 = vst [vmem:[#allocation11_spill] sm:$0xff] %v6709_v8  ;;  %v2806_v29 = vpop.f32.mrb[125].mxu0 }
 0x33b   :  { %v6711_v48 = vpop.f32.mrb[126].mxu0 }
 0x33c   :  { %7468 = vst [vmem:[#allocation41_spill] sm:$0xff] %v6711_v48  ;;  %v2809_v47 = vpop.f32.mrb[127].mxu0 }
 0x33f   :  { %3413 = vmatmul.mubr.bf16.gmra.mrb[0].mxu1 %v7469_v5  ;;  %v7478_v5 = vld [vmem:[#allocation43_spill] sm:$0xff] }
 0x340   :  { %3420 = vmatprep.mubr.bf16.mxu1 %v7470_v28 }
 0x341   :  { %v6715_v1 = vpop.f32.mrb[128].mxu0 }
 0x342   :  { %7471 = vst [vmem:[#allocation17_spill] sm:$0xff] %v6715_v1  ;;  %v2814_v11 = vpop.f32.mrb[129].mxu0 }
 0x343   :  { %v6717_v17 = vpop.f32.mrb[130].mxu0 }
 0x344   :  { %7472 = vst [vmem:[#allocation45_spill] sm:$0xff] %v6717_v17  ;;  %v2817_v38 = vpop.f32.mrb[131].mxu0 }
 0x347   :  { %3421 = vmatmul.mubr.bf16.gmra.mrb[4].mxu1 %v7473_v45  ;;  %v7482_v45 = vld [vmem:[#allocation52_spill] sm:$0xff] }
 0x348   :  { %3428 = vmatprep.mubr.bf16.mxu1 %v7474_v27 }
 0x349   :  { %v6721_v53 = vpop.f32.mrb[132].mxu0 }
 0x34a   :  { %7475 = vst [vmem:[#allocation16_spill] sm:$0xff] %v6721_v53  ;;  %v2822_v29 = vpop.f32.mrb[133].mxu0 }
 0x34b   :  { %v6723_v60 = vpop.f32.mrb[134].mxu0 }
 0x34c   :  { %7476 = vst [vmem:[#allocation50_spill] sm:$0xff] %v6723_v60  ;;  %v2825_v47 = vpop.f32.mrb[135].mxu0  ;;  %v4675_v60 = vadd.f32 %v6767_v54, %v6606_v7 }
 0x34d   :  { %v7484_v47 = vld [vmem:[#allocation49_spill] sm:$0xff] }
 0x34f   :  { %3429 = vmatmul.mubr.bf16.gmra.mrb[8].mxu1 %v7477_v3 }
 0x350   :  { %3436 = vmatprep.mubr.bf16.mxu1 %v7478_v5 }
 0x351   :  { %v6727_v28 = vpop.f32.mrb[136].mxu0 }
 0x352   :  { %7479 = vst [vmem:[#allocation22_spill] sm:$0xff] %v6727_v28  ;;  %v2830_v11 = vpop.f32.mrb[137].mxu0 }
 0x353   :  { %v6729_v36 = vpop.f32.mrb[138].mxu0 }
 0x354   :  { %7480 = vst [vmem:[#allocation54_spill] sm:$0xff] %v6729_v36  ;;  %v2833_v38 = vpop.f32.mrb[139].mxu0 }
 0x355   :  { %v7485_v38 = vld [vmem:[#allocation62_spill] sm:$0xff] }
 0x357   :  { %3437 = vmatmul.mubr.bf16.gmra.mrb[12].mxu1 %v7481_v34 }
 0x358   :  { %3444 = vmatprep.mubr.bf16.mxu1 %v7482_v45 }
 0x359   :  { %v4579_v27 = vpop.f32.mrb[192].mxu0 }
 0x35a   :  { %v3551_v19 = vpop.f32.mrb[193].mxu0 }
 0x35b   :  { %v4580_v29 = vpop.f32.mrb[194].mxu0 }
 0x35c   :  { %v3554_v37 = vpop.f32.mrb[195].mxu0 }
 0x35f   :  { %3445 = vmatmul.mubr.bf16.gmra.mrb[16].mxu1 %v7483_v23 }
 0x360   :  { %3452 = vmatprep.mubr.bf16.mxu1 %v7484_v47  ;;  %v7486_v47 = vld [vmem:[#allocation64_spill] sm:$0xff] }
 0x361   :  { %v6735_v3 = vpop.f32.mrb[196].mxu0 }
 0x362   :  { %v6737_v5 = vpop.f32.mrb[197].mxu0 }
 0x363   :  { %v6739_v11 = vpop.f32.mrb[198].mxu0 }
 0x364   :  { %v6741_v44 = vpop.f32.mrb[199].mxu0 }
 0x367   :  { %3453 = vmatmul.mubr.bf16.gmra.mrb[20].mxu1 %v7485_v38 }
 0x368   :  { %3460 = vmatprep.mubr.bf16.mxu1 %v5971_v4  ;;  %v7487_v4 = vld [vmem:[#allocation68_spill] sm:$0xff] }
 0x369   :  { %v6745_v34 = vpop.f32.mrb[200].mxu0 }
 0x36a   :  { %v6747_v45 = vpop.f32.mrb[201].mxu0 }
 0x36b   :  { %v6749_v56 = vpop.f32.mrb[202].mxu0 }
 0x36c   :  { %v6751_v23 = vpop.f32.mrb[203].mxu0 }
 0x36f   :  { %3461 = vmatmul.mubr.bf16.gmra.mrb[24].mxu1 %v7486_v47 }
 0x370   :  { %3468 = vmatprep.mubr.bf16.mxu1 %v5958_v18  ;;  %v4673_v18 = vadd.f32 %v6767_v54, %v6604_v24  ;;  %v7488_v24 = vld [vmem:[#allocation69_spill] sm:$0xff] }
 0x371   :  { %v6755_v63 = vpop.f32.mrb[204].mxu0 }
 0x372   :  { %v6757_v25 = vpop.f32.mrb[205].mxu0 }
 0x373   :  { %v6759_v16 = vpop.f32.mrb[206].mxu0 }
 0x374   :  { %v6761_v38 = vpop.f32.mrb[207].mxu0 }
 0x377   :  { %3469 = vmatmul.mubr.bf16.gmra.mrb[28].mxu1 %v7487_v4 }
 0x378   :  { %3476 = vmatprep.mubr.bf16.mxu1 %v6016_v2 }
 0x379   :  { %v6772_v47 = vpop.f32.mrb[208].mxu0 }
 0x37a   :  { %v3262_v36 = vpop.f32.mrb[52].mxu1  ;;  %v6774_v28 = vpop.f32.mrb[209].mxu0 }
 0x37b   :  { %v4674_v53 = vadd.f32 %v4673_v18, %v3262_v36  ;;  %v3264_v4 = vpop.f32.mrb[53].mxu1  ;;  %v6778_v17 = vpop.f32.mrb[210].mxu0  ;;  %v4679_v18 = vadd.f32 %v6767_v54, %v6614_v13 }
 0x37c   :  { %v3265_v1 = vpop.f32.mrb[54].mxu1  ;;  %v6780_v48 = vpop.f32.mrb[211].mxu0 }
 0x37d   :  { %v3552_v8 = vadd.f32 %v4674_v53, %v3551_v19  ;;  %v4676_v2 = vadd.f32 %v4675_v60, %v3265_v1  ;;  %v3267_v59 = vpop.f32.mrb[55].mxu1 }
 0x37f   :  { %v3555_v12 = vadd.f32 %v4676_v2, %v3554_v37  ;;  %3477 = vmatmul.mubr.bf16.gmra.mrb[32].mxu1 %v7488_v24  ;;  %v7490_v24 = vld [vmem:[#allocation73_spill] sm:$0xff] }
 0x380   :  { %3484 = vmatprep.mubr.bf16.mxu1 %v6002_v55 }
 0x381   :  { %v6786_v9 = vpop.f32.mrb[212].mxu0 }
 0x382   :  { %v3270_v36 = vpop.f32.mrb[56].mxu1  ;;  %v6788_v7 = vpop.f32.mrb[213].mxu0 }
 0x383   :  { %v4678_v4 = vadd.f32 %v4677_v22, %v3270_v36  ;;  %v3272_v19 = vpop.f32.mrb[57].mxu1  ;;  %v6792_v60 = vpop.f32.mrb[214].mxu0 }
 0x384   :  { %7489 = vst [vmem:[#allocation21_spill] sm:$0xff] %v6792_v60  ;;  %v3273_v37 = vpop.f32.mrb[58].mxu1  ;;  %v6794_v59 = vpop.f32.mrb[215].mxu0 }
 0x385   :  { %v3560_v1 = vadd.f32 %v4678_v4, %v4579_v27  ;;  %v4680_v55 = vadd.f32 %v4679_v18, %v3273_v37  ;;  %v3275_v53 = vpop.f32.mrb[59].mxu1 }
 0x387   :  { %v3806_v2 = vmax.f32 %v3552_v8, %v3560_v1  ;;  %v3563_v30 = vadd.f32 %v4680_v55, %v4580_v29  ;;  %3485 = vmatmul.mubr.bf16.gmra.mrb[36].mxu1 %v7490_v24  ;;  %v4683_v29 = vadd.f32 %v6767_v54, %v6622_v50 }
 0x388   :  { %3492 = vmatprep.mubr.bf16.mxu1 %v6054_v62 }
 0x389   :  { %v3838_v13 = vmax.f32 %v3806_v2, 0.0  ;;  %v3807_v22 = vmax.f32 %v3555_v12, %v3563_v30  ;;  %v6800_v36 = vpop.f32.mrb[216].mxu0 }
 0x38a   :  { %7491 = vst [vmem:[#allocation57_spill] sm:$0xff] %v6800_v36  ;;  %v3278_v19 = vpop.f32.mrb[60].mxu1  ;;  %v6802_v6 = vpop.f32.mrb[217].mxu0 }
 0x38b   :  { %7492 = vst [vmem:[#allocation27_spill] sm:$0xff] %v6802_v6  ;;  %v3903_v60 = vrot.slane %v3838_v13, 7  ;;  %v3839_v27 = vmax.f32 %v3807_v22, 0.0  ;;  %v4682_v18 = vadd.f32 %v4681_v35, %v3278_v19  ;;  %v3280_v4 = vpop.f32.mrb[61].mxu1  ;;  %v6804_v8 = vpop.f32.mrb[218].mxu0  ;;  %v4000_v62 = vrot.slane %v3838_v13, 1 }
 0x38c   :  { %7493 = vst [vmem:[#allocation60_spill] sm:$0xff] %v6804_v8  ;;  %v3281_v37 = vpop.f32.mrb[62].mxu1  ;;  %v6808_v52 = vpop.f32.mrb[219].mxu0  ;;  %v7495_v8 = vld [vmem:[#allocation74_spill] sm:$0xff] }
 0x38d   :  { %7494 = vst [vmem:[#allocation26_spill] sm:$0xff] %v6808_v52  ;;  %v3983_v12 = vsel %vm1015_vm1, 0.0, %v3903_v60  ;;  %v3904_v55 = vrot.slane %v3839_v27, 7  ;;  %v4001_v53 = vrot.slane %v3839_v27, 1  ;;  %v3568_v2 = vadd.f32 %v4682_v18, %v6737_v5  ;;  %v3283_v24 = vpop.f32.mrb[63].mxu1 }
 0x38e   :  { %v4096_v22 = vmax.f32 %v3838_v13, %v3983_v12  ;;  %v4684_v35 = vadd.f32 %v4683_v29, %v3281_v37  ;;  %v4685_v52 = vadd.f32 %v6767_v54, %v6628_v42  ;;  %v7496_v24 = vld [vmem:[#allocation75_spill] sm:$0xff] }
 0x38f   :  { %v3905_v19 = vsel %vm1015_vm1, %v3903_v60, %v3904_v55  ;;  %v4002_v4 = vsel %vm3999_vm7, %v4000_v62, %v4001_v53  ;;  %3493 = vmatmul.mubr.bf16.gmra.mrb[40].mxu1 %v7495_v8  ;;  %v4080_v5 = vsel %vm3999_vm7, %v4001_v53, 0.0 }
 0x390   :  { %v4097_v50 = vmax.f32 %v3839_v27, %v3905_v19  ;;  %v4128_v36 = vmax.f32 %v4096_v22, %v4002_v4  ;;  %v3571_v6 = vadd.f32 %v4684_v35, %v6741_v44  ;;  %3500 = vmatprep.mubr.bf16.mxu1 %v6045_v26  ;;  %v4687_v27 = vadd.f32 %v6767_v54, %v6630_v20 }
 0x391   :  { %v6820_v18 = vpop.f32.mrb[220].mxu0  ;;  %v4689_v20 = vadd.f32 %v6767_v54, %v6636_v51 }
 0x392   :  { %v4129_v13 = vmax.f32 %v4097_v50, %v4080_v5  ;;  %4160 = vst [vmem:[#allocation3] sm:$0xff] %v4128_v36  ;;  %v3286_v60 = vpop.f32.mrb[64].mxu1  ;;  %v6822_v29 = vpop.f32.mrb[221].mxu0 }
 0x393   :  { %v4686_v8 = vadd.f32 %v4685_v52, %v3286_v60  ;;  %v3288_v62 = vpop.f32.mrb[65].mxu1  ;;  %v6826_v44 = vpop.f32.mrb[222].mxu0 }
 0x394   :  { %4161 = vst [vmem:[#allocation3 + $0x8] sm:$0xff] %v4129_v13  ;;  %v3289_v26 = vpop.f32.mrb[66].mxu1  ;;  %v6828_v37 = vpop.f32.mrb[223].mxu0 }
 0x395   :  { %v3576_v42 = vadd.f32 %v4686_v8, %v6735_v3  ;;  %v4688_v12 = vadd.f32 %v4687_v27, %v3289_v26  ;;  %v3291_v55 = vpop.f32.mrb[67].mxu1 }
 0x397   :  { %v3808_v53 = vmax.f32 %v3568_v2, %v3576_v42  ;;  %v3579_v36 = vadd.f32 %v4688_v12, %v6739_v11  ;;  %3501 = vmatmul.mubr.bf16.gmra.mrb[44].mxu1 %v7496_v24 }
 0x398   :  { %3508 = vmatprep.mubr.bf16.mxu1 %v7454_v46  ;;  %v4691_v46 = vadd.f32 %v6767_v54, %v6638_v57 }
 0x399   :  { %v3840_v52 = vmax.f32 %v3808_v53, %v3560_v1  ;;  %v3809_v22 = vmax.f32 %v3571_v6, %v3579_v36  ;;  %v6836_v35 = vpop.f32.mrb[224].mxu0 }
 0x39a   :  { %v3294_v19 = vpop.f32.mrb[68].mxu1  ;;  %v6838_v4 = vpop.f32.mrb[225].mxu0 }
 0x39b   :  { %v4192_v3 = vld [vmem:[#allocation3] ss:$2 sm:$0xff]  ;;  %v3906_v50 = vrot.slane %v3840_v52, 7  ;;  %v3841_v5 = vmax.f32 %v3809_v22, %v3563_v30  ;;  %v4690_v2 = vadd.f32 %v4689_v20, %v3294_v19  ;;  %v3296_v13 = vpop.f32.mrb[69].mxu1  ;;  %v6840_v11 = vpop.f32.mrb[226].mxu0  ;;  %v4003_v27 = vrot.slane %v3840_v52, 1 }
 0x39c   :  { %v4223_v60 = vmax.f32 %v4192_v3, 0.0  ;;  %v3297_v51 = vpop.f32.mrb[70].mxu1  ;;  %v6844_v1 = vpop.f32.mrb[227].mxu0  ;;  %v4693_v19 = vadd.f32 %v6767_v54, %v6644_v21 }
 0x39d   :  { %v3984_v6 = vsel %vm1015_vm1, 0.0, %v3906_v50  ;;  %v3907_v8 = vrot.slane %v3841_v5, 7  ;;  %v4004_v62 = vrot.slane %v3841_v5, 1  ;;  %v3584_v26 = vadd.f32 %v4690_v2, %v6747_v45  ;;  %v3299_v12 = vpop.f32.mrb[71].mxu1 }
 0x39e   :  { %4239 = vst [vmem:[#allocation4] sm:$0xff] %v4223_v60  ;;  %v4098_v30 = vmax.f32 %v3840_v52, %v3984_v6  ;;  %v4692_v55 = vadd.f32 %v4691_v46, %v3297_v51 }
 0x39f   :  { %v3908_v53 = vsel %vm1015_vm1, %v3906_v50, %v3907_v8  ;;  %v4005_v24 = vsel %vm3999_vm7, %v4003_v27, %v4004_v62  ;;  %3509 = vmatmul.mubr.bf16.gmra.mrb[48].mxu1 %v7455_v32  ;;  %v4081_v3 = vsel %vm3999_vm7, %v4004_v62, 0.0  ;;  %v4695_v50 = vadd.f32 %v6767_v54, %v6646_v58 }
 0x3a0   :  { %v4099_v57 = vmax.f32 %v3841_v5, %v3908_v53  ;;  %v4130_v20 = vmax.f32 %v4098_v30, %v4005_v24  ;;  %v3587_v22 = vadd.f32 %v4692_v55, %v6751_v23  ;;  %v4697_v62 = vadd.f32 %v6767_v54, %v6652_v43 }
 0x3a1   :  { %v6855_v45 = vpop.f32.mrb[228].mxu0 }
 0x3a2   :  { %v4131_v2 = vmax.f32 %v4099_v57, %v4081_v3  ;;  %4162 = vst [vmem:[#allocation3 + $0x10] sm:$0xff] %v4130_v20  ;;  %v3302_v52 = vpop.f32.mrb[72].mxu1  ;;  %v6857_v13 = vpop.f32.mrb[229].mxu0 }
 0x3a3   :  { %v4694_v32 = vadd.f32 %v4693_v19, %v3302_v52  ;;  %v3304_v5 = vpop.f32.mrb[73].mxu1  ;;  %v6861_v46 = vpop.f32.mrb[230].mxu0 }
 0x3a4   :  { %4163 = vst [vmem:[#allocation3 + $0x18] sm:$0xff] %v4131_v2  ;;  %v3305_v23 = vpop.f32.mrb[74].mxu1  ;;  %v6863_v60 = vpop.f32.mrb[231].mxu0 }
 0x3a5   :  { %v3592_v21 = vadd.f32 %v4694_v32, %v6745_v34  ;;  %v4696_v27 = vadd.f32 %v4695_v50, %v3305_v23  ;;  %v3307_v51 = vpop.f32.mrb[75].mxu1 }
 0x3a7   :  { %v3810_v6 = vmax.f32 %v3584_v26, %v3592_v21  ;;  %v3595_v8 = vadd.f32 %v4696_v27, %v6749_v56  ;;  %v4699_v56 = vadd.f32 %v6767_v54, %v6654_v0 }
 0x3a9   :  { %v3842_v12 = vmax.f32 %v3810_v6, %v3576_v42  ;;  %v3811_v58 = vmax.f32 %v3587_v22, %v3595_v8  ;;  %v6869_v30 = vpop.f32.mrb[232].mxu0 }
 0x3aa   :  { %v3310_v55 = vpop.f32.mrb[76].mxu1  ;;  %v6871_v53 = vpop.f32.mrb[233].mxu0 }
 0x3ab   :  { %v4194_v24 = vld [vmem:[#allocation3 + $0x10] ss:$2 sm:$0xff]  ;;  %v3909_v57 = vrot.slane %v3842_v12, 7  ;;  %v3843_v20 = vmax.f32 %v3811_v58, %v3579_v36  ;;  %v4698_v19 = vadd.f32 %v4697_v62, %v3310_v55  ;;  %v3312_v34 = vpop.f32.mrb[77].mxu1  ;;  %v6873_v3 = vpop.f32.mrb[234].mxu0  ;;  %v4006_v2 = vrot.slane %v3842_v12, 1 }
 0x3ac   :  { %v4224_v26 = vmax.f32 %v4194_v24, 0.0  ;;  %v3313_v43 = vpop.f32.mrb[78].mxu1  ;;  %v6877_v42 = vpop.f32.mrb[235].mxu0  ;;  %v4701_v58 = vadd.f32 %v6767_v54, %v6660_v49 }
 0x3ad   :  { %v3985_v22 = vsel %vm1015_vm1, 0.0, %v3909_v57  ;;  %v3910_v52 = vrot.slane %v3843_v20, 7  ;;  %v4007_v50 = vrot.slane %v3843_v20, 1  ;;  %v3600_v32 = vadd.f32 %v4698_v19, %v6757_v25  ;;  %v3315_v5 = vpop.f32.mrb[79].mxu1 }
 0x3ae   :  { %4240 = vst [vmem:[#allocation4 + $0x8] sm:$0xff] %v4224_v26  ;;  %v4100_v36 = vmax.f32 %v3842_v12, %v3985_v22  ;;  %v4700_v23 = vadd.f32 %v4699_v56, %v3313_v43 }
 0x3af   :  { %v3911_v27 = vsel %vm1015_vm1, %v3909_v57, %v3910_v52  ;;  %v4008_v51 = vsel %vm3999_vm7, %v4006_v2, %v4007_v50  ;;  %v4082_v55 = vsel %vm3999_vm7, %v4007_v50, 0.0  ;;  %v4703_v57 = vadd.f32 %v6767_v54, %v6662_v61 }
 0x3b0   :  { %v4101_v0 = vmax.f32 %v3843_v20, %v3911_v27  ;;  %v4132_v6 = vmax.f32 %v4100_v36, %v4008_v51  ;;  %v3603_v62 = vadd.f32 %v4700_v23, %v6761_v38  ;;  %v4705_v50 = vadd.f32 %v6767_v54, %v6667_v39 }
 0x3b1   :  { %v6887_v24 = vpop.f32.mrb[236].mxu0 }
 0x3b2   :  { %v4133_v25 = vmax.f32 %v4101_v0, %v4082_v55  ;;  %4164 = vst [vmem:[#allocation3 + $0x20] sm:$0xff] %v4132_v6  ;;  %v3318_v19 = vpop.f32.mrb[80].mxu1  ;;  %v6889_v12 = vpop.f32.mrb[237].mxu0 }
 0x3b3   :  { %v4702_v34 = vadd.f32 %v4701_v58, %v3318_v19  ;;  %v3320_v20 = vpop.f32.mrb[81].mxu1  ;;  %v6893_v56 = vpop.f32.mrb[238].mxu0 }
 0x3b4   :  { %4165 = vst [vmem:[#allocation3 + $0x28] sm:$0xff] %v4133_v25  ;;  %v3321_v38 = vpop.f32.mrb[82].mxu1  ;;  %v6895_v26 = vpop.f32.mrb[239].mxu0 }
 0x3b5   :  { %v3608_v49 = vadd.f32 %v4702_v34, %v6755_v63  ;;  %v4704_v2 = vadd.f32 %v4703_v57, %v3321_v38  ;;  %v3323_v43 = vpop.f32.mrb[83].mxu1 }
 0x3b7   :  { %v3812_v22 = vmax.f32 %v3600_v32, %v3608_v49  ;;  %v3611_v52 = vadd.f32 %v4704_v2, %v6759_v16  ;;  %v4707_v16 = vadd.f32 %v6767_v54, %v6669_v41 }
 0x3b9   :  { %v3844_v5 = vmax.f32 %v3812_v22, %v3592_v21  ;;  %v3813_v61 = vmax.f32 %v3603_v62, %v3611_v52  ;;  %v6901_v36 = vpop.f32.mrb[240].mxu0 }
 0x3ba   :  { %v3326_v23 = vpop.f32.mrb[84].mxu1  ;;  %v6903_v27 = vpop.f32.mrb[241].mxu0 }
 0x3bb   :  { %v4196_v51 = vld [vmem:[#allocation3 + $0x20] ss:$2 sm:$0xff]  ;;  %v3912_v0 = vrot.slane %v3844_v5, 7  ;;  %v3845_v6 = vmax.f32 %v3813_v61, %v3595_v8  ;;  %v4706_v58 = vadd.f32 %v4705_v50, %v3326_v23  ;;  %v3328_v63 = vpop.f32.mrb[85].mxu1  ;;  %v6905_v55 = vpop.f32.mrb[242].mxu0  ;;  %v4009_v25 = vrot.slane %v3844_v5, 1 }
 0x3bc   :  { %v4225_v32 = vmax.f32 %v4196_v51, 0.0  ;;  %v3329_v39 = vpop.f32.mrb[86].mxu1  ;;  %v6909_v21 = vpop.f32.mrb[243].mxu0  ;;  %v4709_v61 = vadd.f32 %v6767_v54, %v6673_v31 }
 0x3bd   :  { %v3986_v62 = vsel %vm1015_vm1, 0.0, %v3912_v0  ;;  %v3913_v19 = vrot.slane %v3845_v6, 7  ;;  %v4010_v57 = vrot.slane %v3845_v6, 1  ;;  %v3616_v34 = vadd.f32 %v4706_v58, %v6774_v28  ;;  %v3331_v20 = vpop.f32.mrb[87].mxu1 }
 0x3be   :  { %4241 = vst [vmem:[#allocation4 + $0x10] sm:$0xff] %v4225_v32  ;;  %v4102_v8 = vmax.f32 %v3844_v5, %v3986_v62  ;;  %v4708_v38 = vadd.f32 %v4707_v16, %v3329_v39 }
 0x3bf   :  { %v3914_v2 = vsel %vm1015_vm1, %v3912_v0, %v3913_v19  ;;  %v4011_v43 = vsel %vm3999_vm7, %v4009_v25, %v4010_v57  ;;  %v4083_v23 = vsel %vm3999_vm7, %v4010_v57, 0.0  ;;  %v4711_v0 = vadd.f32 %v6767_v54, %v6675_v15 }
 0x3c0   :  { %v4103_v41 = vmax.f32 %v3845_v6, %v3914_v2  ;;  %v4134_v22 = vmax.f32 %v4102_v8, %v4011_v43  ;;  %v3619_v50 = vadd.f32 %v4708_v38, %v6780_v48  ;;  %v4713_v57 = vadd.f32 %v6767_v54, %v6679_v10 }
 0x3c1   :  { %v6919_v51 = vpop.f32.mrb[244].mxu0 }
 0x3c2   :  { %v4135_v28 = vmax.f32 %v4103_v41, %v4083_v23  ;;  %4166 = vst [vmem:[#allocation3 + $0x30] sm:$0xff] %v4134_v22  ;;  %v3334_v58 = vpop.f32.mrb[88].mxu1  ;;  %v6921_v5 = vpop.f32.mrb[245].mxu0 }
 0x3c3   :  { %v4710_v63 = vadd.f32 %v4709_v61, %v3334_v58  ;;  %v3336_v6 = vpop.f32.mrb[89].mxu1  ;;  %v6925_v16 = vpop.f32.mrb[246].mxu0 }
 0x3c4   :  { %4167 = vst [vmem:[#allocation3 + $0x38] sm:$0xff] %v4135_v28  ;;  %v3337_v48 = vpop.f32.mrb[90].mxu1  ;;  %v6927_v32 = vpop.f32.mrb[247].mxu0 }
 0x3c5   :  { %v3624_v31 = vadd.f32 %v4710_v63, %v6772_v47  ;;  %v4712_v25 = vadd.f32 %v4711_v0, %v3337_v48  ;;  %v3339_v39 = vpop.f32.mrb[91].mxu1 }
 0x3c7   :  { %v3814_v62 = vmax.f32 %v3616_v34, %v3624_v31  ;;  %v3627_v19 = vadd.f32 %v4712_v25, %v6778_v17  ;;  %v4715_v17 = vadd.f32 %v6767_v54, %v6681_v40 }
 0x3c9   :  { %v3846_v20 = vmax.f32 %v3814_v62, %v3608_v49  ;;  %v3815_v15 = vmax.f32 %v3619_v50, %v3627_v19  ;;  %v6933_v8 = vpop.f32.mrb[248].mxu0 }
 0x3ca   :  { %v3342_v38 = vpop.f32.mrb[92].mxu1  ;;  %v6935_v2 = vpop.f32.mrb[249].mxu0 }
 0x3cb   :  { %v4198_v43 = vld [vmem:[#allocation3 + $0x30] ss:$2 sm:$0xff]  ;;  %v3915_v41 = vrot.slane %v3846_v20, 7  ;;  %v3847_v22 = vmax.f32 %v3815_v15, %v3611_v52  ;;  %v4714_v61 = vadd.f32 %v4713_v57, %v3342_v38  ;;  %v3344_v47 = vpop.f32.mrb[93].mxu1  ;;  %v6937_v23 = vpop.f32.mrb[250].mxu0  ;;  %v4012_v28 = vrot.slane %v3846_v20, 1 }
 0x3cc   :  { %v4226_v34 = vmax.f32 %v4198_v43, 0.0  ;;  %v3345_v10 = vpop.f32.mrb[94].mxu1  ;;  %v6941_v49 = vpop.f32.mrb[251].mxu0  ;;  %v4717_v15 = vadd.f32 %v6767_v54, %v6685_v33  ;;  %v7498_v33 = vld [vmem:[#allocation66_spill] sm:$0xff] }
 0x3cd   :  { %v3987_v50 = vsel %vm1015_vm1, 0.0, %v3915_v41  ;;  %v3916_v58 = vrot.slane %v3847_v22, 7  ;;  %v4013_v0 = vrot.slane %v3847_v22, 1  ;;  %v3632_v63 = vadd.f32 %v4714_v61, %v6788_v7  ;;  %v3347_v6 = vpop.f32.mrb[95].mxu1 }
 0x3ce   :  { %4242 = vst [vmem:[#allocation4 + $0x18] sm:$0xff] %v4226_v34  ;;  %v4104_v52 = vmax.f32 %v3846_v20, %v3987_v50  ;;  %v4716_v48 = vadd.f32 %v4715_v17, %v3345_v10  ;;  %v4719_v20 = vadd.f32 %v6767_v54, %v6687_v14  ;;  %v4721_v50 = vadd.f32 %v6767_v54, %v7498_v33  ;;  %v7502_v33 = vld [vmem:[#allocation70_spill] sm:$0xff] }
 0x3cf   :  { %v3917_v25 = vsel %vm1015_vm1, %v3915_v41, %v3916_v58  ;;  %v4014_v39 = vsel %vm3999_vm7, %v4012_v28, %v4013_v0  ;;  %v4084_v38 = vsel %vm3999_vm7, %v4013_v0, 0.0  ;;  %v7497_v28 = vld [vmem:[#allocation21_spill] sm:$0xff] }
 0x3d0   :  { %v4105_v40 = vmax.f32 %v3847_v22, %v3917_v25  ;;  %v4136_v62 = vmax.f32 %v4104_v52, %v4014_v39  ;;  %v3635_v57 = vadd.f32 %v4716_v48, %v6794_v59 }
 0x3d2   :  { %v4137_v43 = vmax.f32 %v4105_v40, %v4084_v38  ;;  %4168 = vst [vmem:[#allocation3 + $0x40] sm:$0xff] %v4136_v62  ;;  %v3350_v7 = vpop.f32.mrb[96].mxu1  ;;  %v7499_v40 = vld [vmem:[#allocation67_spill] sm:$0xff] }
 0x3d3   :  { %v4718_v61 = vadd.f32 %v4717_v15, %v3350_v7  ;;  %v3352_v47 = vpop.f32.mrb[97].mxu1  ;;  %v4723_v62 = vadd.f32 %v6767_v54, %v7499_v40 }
 0x3d4   :  { %4169 = vst [vmem:[#allocation3 + $0x48] sm:$0xff] %v4137_v43  ;;  %v3353_v41 = vpop.f32.mrb[98].mxu1 }
 0x3d5   :  { %v3640_v22 = vadd.f32 %v4718_v61, %v6786_v9  ;;  %v4720_v17 = vadd.f32 %v4719_v20, %v3353_v41  ;;  %v3355_v34 = vpop.f32.mrb[99].mxu1  ;;  %v7500_v20 = vld [vmem:[#allocation27_spill] sm:$0xff] }
 0x3d7   :  { %v3816_v59 = vmax.f32 %v3632_v63, %v3640_v22  ;;  %v3643_v10 = vadd.f32 %v4720_v17, %v7497_v28 }
 0x3d9   :  { %v3848_v58 = vmax.f32 %v3816_v59, %v3624_v31  ;;  %v3817_v0 = vmax.f32 %v3635_v57, %v3643_v10  ;;  %v7501_v59 = vld [vmem:[#allocation26_spill] sm:$0xff] }
 0x3da   :  { %v3358_v6 = vpop.f32.mrb[100].mxu1 }
 0x3db   :  { %v4200_v52 = vld [vmem:[#allocation3 + $0x40] ss:$2 sm:$0xff]  ;;  %v3918_v48 = vrot.slane %v3848_v58, 7  ;;  %v3849_v14 = vmax.f32 %v3817_v0, %v3627_v19  ;;  %v4722_v25 = vadd.f32 %v4721_v50, %v3358_v6  ;;  %v3360_v39 = vpop.f32.mrb[101].mxu1  ;;  %v4015_v15 = vrot.slane %v3848_v58, 1 }
 0x3dc   :  { %v4227_v9 = vmax.f32 %v4200_v52, 0.0  ;;  %v3361_v38 = vpop.f32.mrb[102].mxu1  ;;  %v4725_v50 = vadd.f32 %v6767_v54, %v7502_v33  ;;  %v7507_v33 = vld [vmem:[#allocation63_spill] sm:$0xff] }
 0x3dd   :  { %v3988_v63 = vsel %vm1015_vm1, 0.0, %v3918_v48  ;;  %v3919_v43 = vrot.slane %v3849_v14, 7  ;;  %v4016_v7 = vrot.slane %v3849_v14, 1  ;;  %v3648_v61 = vadd.f32 %v4722_v25, %v7500_v20  ;;  %v3363_v31 = vpop.f32.mrb[103].mxu1  ;;  %v7503_v25 = vld [vmem:[#allocation71_spill] sm:$0xff]  ;;  %v7506_v20 = vld [vmem:[#allocation72_spill] sm:$0xff] }
 0x3de   :  { %4243 = vst [vmem:[#allocation4 + $0x20] sm:$0xff] %v4227_v9  ;;  %v4106_v57 = vmax.f32 %v3848_v58, %v3988_v63  ;;  %v4724_v47 = vadd.f32 %v4723_v62, %v3361_v38  ;;  %v4727_v58 = vadd.f32 %v6767_v54, %v7503_v25  ;;  %v7504_v62 = vld [vmem:[#allocation57_spill] sm:$0xff]  ;;  %v7505_v63 = vld [vmem:[#allocation60_spill] sm:$0xff] }
 0x3df   :  { %v3920_v19 = vsel %vm1015_vm1, %v3918_v48, %v3919_v43  ;;  %v4017_v41 = vsel %vm3999_vm7, %v4015_v15, %v4016_v7  ;;  %v4085_v0 = vsel %vm3999_vm7, %v4016_v7, 0.0  ;;  %v4729_v7 = vadd.f32 %v6767_v54, %v7506_v20 }
 0x3e0   :  { %v4107_v17 = vmax.f32 %v3849_v14, %v3920_v19  ;;  %v4138_v34 = vmax.f32 %v4106_v57, %v4017_v41  ;;  %v3651_v28 = vadd.f32 %v4724_v47, %v7501_v59 }
 0x3e2   :  { %v4139_v6 = vmax.f32 %v4107_v17, %v4085_v0  ;;  %4170 = vst [vmem:[#allocation3 + $0x50] sm:$0xff] %v4138_v34  ;;  %v3366_v52 = vpop.f32.mrb[104].mxu1 }
 0x3e3   :  { %v4726_v39 = vadd.f32 %v4725_v50, %v3366_v52  ;;  %v3368_v40 = vpop.f32.mrb[105].mxu1  ;;  %v4731_v50 = vadd.f32 %v6767_v54, %v7507_v33 }
 0x3e4   :  { %4171 = vst [vmem:[#allocation3 + $0x58] sm:$0xff] %v4139_v6  ;;  %v3369_v48 = vpop.f32.mrb[106].mxu1 }
 0x3e5   :  { %v3656_v14 = vadd.f32 %v4726_v39, %v7504_v62  ;;  %v4728_v9 = vadd.f32 %v4727_v58, %v3369_v48  ;;  %v3371_v15 = vpop.f32.mrb[107].mxu1 }
 0x3e7   :  { %v3818_v38 = vmax.f32 %v3648_v61, %v3656_v14  ;;  %v3659_v43 = vadd.f32 %v4728_v9, %v7505_v63  ;;  %v6975_v61 = vpop.f32.mrb[252].mxu0 }
 0x3e8   :  { %v6979_v40 = vpop.f32.mrb[253].mxu0 }
 0x3e9   :  { %v3850_v31 = vmax.f32 %v3818_v38, %v3640_v22  ;;  %v3819_v57 = vmax.f32 %v3651_v28, %v3659_v43  ;;  %v6981_v62 = vpop.f32.mrb[254].mxu0 }
 0x3ea   :  { %v3374_v47 = vpop.f32.mrb[108].mxu1  ;;  %v6985_v38 = vpop.f32.mrb[255].mxu0 }
 0x3eb   :  { %v4202_v19 = vld [vmem:[#allocation3 + $0x50] ss:$2 sm:$0xff]  ;;  %v3921_v41 = vrot.slane %v3850_v31, 7  ;;  %v3851_v17 = vmax.f32 %v3819_v57, %v3643_v10  ;;  %v4730_v34 = vadd.f32 %v4729_v7, %v3374_v47  ;;  %v3376_v59 = vpop.f32.mrb[109].mxu1  ;;  %v4018_v6 = vrot.slane %v3850_v31, 1  ;;  %v7508_v57 = vld [vmem:[#allocation11_spill] sm:$0xff] }
 0x3ec   :  { %v4228_v0 = vmax.f32 %v4202_v19, 0.0  ;;  %v3377_v52 = vpop.f32.mrb[110].mxu1 }
 0x3ed   :  { %v3989_v25 = vsel %vm1015_vm1, 0.0, %v3921_v41  ;;  %v3922_v58 = vrot.slane %v3851_v17, 7  ;;  %v4019_v39 = vrot.slane %v3851_v17, 1  ;;  %v3664_v22 = vadd.f32 %v4730_v34, %v6822_v29  ;;  %v3379_v28 = vpop.f32.mrb[111].mxu1  ;;  %v7509_v34 = vld [vmem:[#allocation41_spill] sm:$0xff] }
 0x3ee   :  { %4244 = vst [vmem:[#allocation4 + $0x28] sm:$0xff] %v4228_v0  ;;  %v4108_v10 = vmax.f32 %v3850_v31, %v3989_v25  ;;  %v4732_v48 = vadd.f32 %v4731_v50, %v3377_v52  ;;  %v4733_v29 = vadd.f32 %v6767_v54, %v7508_v57  ;;  %v4735_v59 = vadd.f32 %v6767_v54, %v7509_v34  ;;  %v7510_v25 = vld [vmem:[#allocation17_spill] sm:$0xff] }
 0x3ef   :  { %v3923_v9 = vsel %vm1015_vm1, %v3921_v41, %v3922_v58  ;;  %v4020_v15 = vsel %vm3999_vm7, %v4018_v6, %v4019_v39  ;;  %v4086_v47 = vsel %vm3999_vm7, %v4019_v39, 0.0  ;;  %v4737_v58 = vadd.f32 %v6767_v54, %v7510_v25  ;;  %v7511_v57 = vld [vmem:[#allocation45_spill] sm:$0xff]  ;;  %v7513_v25 = vld [vmem:[#allocation50_spill] sm:$0xff] }
 0x3f0   :  { %v4109_v63 = vmax.f32 %v3851_v17, %v3923_v9  ;;  %v4140_v20 = vmax.f32 %v4108_v10, %v4020_v15  ;;  %v3667_v7 = vadd.f32 %v4732_v48, %v6828_v37 }
 0x3f2   :  { %v4141_v19 = vmax.f32 %v4109_v63, %v4086_v47  ;;  %4172 = vst [vmem:[#allocation3 + $0x60] sm:$0xff] %v4140_v20  ;;  %v3382_v31 = vpop.f32.mrb[112].mxu1 }
 0x3f3   :  { %v4734_v41 = vadd.f32 %v4733_v29, %v3382_v31  ;;  %v3384_v33 = vpop.f32.mrb[113].mxu1  ;;  %v4739_v29 = vadd.f32 %v6767_v54, %v7511_v57 }
 0x3f4   :  { %4173 = vst [vmem:[#allocation3 + $0x68] sm:$0xff] %v4141_v19  ;;  %v3385_v50 = vpop.f32.mrb[114].mxu1 }
 0x3f5   :  { %v3672_v17 = vadd.f32 %v4734_v41, %v6820_v18  ;;  %v4736_v0 = vadd.f32 %v4735_v59, %v3385_v50  ;;  %v3387_v6 = vpop.f32.mrb[115].mxu1 }
 0x3f7   :  { %v3820_v37 = vmax.f32 %v3664_v22, %v3672_v17  ;;  %v3675_v52 = vadd.f32 %v4736_v0, %v6826_v44  ;;  %v7512_v0 = vld [vmem:[#allocation16_spill] sm:$0xff] }
 0x3f8   :  { %v4741_v6 = vadd.f32 %v6767_v54, %v7512_v0 }
 0x3f9   :  { %v3852_v39 = vmax.f32 %v3820_v37, %v3656_v14  ;;  %v3821_v28 = vmax.f32 %v3667_v7, %v3675_v52 }
 0x3fa   :  { %v3390_v10 = vpop.f32.mrb[116].mxu1 }
 0x3fb   :  { %v4204_v48 = vld [vmem:[#allocation3 + $0x60] ss:$2 sm:$0xff]  ;;  %v3924_v9 = vrot.slane %v3852_v39, 7  ;;  %v3853_v15 = vmax.f32 %v3821_v28, %v3659_v43  ;;  %v4738_v63 = vadd.f32 %v4737_v58, %v3390_v10  ;;  %v3392_v20 = vpop.f32.mrb[117].mxu1  ;;  %v4021_v47 = vrot.slane %v3852_v39, 1 }
 0x3fc   :  { %v4229_v18 = vmax.f32 %v4204_v48, 0.0  ;;  %v3393_v19 = vpop.f32.mrb[118].mxu1  ;;  %v4743_v58 = vadd.f32 %v6767_v54, %v7513_v25  ;;  %v7514_v20 = vld [vmem:[#allocation22_spill] sm:$0xff] }
 0x3fd   :  { %v3990_v22 = vsel %vm1015_vm1, 0.0, %v3924_v9  ;;  %v3925_v44 = vrot.slane %v3853_v15, 7  ;;  %v4022_v31 = vrot.slane %v3853_v15, 1  ;;  %v3680_v34 = vadd.f32 %v4738_v63, %v6838_v4  ;;  %v3395_v14 = vpop.f32.mrb[119].mxu1 }
 0x3fe   :  { %4245 = vst [vmem:[#allocation4 + $0x30] sm:$0xff] %v4229_v18  ;;  %v4110_v7 = vmax.f32 %v3852_v39, %v3990_v22  ;;  %v4740_v59 = vadd.f32 %v4739_v29, %v3393_v19  ;;  %v4745_v57 = vadd.f32 %v6767_v54, %v7514_v20 }
 0x3ff   :  { %v3926_v43 = vsel %vm1015_vm1, %v3924_v9, %v3925_v44  ;;  %v4023_v41 = vsel %vm3999_vm7, %v4021_v47, %v4022_v31  ;;  %v4087_v37 = vsel %vm3999_vm7, %v4022_v31, 0.0 }
 0x400   :  { %v4111_v33 = vmax.f32 %v3853_v15, %v3926_v43  ;;  %v4142_v50 = vmax.f32 %v4110_v7, %v4023_v41  ;;  %v3683_v17 = vadd.f32 %v4740_v59, %v6844_v1  ;;  %v7515_v7 = vld [vmem:[#allocation54_spill] sm:$0xff] }
 0x401   :  { %v4747_v59 = vadd.f32 %v6767_v54, %v7515_v7 }
 0x402   :  { %v4143_v52 = vmax.f32 %v4111_v33, %v4087_v37  ;;  %4174 = vst [vmem:[#allocation3 + $0x70] sm:$0xff] %v4142_v50  ;;  %v3398_v4 = vpop.f32.mrb[120].mxu1 }
 0x403   :  { %v4742_v39 = vadd.f32 %v4741_v6, %v3398_v4  ;;  %v3400_v28 = vpop.f32.mrb[121].mxu1 }
 0x404   :  { %4175 = vst [vmem:[#allocation3 + $0x78] sm:$0xff] %v4143_v52  ;;  %v3401_v10 = vpop.f32.mrb[122].mxu1 }
 0x405   :  { %v3688_v48 = vadd.f32 %v4742_v39, %v6836_v35  ;;  %v4744_v9 = vadd.f32 %v4743_v58, %v3401_v10  ;;  %v3403_v15 = vpop.f32.mrb[123].mxu1  ;;  %v7516_v39 = vld [vmem:[#allocation15_spill] sm:$0xff] }
 0x406   :  { %v2548_v28 = vadd.f32 %v6767_v54, %v7516_v39  ;;  %v7517_v15 = vld [vmem:[#allocation8_spill] sm:$0xff] }
 0x407   :  { %v3822_v1 = vmax.f32 %v3680_v34, %v3688_v48  ;;  %v3691_v63 = vadd.f32 %v4744_v9, %v6840_v11 }
 0x409   :  { %v3854_v29 = vmax.f32 %v3822_v1, 0.0  ;;  %v3823_v18 = vmax.f32 %v3683_v17, %v3691_v63  ;;  %v2551_v1 = vadd.f32 %v6767_v54, %v7517_v15 }
 0x40a   :  { %v3406_v47 = vpop.f32.mrb[124].mxu1 }
 0x40b   :  { %v4206_v19 = vld [vmem:[#allocation3 + $0x70] ss:$2 sm:$0xff]  ;;  %v3927_v22 = vrot.slane %v3854_v29, 7  ;;  %v3855_v44 = vmax.f32 %v3823_v18, 0.0  ;;  %v4746_v31 = vadd.f32 %v4745_v57, %v3406_v47  ;;  %v3408_v14 = vpop.f32.mrb[125].mxu1  ;;  %v4024_v43 = vrot.slane %v3854_v29, 1 }
 0x40c   :  { %v4230_v35 = vmax.f32 %v4206_v19, 0.0  ;;  %v3409_v41 = vpop.f32.mrb[126].mxu1 }
 0x40d   :  { %v3991_v34 = vsel %vm1015_vm1, 0.0, %v3927_v22  ;;  %v3928_v11 = vrot.slane %v3855_v44, 7  ;;  %v4025_v33 = vrot.slane %v3855_v44, 1  ;;  %v3696_v50 = vadd.f32 %v4746_v31, %v6857_v13  ;;  %v3411_v0 = vpop.f32.mrb[127].mxu1 }
 0x40e   :  { %4246 = vst [vmem:[#allocation4 + $0x38] sm:$0xff] %v4230_v35  ;;  %v4112_v17 = vmax.f32 %v3854_v29, %v3991_v34  ;;  %v4748_v6 = vadd.f32 %v4747_v59, %v3409_v41 }
 0x40f   :  { %v3929_v37 = vsel %vm1015_vm1, %v3927_v22, %v3928_v11  ;;  %v4026_v52 = vsel %vm3999_vm7, %v4024_v43, %v4025_v33  ;;  %v4088_v10 = vsel %vm3999_vm7, %v4025_v33, 0.0  ;;  %v7519_v33 = vld [vmem:[#allocation9_spill] sm:$0xff] }
 0x410   :  { %v4113_v4 = vmax.f32 %v3855_v44, %v3929_v37  ;;  %v4144_v25 = vmax.f32 %v4112_v17, %v4026_v52  ;;  %v3699_v58 = vadd.f32 %v4748_v6, %v6863_v60  ;;  %v7518_v44 = vld [vmem:[#allocation14_spill] sm:$0xff]  ;;  %v2559_v0 = vadd.f32 %v6767_v54, %v7519_v33 }
 0x411   :  { %v2556_v31 = vadd.f32 %v6767_v54, %v7518_v44 }
 0x412   :  { %v4145_v9 = vmax.f32 %v4113_v4, %v4088_v10  ;;  %4176 = vst [vmem:[#allocation3 + $0x80] sm:$0xff] %v4144_v25  ;;  %v3414_v13 = vpop.f32.mrb[0].mxu1 }
 0x413   :  { %v4750_v20 = vadd.f32 %v3414_v13, %v2548_v28  ;;  %v3416_v57 = vpop.f32.mrb[1].mxu1 }
 0x414   :  { %4177 = vst [vmem:[#allocation3 + $0x88] sm:$0xff] %v4145_v9  ;;  %v3417_v29 = vpop.f32.mrb[2].mxu1  ;;  %v7520_v9 = vld [vmem:[#allocation20_spill] sm:$0xff] }
 0x415   :  { %v3704_v18 = vadd.f32 %v4750_v20, %v6855_v45  ;;  %v4752_v47 = vadd.f32 %v3417_v29, %v2551_v1  ;;  %v3419_v19 = vpop.f32.mrb[3].mxu1  ;;  %v2564_v13 = vadd.f32 %v6767_v54, %v7520_v9  ;;  %v7521_v20 = vld [vmem:[#allocation10_spill] sm:$0xff] }
 0x416   :  { %v2567_v57 = vadd.f32 %v6767_v54, %v7521_v20 }
 0x417   :  { %v3824_v60 = vmax.f32 %v3696_v50, %v3704_v18  ;;  %v3707_v22 = vadd.f32 %v4752_v47, %v6861_v46 }
 0x419   :  { %v3856_v14 = vmax.f32 %v3824_v60, %v3688_v48  ;;  %v3825_v7 = vmax.f32 %v3699_v58, %v3707_v22 }
 0x41a   :  { %v3422_v59 = vpop.f32.mrb[4].mxu1 }
 0x41b   :  { %v4208_v35 = vld [vmem:[#allocation3 + $0x80] ss:$2 sm:$0xff]  ;;  %v3930_v43 = vrot.slane %v3856_v14, 7  ;;  %v3857_v41 = vmax.f32 %v3825_v7, %v3691_v63  ;;  %v4754_v34 = vadd.f32 %v3422_v59, %v2556_v31  ;;  %v3424_v11 = vpop.f32.mrb[5].mxu1  ;;  %v4027_v17 = vrot.slane %v3856_v14, 1 }
 0x41c   :  { %v4231_v45 = vmax.f32 %v4208_v35, 0.0  ;;  %v3425_v6 = vpop.f32.mrb[6].mxu1  ;;  %v7522_v7 = vld [vmem:[#allocation19_spill] sm:$0xff] }
 0x41d   :  { %v3992_v50 = vsel %vm1015_vm1, 0.0, %v3930_v43  ;;  %v3931_v46 = vrot.slane %v3857_v41, 7  ;;  %v4028_v37 = vrot.slane %v3857_v41, 1  ;;  %v3712_v52 = vadd.f32 %v4754_v34, %v6871_v53  ;;  %v3427_v48 = vpop.f32.mrb[7].mxu1 }
 0x41e   :  { %4247 = vst [vmem:[#allocation4 + $0x40] sm:$0xff] %v4231_v45  ;;  %v4114_v4 = vmax.f32 %v3856_v14, %v3992_v50  ;;  %v4756_v25 = vadd.f32 %v3425_v6, %v2559_v0  ;;  %v2572_v59 = vadd.f32 %v6767_v54, %v7522_v7 }
 0x41f   :  { %v3932_v63 = vsel %vm1015_vm1, %v3930_v43, %v3931_v46  ;;  %v4029_v58 = vsel %vm3999_vm7, %v4027_v17, %v4028_v37  ;;  %v4089_v15 = vsel %vm3999_vm7, %v4028_v37, 0.0  ;;  %v7523_v17 = vld [vmem:[#allocation13_spill] sm:$0xff] }
 0x420   :  { %v4115_v39 = vmax.f32 %v3857_v41, %v3932_v63  ;;  %v4146_v28 = vmax.f32 %v4114_v4, %v4029_v58  ;;  %v3715_v10 = vadd.f32 %v4756_v25, %v6877_v42  ;;  %v2575_v6 = vadd.f32 %v6767_v54, %v7523_v17 }
 0x422   :  { %v4147_v1 = vmax.f32 %v4115_v39, %v4089_v15  ;;  %4178 = vst [vmem:[#allocation3 + $0x90] sm:$0xff] %v4146_v28  ;;  %v3430_v53 = vpop.f32.mrb[8].mxu1  ;;  %v7055_v28 = vld [vmem:[%s7148_s4] ss:$0 sm:$0xff]  ;;  %s5195_s4 = smov [#allocation4]  }
 0x423   :  { %v4758_v29 = vadd.f32 %v3430_v53, %v2564_v13  ;;  %v3432_v47 = vpop.f32.mrb[9].mxu1  ;;  %s4260_s24 = sshll.u32 %s5195_s4, 4  ;;  %s4261_s24 = int_to_ptr.vmem [resolvable:$true] %s4260_s24 }
 0x424   :  { %4179 = vst [vmem:[#allocation3 + $0x98] sm:$0xff] %v4147_v1  ;;  %v3433_v19 = vpop.f32.mrb[10].mxu1  ;;  %v7525_v1 = vld [vmem:[#allocation18_spill] sm:$0xff]  ;;  %s5170_s2 = scalar_lea.vmem %s4261_s24, 2048  ;;  %p5175_p1 = scmp.lt.s32.totalorder %s4261_s24, %s4261_s24 }
 0x425   :  { %v3720_v60 = vadd.f32 %v4758_v29, %v6869_v30  ;;  %v4760_v44 = vadd.f32 %v3433_v19, %v2567_v57  ;;  %v3435_v31 = vpop.f32.mrb[11].mxu1  ;;  %v2583_v53 = vadd.f32 %v7055_v28, %v7525_v1  ;;  %p5171_p0 = scmp.ne.s32.totalorder %s4261_s24, %s5170_s2  ;;  %p5176_p2 = scmp.lt.s32.totalorder %s5170_s2, %s5170_s2 }
 0x427   :  { %v3826_v42 = vmax.f32 %v3712_v52, %v3720_v60  ;;  %v3723_v14 = vadd.f32 %v4760_v44, %v6873_v3  ;;  %p5177_p3 = por %p5176_p2, %p5175_p1 }
 0x429   :  { %v3858_v35 = vmax.f32 %v3826_v42, %v3704_v18  ;;  %v3827_v43 = vmax.f32 %v3715_v10, %v3723_v14  ;;  %v7524_v10 = vld [vmem:[#allocation25_spill] sm:$0xff]  ;;  %v7526_v42 = vld [vmem:[#allocation24_spill] sm:$0xff]  ;;  %p5178_p4 = pnand %p5177_p3, %p5171_p0 }
 0x42a   :  { %v3438_v41 = vpop.f32.mrb[12].mxu1  ;;  %v2588_v7 = vadd.f32 %v7055_v28, %v7526_v42 }
 0x42b   :  { %v4210_v34 = vld [vmem:[#allocation3 + $0x90] ss:$2 sm:$0xff]  ;;  %v3933_v11 = vrot.slane %v3858_v35, 7  ;;  %v3859_v33 = vmax.f32 %v3827_v43, %v3707_v22  ;;  %v4762_v0 = vadd.f32 %v3438_v41, %v2572_v59  ;;  %v3440_v45 = vpop.f32.mrb[13].mxu1  ;;  %v4030_v50 = vrot.slane %v3858_v35, 1 }
 0x42c   :  { %v4232_v30 = vmax.f32 %v4210_v34, 0.0  ;;  %v3441_v46 = vpop.f32.mrb[14].mxu1  ;;  %v7527_v45 = vld [vmem:[#allocation23_spill] sm:$0xff] }
 0x42d   :  { %v3993_v37 = vsel %vm1015_vm1, 0.0, %v3933_v11  ;;  %v3934_v3 = vrot.slane %v3859_v33, 7  ;;  %v4031_v52 = vrot.slane %v3859_v33, 1  ;;  %v3728_v48 = vadd.f32 %v4762_v0, %v6889_v12  ;;  %v3443_v18 = vpop.f32.mrb[15].mxu1 }
 0x42e   :  { %4248 = vst [vmem:[#allocation4 + $0x48] sm:$0xff] %v4232_v30  ;;  %v4116_v4 = vmax.f32 %v3858_v35, %v3993_v37  ;;  %v4764_v25 = vadd.f32 %v3441_v46, %v2575_v6  ;;  %v2580_v12 = vadd.f32 %v7055_v28, %v7524_v10  ;;  %v2591_v17 = vadd.f32 %v7055_v28, %v7527_v45 }
 0x42f   :  { %v3935_v22 = vsel %vm1015_vm1, %v3933_v11, %v3934_v3  ;;  %v4032_v63 = vsel %vm3999_vm7, %v4030_v50, %v4031_v52  ;;  %v4090_v9 = vsel %vm3999_vm7, %v4031_v52, 0.0 }
 0x430   :  { %v4117_v58 = vmax.f32 %v3859_v33, %v3935_v22  ;;  %v4148_v39 = vmax.f32 %v4116_v4, %v4032_v63  ;;  %v3731_v54 = vadd.f32 %v4764_v25, %v6895_v26  ;;  %v7528_v22 = vld [vmem:[#allocation30_spill] sm:$0xff] }
 0x431   :  { %v2596_v63 = vadd.f32 %v7055_v28, %v7528_v22 }
 0x432   :  { %v4149_v13 = vmax.f32 %v4117_v58, %v4090_v9  ;;  %4180 = vst [vmem:[#allocation3 + $0xa0] sm:$0xff] %v4148_v39  ;;  %v3446_v15 = vpop.f32.mrb[16].mxu1 }
 0x433   :  { %v4766_v20 = vadd.f32 %v3446_v15, %v2580_v12  ;;  %v3448_v57 = vpop.f32.mrb[17].mxu1 }
 0x434   :  { %4181 = vst [vmem:[#allocation3 + $0xa8] sm:$0xff] %v4149_v13  ;;  %v3449_v26 = vpop.f32.mrb[18].mxu1  ;;  %v7530_v57 = vld [vmem:[#allocation32_spill] sm:$0xff] }
 0x435   :  { %v3736_v29 = vadd.f32 %v4766_v20, %v6887_v24  ;;  %v4768_v47 = vadd.f32 %v3449_v26, %v2583_v53  ;;  %v3451_v19 = vpop.f32.mrb[19].mxu1  ;;  %v2604_v26 = vadd.f32 %v7055_v28, %v7530_v57 }
 0x437   :  { %v3828_v44 = vmax.f32 %v3728_v48, %v3736_v29  ;;  %v3739_v31 = vadd.f32 %v4768_v47, %v6893_v56 }
 0x439   :  { %v3860_v59 = vmax.f32 %v3828_v44, %v3720_v60  ;;  %v3829_v35 = vmax.f32 %v3731_v54, %v3739_v31  ;;  %v7529_v54 = vld [vmem:[#allocation28_spill] sm:$0xff] }
 0x43a   :  { %v3454_v43 = vpop.f32.mrb[20].mxu1  ;;  %v2599_v10 = vadd.f32 %v7055_v28, %v7529_v54 }
 0x43b   :  { %v4212_v41 = vld [vmem:[#allocation3 + $0xa0] ss:$2 sm:$0xff]  ;;  %v3936_v34 = vrot.slane %v3860_v59, 7  ;;  %v3861_v11 = vmax.f32 %v3829_v35, %v3723_v14  ;;  %v4770_v33 = vadd.f32 %v3454_v43, %v2588_v7  ;;  %v3456_v0 = vpop.f32.mrb[21].mxu1  ;;  %v4033_v6 = vrot.slane %v3860_v59, 1 }
 0x43c   :  { %v4233_v24 = vmax.f32 %v4212_v41, 0.0  ;;  %v3457_v30 = vpop.f32.mrb[22].mxu1  ;;  %v7531_v41 = vld [vmem:[#allocation34_spill] sm:$0xff] }
 0x43d   :  { %v3994_v50 = vsel %vm1015_vm1, 0.0, %v3936_v34  ;;  %v3937_v56 = vrot.slane %v3861_v11, 7  ;;  %v4034_v46 = vrot.slane %v3861_v11, 1  ;;  %v3744_v37 = vadd.f32 %v4770_v33, %v6903_v27  ;;  %v3459_v60 = vpop.f32.mrb[23].mxu1 }
 0x43e   :  { %4249 = vst [vmem:[#allocation4 + $0x50] sm:$0xff] %v4233_v24  ;;  %v4118_v3 = vmax.f32 %v3860_v59, %v3994_v50  ;;  %v4772_v52 = vadd.f32 %v3457_v30, %v2591_v17 }
 0x43f   :  { %v3938_v14 = vsel %vm1015_vm1, %v3936_v34, %v3937_v56  ;;  %v4035_v48 = vsel %vm3999_vm7, %v4033_v6, %v4034_v46  ;;  %v4091_v58 = vsel %vm3999_vm7, %v4034_v46, 0.0  ;;  %v2607_v34 = vadd.f32 %v7055_v28, %v7531_v41 }
 0x440   :  { %v4119_v18 = vmax.f32 %v3861_v11, %v3938_v14  ;;  %v4150_v4 = vmax.f32 %v4118_v3, %v4035_v48  ;;  %v3747_v25 = vadd.f32 %v4772_v52, %v6909_v21  ;;  %v7533_v14 = vld [vmem:[#allocation33_spill] sm:$0xff] }
 0x441   :  { %v2615_v48 = vadd.f32 %v7055_v28, %v7533_v14  ;;  %v7539_v14 = vld [vmem:[#allocation61_spill] sm:$0xff] }
 0x442   :  { %v4151_v39 = vmax.f32 %v4119_v18, %v4091_v58  ;;  %4182 = vst [vmem:[#allocation3 + $0xb0] sm:$0xff] %v4150_v4  ;;  %v3462_v27 = vpop.f32.mrb[24].mxu1 }
 0x443   :  { %v4774_v12 = vadd.f32 %v3462_v27, %v2596_v63  ;;  %v3464_v9 = vpop.f32.mrb[25].mxu1  ;;  %v7534_v27 = vld [vmem:[#allocation42_spill] sm:$0xff] }
 0x444   :  { %4183 = vst [vmem:[#allocation3 + $0xb8] sm:$0xff] %v4151_v39  ;;  %v3465_v13 = vpop.f32.mrb[26].mxu1  ;;  %v2620_v54 = vadd.f32 %v7055_v28, %v7534_v27 }
 0x445   :  { %v3752_v15 = vadd.f32 %v4774_v12, %v6901_v36  ;;  %v4776_v1 = vadd.f32 %v3465_v13, %v2599_v10  ;;  %v3467_v53 = vpop.f32.mrb[27].mxu1 }
 0x447   :  { %v3830_v21 = vmax.f32 %v3744_v37, %v3752_v15  ;;  %v3755_v20 = vadd.f32 %v4776_v1, %v6905_v55  ;;  %v7532_v37 = vld [vmem:[#allocation37_spill] sm:$0xff] }
 0x448   :  { %v2612_v60 = vadd.f32 %v7055_v28, %v7532_v37  ;;  %v7538_v37 = vld [vmem:[#allocation59_spill] sm:$0xff] }
 0x449   :  { %v3862_v47 = vmax.f32 %v3830_v21, %v3736_v29  ;;  %v3831_v19 = vmax.f32 %v3747_v25, %v3755_v20 }
 0x44a   :  { %v3470_v44 = vpop.f32.mrb[28].mxu1 }
 0x44b   :  { %v4214_v42 = vld [vmem:[#allocation3 + $0xb0] ss:$2 sm:$0xff]  ;;  %v3939_v7 = vrot.slane %v3862_v47, 7  ;;  %v3863_v59 = vmax.f32 %v3831_v19, %v3739_v31  ;;  %v4778_v35 = vadd.f32 %v3470_v44, %v2604_v26  ;;  %v3472_v43 = vpop.f32.mrb[29].mxu1  ;;  %v4036_v11 = vrot.slane %v3862_v47, 1  ;;  %v7535_v26 = vld [vmem:[#allocation47_spill] sm:$0xff] }
 0x44c   :  { %v4234_v36 = vmax.f32 %v4214_v42, 0.0  ;;  %v3473_v33 = vpop.f32.mrb[30].mxu1 }
 0x44d   :  { %v3995_v0 = vsel %vm1015_vm1, 0.0, %v3939_v7  ;;  %v3940_v55 = vrot.slane %v3863_v59, 7  ;;  %v4037_v45 = vrot.slane %v3863_v59, 1  ;;  %v3760_v17 = vadd.f32 %v4778_v35, %v6921_v5  ;;  %v3475_v29 = vpop.f32.mrb[31].mxu1 }
 0x44e   :  { %4250 = vst [vmem:[#allocation4 + $0x58] sm:$0xff] %v4234_v36  ;;  %v4120_v24 = vmax.f32 %v3862_v47, %v3995_v0  ;;  %v4780_v6 = vadd.f32 %v3473_v33, %v2607_v34  ;;  %v2623_v47 = vadd.f32 %v7055_v28, %v7535_v26  ;;  %v7536_v33 = vld [vmem:[#allocation53_spill] sm:$0xff] }
 0x44f   :  { %v3941_v31 = vsel %vm1015_vm1, %v3939_v7, %v3940_v55  ;;  %v4038_v30 = vsel %vm3999_vm7, %v4036_v11, %v4037_v45  ;;  %v4092_v3 = vsel %vm3999_vm7, %v4037_v45, 0.0  ;;  %v2628_v0 = vadd.f32 %v7055_v28, %v7536_v33  ;;  %v7540_v26 = vld [vmem:[#allocation29_spill] sm:$0xff] }
 0x450   :  { %v4121_v50 = vmax.f32 %v3863_v59, %v3941_v31  ;;  %v4152_v56 = vmax.f32 %v4120_v24, %v4038_v30  ;;  %v3763_v46 = vadd.f32 %v4780_v6, %v6927_v32 }
 0x452   :  { %v4153_v52 = vmax.f32 %v4121_v50, %v4092_v3  ;;  %4184 = vst [vmem:[#allocation3 + $0xc0] sm:$0xff] %v4152_v56  ;;  %v3478_v5 = vpop.f32.mrb[32].mxu1 }
 0x453   :  { %v4782_v18 = vadd.f32 %v3478_v5, %v2612_v60  ;;  %v3480_v4 = vpop.f32.mrb[33].mxu1  ;;  %v2636_v60 = vadd.f32 %v7055_v28, %v7538_v37 }
 0x454   :  { %4185 = vst [vmem:[#allocation3 + $0xc8] sm:$0xff] %v4153_v52  ;;  %v3481_v25 = vpop.f32.mrb[34].mxu1 }
 0x455   :  { %v3768_v22 = vadd.f32 %v4782_v18, %v6919_v51  ;;  %v4784_v63 = vadd.f32 %v3481_v25, %v2615_v48  ;;  %v3483_v58 = vpop.f32.mrb[35].mxu1  ;;  %v2639_v48 = vadd.f32 %v7055_v28, %v7539_v14 }
 0x457   :  { %v3832_v32 = vmax.f32 %v3760_v17, %v3768_v22  ;;  %v3771_v39 = vadd.f32 %v4784_v63, %v6925_v16  ;;  %v7537_v17 = vld [vmem:[#allocation55_spill] sm:$0xff] }
 0x458   :  { %v2631_v29 = vadd.f32 %v7055_v28, %v7537_v17 }
 0x459   :  { %v3864_v10 = vmax.f32 %v3832_v32, %v3752_v15  ;;  %v3833_v12 = vmax.f32 %v3763_v46, %v3771_v39 }
 0x45a   :  { %v3486_v9 = vpop.f32.mrb[36].mxu1 }
 0x45b   :  { %v4216_v13 = vld [vmem:[#allocation3 + $0xc0] ss:$2 sm:$0xff]  ;;  %v3942_v1 = vrot.slane %v3864_v10, 7  ;;  %v3865_v53 = vmax.f32 %v3833_v12, %v3755_v20  ;;  %v4786_v21 = vadd.f32 %v3486_v9, %v2620_v54  ;;  %v3488_v57 = vpop.f32.mrb[37].mxu1  ;;  %v4039_v19 = vrot.slane %v3864_v10, 1 }
 0x45c   :  { %v4235_v51 = vmax.f32 %v4216_v13, 0.0  ;;  %v3489_v44 = vpop.f32.mrb[38].mxu1 }
 0x45d   :  { %v3996_v42 = vsel %vm1015_vm1, 0.0, %v3942_v1  ;;  %v3943_v16 = vrot.slane %v3865_v53, 7  ;;  %v4040_v7 = vrot.slane %v3865_v53, 1  ;;  %v3776_v59 = vadd.f32 %v4786_v21, %v6935_v2  ;;  %v3491_v15 = vpop.f32.mrb[39].mxu1 }
 0x45e   :  { %4251 = vst [vmem:[#allocation4 + $0x60] sm:$0xff] %v4235_v51  ;;  %v4122_v35 = vmax.f32 %v3864_v10, %v3996_v42  ;;  %v4788_v43 = vadd.f32 %v3489_v44, %v2623_v47  ;;  %v2644_v47 = vadd.f32 %v7055_v28, %v7540_v26  ;;  %v7541_v42 = vld [vmem:[#allocation65_spill] sm:$0xff] }
 0x45f   :  { %v3944_v20 = vsel %vm1015_vm1, %v3942_v1, %v3943_v16  ;;  %v4041_v41 = vsel %vm3999_vm7, %v4039_v19, %v4040_v7  ;;  %v4093_v55 = vsel %vm3999_vm7, %v4040_v7, 0.0  ;;  %v2647_v16 = vadd.f32 %v7055_v28, %v7541_v42 }
 0x460   :  { %v4123_v34 = vmax.f32 %v3865_v53, %v3944_v20  ;;  %v4154_v36 = vmax.f32 %v4122_v35, %v4041_v41  ;;  %v3779_v11 = vadd.f32 %v4788_v43, %v6941_v49 }
 0x462   :  { %v4155_v45 = vmax.f32 %v4123_v34, %v4093_v55  ;;  %4186 = vst [vmem:[#allocation3 + $0xd0] sm:$0xff] %v4154_v36  ;;  %v3494_v2 = vpop.f32.mrb[40].mxu1 }
 0x463   :  { %v4790_v24 = vadd.f32 %v3494_v2, %v2628_v0  ;;  %v3496_v6 = vpop.f32.mrb[41].mxu1 }
 0x464   :  { %4187 = vst [vmem:[#allocation3 + $0xd8] sm:$0xff] %v4155_v45  ;;  %v3497_v31 = vpop.f32.mrb[42].mxu1 }
 0x465   :  { %v3784_v30 = vadd.f32 %v4790_v24, %v6933_v8  ;;  %v4792_v50 = vadd.f32 %v3497_v31, %v2631_v29  ;;  %v3499_v56 = vpop.f32.mrb[43].mxu1 }
 0x467   :  { %v3834_v49 = vmax.f32 %v3776_v59, %v3784_v30  ;;  %v3787_v46 = vadd.f32 %v4792_v50, %v6937_v23 }
 0x469   :  { %v3866_v3 = vmax.f32 %v3834_v49, %v3768_v22  ;;  %v3835_v52 = vmax.f32 %v3779_v11, %v3787_v46 }
 0x46a   :  { %v3502_v5 = vpop.f32.mrb[44].mxu1 }
 0x46b   :  { %v4218_v18 = vld [vmem:[#allocation3 + $0xd0] ss:$2 sm:$0xff]  ;;  %v3945_v4 = vrot.slane %v3866_v3, 7  ;;  %v3867_v25 = vmax.f32 %v3835_v52, %v3771_v39  ;;  %v4794_v63 = vadd.f32 %v3502_v5, %v2636_v60  ;;  %v3504_v58 = vpop.f32.mrb[45].mxu1  ;;  %v4042_v32 = vrot.slane %v3866_v3, 1 }
 0x46c   :  { %v4236_v8 = vmax.f32 %v4218_v18, 0.0  ;;  %v3505_v27 = vpop.f32.mrb[46].mxu1 }
 0x46d   :  { %v3997_v54 = vsel %vm1015_vm1, 0.0, %v3945_v4  ;;  %v3946_v23 = vrot.slane %v3867_v25, 7  ;;  %v4043_v10 = vrot.slane %v3867_v25, 1  ;;  %v4796_v12 = vadd.f32 %v3505_v27, %v2639_v48  ;;  %v3507_v9 = vpop.f32.mrb[47].mxu1 }
 0x46e   :  { %4252 = vst [vmem:[#allocation4 + $0x68] sm:$0xff] %v4236_v8  ;;  %v4124_v22 = vmax.f32 %v3866_v3, %v3997_v54  ;;  %v3792_v13 = vadd.f32 %v4794_v63, %v6979_v40 }
 0x46f   :  { %v3947_v1 = vsel %vm1015_vm1, %v3945_v4, %v3946_v23  ;;  %v4044_v53 = vsel %vm3999_vm7, %v4042_v32, %v4043_v10  ;;  %v3795_v39 = vadd.f32 %v4796_v12, %v6985_v38  ;;  %v4094_v51 = vsel %vm3999_vm7, %v4043_v10, 0.0 }
 0x470   :  { %v4125_v21 = vmax.f32 %v3867_v25, %v3947_v1  ;;  %v4156_v57 = vmax.f32 %v4124_v22, %v4044_v53 }
 0x472   :  { %v4157_v19 = vmax.f32 %v4125_v21, %v4094_v51  ;;  %4188 = vst [vmem:[#allocation3 + $0xe0] sm:$0xff] %v4156_v57  ;;  %v3510_v44 = vpop.f32.mrb[48].mxu1 }
 0x473   :  { %v4798_v40 = vadd.f32 %v3510_v44, %v2644_v47  ;;  %v3512_v7 = vpop.f32.mrb[49].mxu1 }
 0x474   :  { %4189 = vst [vmem:[#allocation3 + $0xe8] sm:$0xff] %v4157_v19  ;;  %v3513_v59 = vpop.f32.mrb[50].mxu1 }
 0x475   :  { %v3800_v15 = vadd.f32 %v4798_v40, %v6975_v61  ;;  %v4800_v38 = vadd.f32 %v3513_v59, %v2647_v16  ;;  %v3515_v35 = vpop.f32.mrb[51].mxu1 }
 0x477   :  { %v3836_v43 = vmax.f32 %v3792_v13, %v3800_v15  ;;  %v3803_v20 = vadd.f32 %v4800_v38, %v6981_v62 }
 0x479   :  { %v3868_v41 = vmax.f32 %v3836_v43, %v3784_v30  ;;  %v3837_v34 = vmax.f32 %v3795_v39, %v3803_v20 }
 0x47b   :  { %v4220_v36 = vld [vmem:[#allocation3 + $0xe0] ss:$2 sm:$0xff]  ;;  %v3948_v11 = vrot.slane %v3868_v41, 7  ;;  %v3869_v33 = vmax.f32 %v3837_v34, %v3787_v46  ;;  %v4045_v28 = vrot.slane %v3868_v41, 1 }
 0x47c   :  { %v4237_v0 = vmax.f32 %v4220_v36, 0.0 }
 0x47d   :  { %v3998_v55 = vsel %vm1015_vm1, 0.0, %v3948_v11  ;;  %v3949_v45 = vrot.slane %v3869_v33, 7  ;;  %v4046_v2 = vrot.slane %v3869_v33, 1 }
 0x47e   :  { %4253 = vst [vmem:[#allocation4 + $0x70] sm:$0xff] %v4237_v0  ;;  %v4126_v17 = vmax.f32 %v3868_v41, %v3998_v55 }
 0x47f   :  { %v3950_v61 = vsel %vm1015_vm1, %v3948_v11, %v3949_v45  ;;  %v4047_v29 = vsel %vm3999_vm7, %v4045_v28, %v4046_v2  ;;  %v4095_v62 = vsel %vm3999_vm7, %v4046_v2, 0.0 }
 0x480   :  { %v4127_v24 = vmax.f32 %v3869_v33, %v3950_v61  ;;  %v4158_v6 = vmax.f32 %v4126_v17, %v4047_v29 }
 0x482   :  { %v4159_v31 = vmax.f32 %v4127_v24, %v4095_v62  ;;  %4190 = vst [vmem:[#allocation3 + $0xf0] sm:$0xff] %v4158_v6 }
 0x484   :  { %4191 = vst [vmem:[#allocation3 + $0xf8] sm:$0xff] %v4159_v31 }
 0x48b   :  { %v4222_v30 = vld [vmem:[#allocation3 + $0xf0] ss:$2 sm:$0xff] }
 0x48c   :  { %v4238_v50 = vmax.f32 %v4222_v30, 0.0 }
 0x48e   :  { %4254 = vst [vmem:[#allocation4 + $0x78] sm:$0xff] %v4238_v50 }
 0x48f   :  { %5181 = shalt.err (!%p5178_p4)
}
 0x490   :  { %s5182_s26 = scalar_lea.hbm %s7149_s5, 2048 }
 0x491   :  { %p5183_p5 = scmp.ne.s32.totalorder %s7149_s5, %s5182_s26  ;;  %p5186_p6 = scmp.lt.u32.totalorder %s5182_s26, %s7149_s5 }
 0x493   :  { %p5188_p7 = pnand %p5186_p6, %p5183_p5 }
 0x495   :  { %5191 = shalt.err (!%p5188_p7)
}
 0x496   :  { %s5196_s6 = smov 128   ;;  %s5197_s1 = smov 8  }
 0x497   :  { %4266 = dma.vmem_to_hbm [thread:$0]  %s4261_s24, 2048, %s7149_s5, [#allocation5], %s5196_s6, %s5196_s6, %s5197_s1  }
 0x498   :  { %5192 = dma.done.wait [#allocation5], 2048  }
 0x499   :  { %5193 = vsyncadd [#allocation5], 4294965248 }
 0x49a   :  { %4270 = vsyncpa [#allocation5], 1 }

</bundles_post_ra>
